<compile_context>
chip_gen: v7x
topology: tpu7x:2x2x1
jax: 0.10.0
libtpu: 0.0.40
codegen_flags: <defaults>
</compile_context>

<pallas_src>
import functools

import jax
import jax.numpy as jnp
from jax.experimental import pallas as pl
from jax.experimental.pallas import tpu as pltpu

LANE = 128
ACC_ROWS = 32                 # one chunk = 4 f32 vregs
NUM_ACC = 4                   # rotating partial accumulators (16 vregs total)
MAX_UNROLL_CHUNKS = 64        # fully unroll the fast fold up to 2048 rows per block
BLOCK_ROWS_MAX_DEFAULT = 2048  # 1 MiB f32 per tile (v5e/v6e); v7x uses 8192 (4 MiB)
PALLAS_MIN_ELEMS = 128 * 1024  # below this, a fused XLA pass beats any kernel launch


def _cdiv(a, b):
    return -(-a // b)


def _chip_config():
    """Generation-aware tiling / slicing defaults (safe fallback: 1 TC, 2k rows)."""
    kind = ""
    try:
        kind = (getattr(jax.devices()[0], "device_kind", "") or "").lower()
    except Exception:
        kind = ""
    is_v7 = "v7" in kind
    dual_core = is_v7 or "v4" in kind or "v5p" in kind   # two TCs / megacore
    return {
        "block_rows_max": 8192 if is_v7 else BLOCK_ROWS_MAX_DEFAULT,
        "num_slices": 2 if dual_core else 1,
        "input_buffers": 3 if is_v7 else 2,
    }


def _per_element_term(x, loss_type, real):
    """Per-element contribution whose mean reproduces the PyTorch loss (x is f32)."""
    t = 1.0 if real else 0.0  # real_label = ones(1), fake_label = zeros(1)
    if loss_type == "wgan":
        # loss = -prob.mean() if real else prob.mean()
        return -x if real else x
    if loss_type == "vgan":
        # sigmoid(x) = 0.5*tanh(0.5*x)+0.5 : one EUP push instead of exp + reciprocal.
        return 0.5 * jnp.tanh(0.5 * x) + 0.5
    if loss_type == "vgan-bce":
        # BCEWithLogitsLoss (numerically stable), mean-reduced.
        return jnp.maximum(x, 0.0) - x * t + jnp.log1p(jnp.exp(-jnp.abs(x)))
    if loss_type == "mse":
        return (x - t) ** 2
    raise NotImplementedError(loss_type)


def _finalize(total, numel, real, loss_type):
    mean_val = total / jnp.float32(numel)
    if loss_type == "vgan":
        # p = sigmoid(prob).mean(); loss = BCELoss(p, target). PyTorch clamps the log
        # terms at -100, which bounds the loss at 100 when p saturates.
        log_term = jnp.log(mean_val) if real else jnp.log(1.0 - mean_val)
        return -jnp.maximum(log_term, -100.0)
    return mean_val


def _ganloss_kernel(x_ref, out_ref, acc_ref, *, loss_type, real, block_rows,
                    chunks_per_slice, full_blocks, tail_rows, emit_fast, emit_slow):
    c = pl.program_id(0)   # slice axis ("parallel"): one per TensorCore on dual-TC parts
    j = pl.program_id(1)   # chunk axis ("arbitrary"): reduction over blocks
    g = c * chunks_per_slice + j   # nominal global block index for this grid step

    @pl.when(j == 0)
    def _():
        acc_ref[...] = jnp.zeros_like(acc_ref)

    n_chunks = block_rows // ACC_ROWS

    def chunk_term(start):
        # Fused: load ACC_ROWS x 128 rows, cast to f32, per-element transform.
        x = x_ref[pl.ds(start, ACC_ROWS), :].astype(jnp.float32)
        return _per_element_term(x, loss_type, real)

    if emit_fast:
        # Fast path: every row of this block is a valid input row (no masking).
        @pl.when(g < full_blocks)
        def _():
            parts = [jnp.zeros((ACC_ROWS, LANE), jnp.float32) for _ in range(NUM_ACC)]
            if n_chunks <= MAX_UNROLL_CHUNKS:
                for i in range(n_chunks):
                    parts[i % NUM_ACC] = parts[i % NUM_ACC] + chunk_term(i * ACC_ROWS)
            else:
                # Big (v7x) blocks: bound code size with a fori_loop over groups of
                # NUM_ACC chunks (block_rows is a multiple of NUM_ACC*ACC_ROWS then).
                def body(grp, carry):
                    base = grp * (NUM_ACC * ACC_ROWS)
                    return tuple(
                        p + chunk_term(pl.multiple_of(base + k * ACC_ROWS, ACC_ROWS))
                        for k, p in enumerate(carry))
                parts = list(jax.lax.fori_loop(0, n_chunks // NUM_ACC, body, tuple(parts)))
            blk = parts[0]
            for p in parts[1:]:
                blk = blk + p
            acc_ref[...] += blk

    if emit_slow:
        # Slow path: the single partially-valid tail block (row-granular mask) and any
        # clamped out-of-range block slots from rounding the grid up. Runs at most a
        # couple of times per kernel, so it is a plain (non-unrolled) fori_loop.
        @pl.when(g >= full_blocks)
        def _():
            row_idx = jax.lax.broadcasted_iota(jnp.int32, (ACC_ROWS, LANE), 0)
            valid_rows = jnp.where(g == full_blocks, tail_rows, 0)  # 0 for OOB slots

            def body(i, blk):
                start = pl.multiple_of(i * ACC_ROWS, ACC_ROWS)
                term = chunk_term(start)
                mask = row_idx < (valid_rows - i * ACC_ROWS)
                # Keep this a true select: masked-out rows hold garbage (possibly
                # inf/NaN through exp/log1p) and must not poison the sum.
                return blk + jnp.where(mask, term, 0.0)

            blk = jax.lax.fori_loop(0, n_chunks, body,
                                    jnp.zeros((ACC_ROWS, LANE), jnp.float32))
            acc_ref[...] += blk

    @pl.when(j == pl.num_programs(1) - 1)
    def _():
        out_ref[...] = jnp.sum(acc_ref[...], keepdims=True)   # (1, 1) per slice


def gan_loss(prob, real=False, loss_type="vgan", *, block_rows_max=None,
             pallas_min_elems=PALLAS_MIN_ELEMS):
    """Pallas implementation of GANLoss.__call__(prob, real, loss_type)."""
    if loss_type not in ("wgan", "vgan", "vgan-bce", "mse"):
        raise NotImplementedError(loss_type)

    numel = int(prob.size)
    flat = prob.reshape(-1)
    rows = numel // LANE

    cfg = _chip_config()
    if block_rows_max is None:
        block_rows_max = cfg["block_rows_max"]

    # Tiny / degenerate inputs: kernel launch + DMA setup dominates; XLA fuses this
    # into one pass over the data.
    if numel < max(int(pallas_min_elems), ACC_ROWS * LANE) or rows < ACC_ROWS:
        total = jnp.sum(_per_element_term(flat.astype(jnp.float32), loss_type, real))
        return _finalize(total, numel, real, loss_type)

    main = rows * LANE
    rem = numel - main
    # No jnp.pad full-tensor copy: the <128-element remainder is reduced in the
    # wrapper; the lane-aligned prefix is fed to the kernel as a (rows, 128) slab.
    # TODO(synk): for ragged numel XLA may still materialize the prefix slice as a
    # copy; a zero-copy path would need 1-D in-kernel tiling of the flat array.
    x2d = (flat[:main] if rem else flat).reshape(rows, LANE)

    block_rows = min(int(block_rows_max), (rows // ACC_ROWS) * ACC_ROWS)
    block_rows = max(block_rows, ACC_ROWS)
    group = ACC_ROWS * NUM_ACC
    if block_rows >= group:
        block_rows -= block_rows % group   # grouped fast fold needs divisibility

    full_blocks = rows // block_rows                 # fully-valid blocks
    tail_rows = rows - full_blocks * block_rows      # valid rows of the partial block
    total_blocks = full_blocks + (1 if tail_rows else 0)

    num_slices = min(cfg["num_slices"], total_blocks)
    chunks_per_slice = _cdiv(total_blocks, num_slices)
    grid_slots = num_slices * chunks_per_slice

    kernel = functools.partial(
        _ganloss_kernel,
        loss_type=loss_type, real=bool(real), block_rows=block_rows,
        chunks_per_slice=chunks_per_slice, full_blocks=full_blocks,
        tail_rows=tail_rows,
        emit_fast=full_blocks > 0,
        emit_slow=grid_slots > full_blocks)

    def in_map(c, j):
        g = c * chunks_per_slice + j
        # Clamp out-of-range slots (grid rounded up to num_slices*chunks_per_slice);
        # they take the masked path and contribute zero.
        return (jnp.minimum(g, total_blocks - 1), 0)

    in_spec_kwargs = {}
    if cfg["input_buffers"] != 2:   # v7x: 3-deep input pipelining hides DMA jitter
        in_spec_kwargs["pipeline_mode"] = pl.Buffered(cfg["input_buffers"])
    in_spec = pl.BlockSpec((block_rows, LANE), in_map, **in_spec_kwargs)

    partials = pl.pallas_call(
        kernel,
        out_shape=jax.ShapeDtypeStruct((num_slices, 1, 1), jnp.float32),
        grid_spec=pltpu.PrefetchScalarGridSpec(
            num_scalar_prefetch=0,
            grid=(num_slices, chunks_per_slice),
            in_specs=[in_spec],
            out_specs=pl.BlockSpec((None, 1, 1), lambda c, j: (c, 0, 0)),
            scratch_shapes=[pltpu.VMEM((ACC_ROWS, LANE), jnp.float32)]),
        compiler_params=pltpu.CompilerParams(
            dimension_semantics=("parallel", "arbitrary")),
    )(x2d)

    total = jnp.sum(partials)
    if rem:
        total = total + jnp.sum(
            _per_element_term(flat[main:].astype(jnp.float32), loss_type, real))
    return _finalize(total, numel, real, loss_type)


def _ref_gan_loss(prob, real, loss_type):
    """Pure-JAX reference mirroring the PyTorch module (independent formulation)."""
    t = 1.0 if real else 0.0
    x = prob.astype(jnp.float32)
    if loss_type == "wgan":
        return -jnp.mean(x) if real else jnp.mean(x)
    if loss_type == "vgan":
        p = jnp.mean(jax.nn.sigmoid(x))
        return -(t * jnp.log(p) + (1.0 - t) * jnp.log(1.0 - p))
    if loss_type == "vgan-bce":
        per = jnp.maximum(x, 0.0) - x * t + jnp.log1p(jnp.exp(-jnp.abs(x)))
        return jnp.mean(per)
    if loss_type == "mse":
        return jnp.mean((x - t) ** 2)
    raise NotImplementedError(loss_type)


if __name__ == "__main__":
    key = jax.random.PRNGKey(0)
    # (shape, dtype, gan_loss kwargs)
    cases = [
        # canonical discriminator output -> tiny-input fused-JAX fallback path
        ((2, 4, 16, 16), jnp.float32, dict()),
        # large enough for the Pallas path with production tiling (single 2048-row block)
        ((2, 8, 128, 128), jnp.float32, dict()),
        # forced Pallas path: multiple blocks + ragged tail rows, bf16 cast in-kernel
        ((2, 4, 32, 33), jnp.bfloat16, dict(pallas_min_elems=0, block_rows_max=32)),
        # forced Pallas path: numel % 128 != 0 -> wrapper remainder + masked tail block
        ((2, 3, 30, 30), jnp.float32, dict(pallas_min_elems=0, block_rows_max=32)),
    ]

    ok = True
    for idx, (shape, dtype, kwargs) in enumerate(cases):
        prob = jax.random.normal(jax.random.fold_in(key, idx), shape,
                                 dtype=jnp.float32).astype(dtype)
        for loss_type in ("vgan", "vgan-bce", "wgan", "mse"):
            for real in (False, True):
                got = jax.block_until_ready(
                    gan_loss(prob, real=real, loss_type=loss_type, **kwargs))
                want = _ref_gan_loss(prob, real, loss_type)
                if not jnp.allclose(got, want, rtol=2e-5, atol=2e-5):
                    ok = False
                    print(f"MISMATCH shape={shape} dtype={dtype} {loss_type} "
                          f"real={real}: {got} vs {want}")

    if ok:
        print("KERNEL_OK")
</pallas_src>

<mosaic_0001>
module attributes {stable_mosaic.version = 11 : i64} {
  func.func @_ganloss_kernel(%arg0: i32, %arg1: i32, %arg2: memref<2048x128xf32, #tpu.memory_space<vmem>>, %arg3: memref<1x1x1xf32, #tpu.memory_space<vmem>>, %arg4: memref<32x128xf32, #tpu.memory_space<vmem>>) attributes {dimension_semantics = [#tpu.dimension_semantics<parallel>, #tpu.dimension_semantics<arbitrary>], iteration_bounds = array<i64: 1, 1>, scalar_prefetch = 0 : i64, scratch_operands = 1 : i64, tpu.core_type = #tpu.core_type<tc>, window_params = [{transform_indices = @transform_0, window_bounds = array<i64: 2048, 128>}, {transform_indices = @transform_1, window_bounds = array<i64: 1, 1, 1>}]} {
    %c1_i32 = arith.constant 1 : i32
    %0 = arith.muli %arg0, %c1_i32 : i32
    %1 = arith.addi %0, %arg1 : i32
    %c0_i32 = arith.constant 0 : i32
    %2 = arith.cmpi eq, %arg1, %c0_i32 : i32
    %3 = arith.extui %2 : i1 to i32
    %c0_i32_0 = arith.constant 0 : i32
    %4 = arith.cmpi ne, %3, %c0_i32_0 : i32
    scf.if %4 {
      %cst = arith.constant 0.000000e+00 : f32
      %11 = vector.broadcast %cst : f32 to vector<32x128xf32>
      %c0 = arith.constant 0 : index
      %c0_5 = arith.constant 0 : index
      %12 = vector.load %arg4[%c0, %c0_5] : memref<32x128xf32, #tpu.memory_space<vmem>>, vector<32x128xf32>
      tpu.vector_store %arg4[%c0, %c0_5], %11 {strides = array<i32>} : memref<32x128xf32, #tpu.memory_space<vmem>>, vector<32x128xf32>,
    } else {
    }
    %c1_i32_1 = arith.constant 1 : i32
    %5 = arith.cmpi slt, %1, %c1_i32_1 : i32
    %6 = arith.extui %5 : i1 to i32
    %c0_i32_2 = arith.constant 0 : i32
    %7 = arith.cmpi ne, %6, %c0_i32_2 : i32
    scf.if %7 {
      %cst = arith.constant 0.000000e+00 : f32
      %11 = vector.broadcast %cst : f32 to vector<32x128xf32>
      %cst_5 = arith.constant 0.000000e+00 : f32
      %12 = vector.broadcast %cst_5 : f32 to vector<32x128xf32>
      %cst_6 = arith.constant 0.000000e+00 : f32
      %13 = vector.broadcast %cst_6 : f32 to vector<32x128xf32>
      %cst_7 = arith.constant 0.000000e+00 : f32
      %14 = vector.broadcast %cst_7 : f32 to vector<32x128xf32>
      %c0 = arith.constant 0 : index
      %c0_8 = arith.constant 0 : index
      %15 = vector.load %arg2[%c0, %c0_8] : memref<2048x128xf32, #tpu.memory_space<vmem>>, vector<32x128xf32>
      %cst_9 = arith.constant 5.000000e-01 : f32
      %16 = vector.broadcast %cst_9 : f32 to vector<32x128xf32>
      %17 = arith.mulf %16, %15 : vector<32x128xf32>
      %18 = math.tanh %17 : vector<32x128xf32>
      %cst_10 = arith.constant 5.000000e-01 : f32
      %19 = vector.broadcast %cst_10 : f32 to vector<32x128xf32>
      %20 = arith.mulf %19, %18 : vector<32x128xf32>
      %cst_11 = arith.constant 5.000000e-01 : f32
      %21 = vector.broadcast %cst_11 : f32 to vector<32x128xf32>
      %22 = arith.addf %20, %21 : vector<32x128xf32>
      %23 = arith.addf %11, %22 : vector<32x128xf32>
      %c32 = arith.constant 32 : index
      %c0_12 = arith.constant 0 : index
      %24 = vector.load %arg2[%c32, %c0_12] : memref<2048x128xf32, #tpu.memory_space<vmem>>, vector<32x128xf32>
      %cst_13 = arith.constant 5.000000e-01 : f32
      %25 = vector.broadcast %cst_13 : f32 to vector<32x128xf32>
      %26 = arith.mulf %25, %24 : vector<32x128xf32>
      %27 = math.tanh %26 : vector<32x128xf32>
      %cst_14 = arith.constant 5.000000e-01 : f32
      %28 = vector.broadcast %cst_14 : f32 to vector<32x128xf32>
      %29 = arith.mulf %28, %27 : vector<32x128xf32>
      %cst_15 = arith.constant 5.000000e-01 : f32
      %30 = vector.broadcast %cst_15 : f32 to vector<32x128xf32>
      %31 = arith.addf %29, %30 : vector<32x128xf32>
      %32 = arith.addf %12, %31 : vector<32x128xf32>
      %c64 = arith.constant 64 : index
      %c0_16 = arith.constant 0 : index
      %33 = vector.load %arg2[%c64, %c0_16] : memref<2048x128xf32, #tpu.memory_space<vmem>>, vector<32x128xf32>
      %cst_17 = arith.constant 5.000000e-01 : f32
      %34 = vector.broadcast %cst_17 : f32 to vector<32x128xf32>
      %35 = arith.mulf %34, %33 : vector<32x128xf32>
      %36 = math.tanh %35 : vector<32x128xf32>
      %cst_18 = arith.constant 5.000000e-01 : f32
      %37 = vector.broadcast %cst_18 : f32 to vector<32x128xf32>
      %38 = arith.mulf %37, %36 : vector<32x128xf32>
      %cst_19 = arith.constant 5.000000e-01 : f32
      %39 = vector.broadcast %cst_19 : f32 to vector<32x128xf32>
      %40 = arith.addf %38, %39 : vector<32x128xf32>
      %41 = arith.addf %13, %40 : vector<32x128xf32>
      %c96 = arith.constant 96 : index
      %c0_20 = arith.constant 0 : index
      %42 = vector.load %arg2[%c96, %c0_20] : memref<2048x128xf32, #tpu.memory_space<vmem>>, vector<32x128xf32>
      %cst_21 = arith.constant 5.000000e-01 : f32
      %43 = vector.broadcast %cst_21 : f32 to vector<32x128xf32>
      %44 = arith.mulf %43, %42 : vector<32x128xf32>
      %45 = math.tanh %44 : vector<32x128xf32>
      %cst_22 = arith.constant 5.000000e-01 : f32
      %46 = vector.broadcast %cst_22 : f32 to vector<32x128xf32>
      %47 = arith.mulf %46, %45 : vector<32x128xf32>
      %cst_23 = arith.constant 5.000000e-01 : f32
      %48 = vector.broadcast %cst_23 : f32 to vector<32x128xf32>
      %49 = arith.addf %47, %48 : vector<32x128xf32>
      %50 = arith.addf %14, %49 : vector<32x128xf32>
      %c128 = arith.constant 128 : index
      %c0_24 = arith.constant 0 : index
      %51 = vector.load %arg2[%c128, %c0_24] : memref<2048x128xf32, #tpu.memory_space<vmem>>, vector<32x128xf32>
      %cst_25 = arith.constant 5.000000e-01 : f32
      %52 = vector.broadcast %cst_25 : f32 to vector<32x128xf32>
      %53 = arith.mulf %52, %51 : vector<32x128xf32>
      %54 = math.tanh %53 : vector<32x128xf32>
      %cst_26 = arith.constant 5.000000e-01 : f32
      %55 = vector.broadcast %cst_26 : f32 to vector<32x128xf32>
      %56 = arith.mulf %55, %54 : vector<32x128xf32>
      %cst_27 = arith.constant 5.000000e-01 : f32
      %57 = vector.broadcast %cst_27 : f32 to vector<32x128xf32>
      %58 = arith.addf %56, %57 : vector<32x128xf32>
      %59 = arith.addf %23, %58 : vector<32x128xf32>
      %c160 = arith.constant 160 : index
      %c0_28 = arith.constant 0 : index
      %60 = vector.load %arg2[%c160, %c0_28] : memref<2048x128xf32, #tpu.memory_space<vmem>>, vector<32x128xf32>
      %cst_29 = arith.constant 5.000000e-01 : f32
      %61 = vector.broadcast %cst_29 : f32 to vector<32x128xf32>
      %62 = arith.mulf %61, %60 : vector<32x128xf32>
      %63 = math.tanh %62 : vector<32x128xf32>
      %cst_30 = arith.constant 5.000000e-01 : f32
      %64 = vector.broadcast %cst_30 : f32 to vector<32x128xf32>
      %65 = arith.mulf %64, %63 : vector<32x128xf32>
      %cst_31 = arith.constant 5.000000e-01 : f32
      %66 = vector.broadcast %cst_31 : f32 to vector<32x128xf32>
      %67 = arith.addf %65, %66 : vector<32x128xf32>
      %68 = arith.addf %32, %67 : vector<32x128xf32>
      %c192 = arith.constant 192 : index
      %c0_32 = arith.constant 0 : index
      %69 = vector.load %arg2[%c192, %c0_32] : memref<2048x128xf32, #tpu.memory_space<vmem>>, vector<32x128xf32>
      %cst_33 = arith.constant 5.000000e-01 : f32
      %70 = vector.broadcast %cst_33 : f32 to vector<32x128xf32>
      %71 = arith.mulf %70, %69 : vector<32x128xf32>
      %72 = math.tanh %71 : vector<32x128xf32>
      %cst_34 = arith.constant 5.000000e-01 : f32
      %73 = vector.broadcast %cst_34 : f32 to vector<32x128xf32>
      %74 = arith.mulf %73, %72 : vector<32x128xf32>
      %cst_35 = arith.constant 5.000000e-01 : f32
      %75 = vector.broadcast %cst_35 : f32 to vector<32x128xf32>
      %76 = arith.addf %74, %75 : vector<32x128xf32>
      %77 = arith.addf %41, %76 : vector<32x128xf32>
      %c224 = arith.constant 224 : index
      %c0_36 = arith.constant 0 : index
      %78 = vector.load %arg2[%c224, %c0_36] : memref<2048x128xf32, #tpu.memory_space<vmem>>, vector<32x128xf32>
      %cst_37 = arith.constant 5.000000e-01 : f32
      %79 = vector.broadcast %cst_37 : f32 to vector<32x128xf32>
      %80 = arith.mulf %79, %78 : vector<32x128xf32>
      %81 = math.tanh %80 : vector<32x128xf32>
      %cst_38 = arith.constant 5.000000e-01 : f32
      %82 = vector.broadcast %cst_38 : f32 to vector<32x128xf32>
      %83 = arith.mulf %82, %81 : vector<32x128xf32>
      %cst_39 = arith.constant 5.000000e-01 : f32
      %84 = vector.broadcast %cst_39 : f32 to vector<32x128xf32>
      %85 = arith.addf %83, %84 : vector<32x128xf32>
      %86 = arith.addf %50, %85 : vector<32x128xf32>
      %c256 = arith.constant 256 : index
      %c0_40 = arith.constant 0 : index
      %87 = vector.load %arg2[%c256, %c0_40] : memref<2048x128xf32, #tpu.memory_space<vmem>>, vector<32x128xf32>
      %cst_41 = arith.constant 5.000000e-01 : f32
      %88 = vector.broadcast %cst_41 : f32 to vector<32x128xf32>
      %89 = arith.mulf %88, %87 : vector<32x128xf32>
      %90 = math.tanh %89 : vector<32x128xf32>
      %cst_42 = arith.constant 5.000000e-01 : f32
      %91 = vector.broadcast %cst_42 : f32 to vector<32x128xf32>
      %92 = arith.mulf %91, %90 : vector<32x128xf32>
      %cst_43 = arith.constant 5.000000e-01 : f32
      %93 = vector.broadcast %cst_43 : f32 to vector<32x128xf32>
      %94 = arith.addf %92, %93 : vector<32x128xf32>
      %95 = arith.addf %59, %94 : vector<32x128xf32>
      %c288 = arith.constant 288 : index
      %c0_44 = arith.constant 0 : index
      %96 = vector.load %arg2[%c288, %c0_44] : memref<2048x128xf32, #tpu.memory_space<vmem>>, vector<32x128xf32>
      %cst_45 = arith.constant 5.000000e-01 : f32
      %97 = vector.broadcast %cst_45 : f32 to vector<32x128xf32>
      %98 = arith.mulf %97, %96 : vector<32x128xf32>
      %99 = math.tanh %98 : vector<32x128xf32>
      %cst_46 = arith.constant 5.000000e-01 : f32
      %100 = vector.broadcast %cst_46 : f32 to vector<32x128xf32>
      %101 = arith.mulf %100, %99 : vector<32x128xf32>
      %cst_47 = arith.constant 5.000000e-01 : f32
      %102 = vector.broadcast %cst_47 : f32 to vector<32x128xf32>
      %103 = arith.addf %101, %102 : vector<32x128xf32>
      %104 = arith.addf %68, %103 : vector<32x128xf32>
      %c320 = arith.constant 320 : index
      %c0_48 = arith.constant 0 : index
      %105 = vector.load %arg2[%c320, %c0_48] : memref<2048x128xf32, #tpu.memory_space<vmem>>, vector<32x128xf32>
      %cst_49 = arith.constant 5.000000e-01 : f32
      %106 = vector.broadcast %cst_49 : f32 to vector<32x128xf32>
      %107 = arith.mulf %106, %105 : vector<32x128xf32>
      %108 = math.tanh %107 : vector<32x128xf32>
      %cst_50 = arith.constant 5.000000e-01 : f32
      %109 = vector.broadcast %cst_50 : f32 to vector<32x128xf32>
      %110 = arith.mulf %109, %108 : vector<32x128xf32>
      %cst_51 = arith.constant 5.000000e-01 : f32
      %111 = vector.broadcast %cst_51 : f32 to vector<32x128xf32>
      %112 = arith.addf %110, %111 : vector<32x128xf32>
      %113 = arith.addf %77, %112 : vector<32x128xf32>
      %c352 = arith.constant 352 : index
      %c0_52 = arith.constant 0 : index
      %114 = vector.load %arg2[%c352, %c0_52] : memref<2048x128xf32, #tpu.memory_space<vmem>>, vector<32x128xf32>
      %cst_53 = arith.constant 5.000000e-01 : f32
      %115 = vector.broadcast %cst_53 : f32 to vector<32x128xf32>
      %116 = arith.mulf %115, %114 : vector<32x128xf32>
      %117 = math.tanh %116 : vector<32x128xf32>
      %cst_54 = arith.constant 5.000000e-01 : f32
      %118 = vector.broadcast %cst_54 : f32 to vector<32x128xf32>
      %119 = arith.mulf %118, %117 : vector<32x128xf32>
      %cst_55 = arith.constant 5.000000e-01 : f32
      %120 = vector.broadcast %cst_55 : f32 to vector<32x128xf32>
      %121 = arith.addf %119, %120 : vector<32x128xf32>
      %122 = arith.addf %86, %121 : vector<32x128xf32>
      %c384 = arith.constant 384 : index
      %c0_56 = arith.constant 0 : index
      %123 = vector.load %arg2[%c384, %c0_56] : memref<2048x128xf32, #tpu.memory_space<vmem>>, vector<32x128xf32>
      %cst_57 = arith.constant 5.000000e-01 : f32
      %124 = vector.broadcast %cst_57 : f32 to vector<32x128xf32>
      %125 = arith.mulf %124, %123 : vector<32x128xf32>
      %126 = math.tanh %125 : vector<32x128xf32>
      %cst_58 = arith.constant 5.000000e-01 : f32
      %127 = vector.broadcast %cst_58 : f32 to vector<32x128xf32>
      %128 = arith.mulf %127, %126 : vector<32x128xf32>
      %cst_59 = arith.constant 5.000000e-01 : f32
      %129 = vector.broadcast %cst_59 : f32 to vector<32x128xf32>
      %130 = arith.addf %128, %129 : vector<32x128xf32>
      %131 = arith.addf %95, %130 : vector<32x128xf32>
      %c416 = arith.constant 416 : index
      %c0_60 = arith.constant 0 : index
      %132 = vector.load %arg2[%c416, %c0_60] : memref<2048x128xf32, #tpu.memory_space<vmem>>, vector<32x128xf32>
      %cst_61 = arith.constant 5.000000e-01 : f32
      %133 = vector.broadcast %cst_61 : f32 to vector<32x128xf32>
      %134 = arith.mulf %133, %132 : vector<32x128xf32>
      %135 = math.tanh %134 : vector<32x128xf32>
      %cst_62 = arith.constant 5.000000e-01 : f32
      %136 = vector.broadcast %cst_62 : f32 to vector<32x128xf32>
      %137 = arith.mulf %136, %135 : vector<32x128xf32>
      %cst_63 = arith.constant 5.000000e-01 : f32
      %138 = vector.broadcast %cst_63 : f32 to vector<32x128xf32>
      %139 = arith.addf %137, %138 : vector<32x128xf32>
      %140 = arith.addf %104, %139 : vector<32x128xf32>
      %c448 = arith.constant 448 : index
      %c0_64 = arith.constant 0 : index
      %141 = vector.load %arg2[%c448, %c0_64] : memref<2048x128xf32, #tpu.memory_space<vmem>>, vector<32x128xf32>
      %cst_65 = arith.constant 5.000000e-01 : f32
      %142 = vector.broadcast %cst_65 : f32 to vector<32x128xf32>
      %143 = arith.mulf %142, %141 : vector<32x128xf32>
      %144 = math.tanh %143 : vector<32x128xf32>
      %cst_66 = arith.constant 5.000000e-01 : f32
      %145 = vector.broadcast %cst_66 : f32 to vector<32x128xf32>
      %146 = arith.mulf %145, %144 : vector<32x128xf32>
      %cst_67 = arith.constant 5.000000e-01 : f32
      %147 = vector.broadcast %cst_67 : f32 to vector<32x128xf32>
      %148 = arith.addf %146, %147 : vector<32x128xf32>
      %149 = arith.addf %113, %148 : vector<32x128xf32>
      %c480 = arith.constant 480 : index
      %c0_68 = arith.constant 0 : index
      %150 = vector.load %arg2[%c480, %c0_68] : memref<2048x128xf32, #tpu.memory_space<vmem>>, vector<32x128xf32>
      %cst_69 = arith.constant 5.000000e-01 : f32
      %151 = vector.broadcast %cst_69 : f32 to vector<32x128xf32>
      %152 = arith.mulf %151, %150 : vector<32x128xf32>
      %153 = math.tanh %152 : vector<32x128xf32>
      %cst_70 = arith.constant 5.000000e-01 : f32
      %154 = vector.broadcast %cst_70 : f32 to vector<32x128xf32>
      %155 = arith.mulf %154, %153 : vector<32x128xf32>
      %cst_71 = arith.constant 5.000000e-01 : f32
      %156 = vector.broadcast %cst_71 : f32 to vector<32x128xf32>
      %157 = arith.addf %155, %156 : vector<32x128xf32>
      %158 = arith.addf %122, %157 : vector<32x128xf32>
      %c512 = arith.constant 512 : index
      %c0_72 = arith.constant 0 : index
      %159 = vector.load %arg2[%c512, %c0_72] : memref<2048x128xf32, #tpu.memory_space<vmem>>, vector<32x128xf32>
      %cst_73 = arith.constant 5.000000e-01 : f32
      %160 = vector.broadcast %cst_73 : f32 to vector<32x128xf32>
      %161 = arith.mulf %160, %159 : vector<32x128xf32>
      %162 = math.tanh %161 : vector<32x128xf32>
      %cst_74 = arith.constant 5.000000e-01 : f32
      %163 = vector.broadcast %cst_74 : f32 to vector<32x128xf32>
      %164 = arith.mulf %163, %162 : vector<32x128xf32>
      %cst_75 = arith.constant 5.000000e-01 : f32
      %165 = vector.broadcast %cst_75 : f32 to vector<32x128xf32>
      %166 = arith.addf %164, %165 : vector<32x128xf32>
      %167 = arith.addf %131, %166 : vector<32x128xf32>
      %c544 = arith.constant 544 : index
      %c0_76 = arith.constant 0 : index
      %168 = vector.load %arg2[%c544, %c0_76] : memref<2048x128xf32, #tpu.memory_space<vmem>>, vector<32x128xf32>
      %cst_77 = arith.constant 5.000000e-01 : f32
      %169 = vector.broadcast %cst_77 : f32 to vector<32x128xf32>
      %170 = arith.mulf %169, %168 : vector<32x128xf32>
      %171 = math.tanh %170 : vector<32x128xf32>
      %cst_78 = arith.constant 5.000000e-01 : f32
      %172 = vector.broadcast %cst_78 : f32 to vector<32x128xf32>
      %173 = arith.mulf %172, %171 : vector<32x128xf32>
      %cst_79 = arith.constant 5.000000e-01 : f32
      %174 = vector.broadcast %cst_79 : f32 to vector<32x128xf32>
      %175 = arith.addf %173, %174 : vector<32x128xf32>
      %176 = arith.addf %140, %175 : vector<32x128xf32>
      %c576 = arith.constant 576 : index
      %c0_80 = arith.constant 0 : index
      %177 = vector.load %arg2[%c576, %c0_80] : memref<2048x128xf32, #tpu.memory_space<vmem>>, vector<32x128xf32>
      %cst_81 = arith.constant 5.000000e-01 : f32
      %178 = vector.broadcast %cst_81 : f32 to vector<32x128xf32>
      %179 = arith.mulf %178, %177 : vector<32x128xf32>
      %180 = math.tanh %179 : vector<32x128xf32>
      %cst_82 = arith.constant 5.000000e-01 : f32
      %181 = vector.broadcast %cst_82 : f32 to vector<32x128xf32>
      %182 = arith.mulf %181, %180 : vector<32x128xf32>
      %cst_83 = arith.constant 5.000000e-01 : f32
      %183 = vector.broadcast %cst_83 : f32 to vector<32x128xf32>
      %184 = arith.addf %182, %183 : vector<32x128xf32>
      %185 = arith.addf %149, %184 : vector<32x128xf32>
      %c608 = arith.constant 608 : index
      %c0_84 = arith.constant 0 : index
      %186 = vector.load %arg2[%c608, %c0_84] : memref<2048x128xf32, #tpu.memory_space<vmem>>, vector<32x128xf32>
      %cst_85 = arith.constant 5.000000e-01 : f32
      %187 = vector.broadcast %cst_85 : f32 to vector<32x128xf32>
      %188 = arith.mulf %187, %186 : vector<32x128xf32>
      %189 = math.tanh %188 : vector<32x128xf32>
      %cst_86 = arith.constant 5.000000e-01 : f32
      %190 = vector.broadcast %cst_86 : f32 to vector<32x128xf32>
      %191 = arith.mulf %190, %189 : vector<32x128xf32>
      %cst_87 = arith.constant 5.000000e-01 : f32
      %192 = vector.broadcast %cst_87 : f32 to vector<32x128xf32>
      %193 = arith.addf %191, %192 : vector<32x128xf32>
      %194 = arith.addf %158, %193 : vector<32x128xf32>
      %c640 = arith.constant 640 : index
      %c0_88 = arith.constant 0 : index
      %195 = vector.load %arg2[%c640, %c0_88] : memref<2048x128xf32, #tpu.memory_space<vmem>>, vector<32x128xf32>
      %cst_89 = arith.constant 5.000000e-01 : f32
      %196 = vector.broadcast %cst_89 : f32 to vector<32x128xf32>
      %197 = arith.mulf %196, %195 : vector<32x128xf32>
      %198 = math.tanh %197 : vector<32x128xf32>
      %cst_90 = arith.constant 5.000000e-01 : f32
      %199 = vector.broadcast %cst_90 : f32 to vector<32x128xf32>
      %200 = arith.mulf %199, %198 : vector<32x128xf32>
      %cst_91 = arith.constant 5.000000e-01 : f32
      %201 = vector.broadcast %cst_91 : f32 to vector<32x128xf32>
      %202 = arith.addf %200, %201 : vector<32x128xf32>
      %203 = arith.addf %167, %202 : vector<32x128xf32>
      %c672 = arith.constant 672 : index
      %c0_92 = arith.constant 0 : index
      %204 = vector.load %arg2[%c672, %c0_92] : memref<2048x128xf32, #tpu.memory_space<vmem>>, vector<32x128xf32>
      %cst_93 = arith.constant 5.000000e-01 : f32
      %205 = vector.broadcast %cst_93 : f32 to vector<32x128xf32>
      %206 = arith.mulf %205, %204 : vector<32x128xf32>
      %207 = math.tanh %206 : vector<32x128xf32>
      %cst_94 = arith.constant 5.000000e-01 : f32
      %208 = vector.broadcast %cst_94 : f32 to vector<32x128xf32>
      %209 = arith.mulf %208, %207 : vector<32x128xf32>
      %cst_95 = arith.constant 5.000000e-01 : f32
      %210 = vector.broadcast %cst_95 : f32 to vector<32x128xf32>
      %211 = arith.addf %209, %210 : vector<32x128xf32>
      %212 = arith.addf %176, %211 : vector<32x128xf32>
      %c704 = arith.constant 704 : index
      %c0_96 = arith.constant 0 : index
      %213 = vector.load %arg2[%c704, %c0_96] : memref<2048x128xf32, #tpu.memory_space<vmem>>, vector<32x128xf32>
      %cst_97 = arith.constant 5.000000e-01 : f32
      %214 = vector.broadcast %cst_97 : f32 to vector<32x128xf32>
      %215 = arith.mulf %214, %213 : vector<32x128xf32>
      %216 = math.tanh %215 : vector<32x128xf32>
      %cst_98 = arith.constant 5.000000e-01 : f32
      %217 = vector.broadcast %cst_98 : f32 to vector<32x128xf32>
      %218 = arith.mulf %217, %216 : vector<32x128xf32>
      %cst_99 = arith.constant 5.000000e-01 : f32
      %219 = vector.broadcast %cst_99 : f32 to vector<32x128xf32>
      %220 = arith.addf %218, %219 : vector<32x128xf32>
      %221 = arith.addf %185, %220 : vector<32x128xf32>
      %c736 = arith.constant 736 : index
      %c0_100 = arith.constant 0 : index
      %222 = vector.load %arg2[%c736, %c0_100] : memref<2048x128xf32, #tpu.memory_space<vmem>>, vector<32x128xf32>
      %cst_101 = arith.constant 5.000000e-01 : f32
      %223 = vector.broadcast %cst_101 : f32 to vector<32x128xf32>
      %224 = arith.mulf %223, %222 : vector<32x128xf32>
      %225 = math.tanh %224 : vector<32x128xf32>
      %cst_102 = arith.constant 5.000000e-01 : f32
      %226 = vector.broadcast %cst_102 : f32 to vector<32x128xf32>
      %227 = arith.mulf %226, %225 : vector<32x128xf32>
      %cst_103 = arith.constant 5.000000e-01 : f32
      %228 = vector.broadcast %cst_103 : f32 to vector<32x128xf32>
      %229 = arith.addf %227, %228 : vector<32x128xf32>
      %230 = arith.addf %194, %229 : vector<32x128xf32>
      %c768 = arith.constant 768 : index
      %c0_104 = arith.constant 0 : index
      %231 = vector.load %arg2[%c768, %c0_104] : memref<2048x128xf32, #tpu.memory_space<vmem>>, vector<32x128xf32>
      %cst_105 = arith.constant 5.000000e-01 : f32
      %232 = vector.broadcast %cst_105 : f32 to vector<32x128xf32>
      %233 = arith.mulf %232, %231 : vector<32x128xf32>
      %234 = math.tanh %233 : vector<32x128xf32>
      %cst_106 = arith.constant 5.000000e-01 : f32
      %235 = vector.broadcast %cst_106 : f32 to vector<32x128xf32>
      %236 = arith.mulf %235, %234 : vector<32x128xf32>
      %cst_107 = arith.constant 5.000000e-01 : f32
      %237 = vector.broadcast %cst_107 : f32 to vector<32x128xf32>
      %238 = arith.addf %236, %237 : vector<32x128xf32>
      %239 = arith.addf %203, %238 : vector<32x128xf32>
      %c800 = arith.constant 800 : index
      %c0_108 = arith.constant 0 : index
      %240 = vector.load %arg2[%c800, %c0_108] : memref<2048x128xf32, #tpu.memory_space<vmem>>, vector<32x128xf32>
      %cst_109 = arith.constant 5.000000e-01 : f32
      %241 = vector.broadcast %cst_109 : f32 to vector<32x128xf32>
      %242 = arith.mulf %241, %240 : vector<32x128xf32>
      %243 = math.tanh %242 : vector<32x128xf32>
      %cst_110 = arith.constant 5.000000e-01 : f32
      %244 = vector.broadcast %cst_110 : f32 to vector<32x128xf32>
      %245 = arith.mulf %244, %243 : vector<32x128xf32>
      %cst_111 = arith.constant 5.000000e-01 : f32
      %246 = vector.broadcast %cst_111 : f32 to vector<32x128xf32>
      %247 = arith.addf %245, %246 : vector<32x128xf32>
      %248 = arith.addf %212, %247 : vector<32x128xf32>
      %c832 = arith.constant 832 : index
      %c0_112 = arith.constant 0 : index
      %249 = vector.load %arg2[%c832, %c0_112] : memref<2048x128xf32, #tpu.memory_space<vmem>>, vector<32x128xf32>
      %cst_113 = arith.constant 5.000000e-01 : f32
      %250 = vector.broadcast %cst_113 : f32 to vector<32x128xf32>
      %251 = arith.mulf %250, %249 : vector<32x128xf32>
      %252 = math.tanh %251 : vector<32x128xf32>
      %cst_114 = arith.constant 5.000000e-01 : f32
      %253 = vector.broadcast %cst_114 : f32 to vector<32x128xf32>
      %254 = arith.mulf %253, %252 : vector<32x128xf32>
      %cst_115 = arith.constant 5.000000e-01 : f32
      %255 = vector.broadcast %cst_115 : f32 to vector<32x128xf32>
      %256 = arith.addf %254, %255 : vector<32x128xf32>
      %257 = arith.addf %221, %256 : vector<32x128xf32>
      %c864 = arith.constant 864 : index
      %c0_116 = arith.constant 0 : index
      %258 = vector.load %arg2[%c864, %c0_116] : memref<2048x128xf32, #tpu.memory_space<vmem>>, vector<32x128xf32>
      %cst_117 = arith.constant 5.000000e-01 : f32
      %259 = vector.broadcast %cst_117 : f32 to vector<32x128xf32>
      %260 = arith.mulf %259, %258 : vector<32x128xf32>
      %261 = math.tanh %260 : vector<32x128xf32>
      %cst_118 = arith.constant 5.000000e-01 : f32
      %262 = vector.broadcast %cst_118 : f32 to vector<32x128xf32>
      %263 = arith.mulf %262, %261 : vector<32x128xf32>
      %cst_119 = arith.constant 5.000000e-01 : f32
      %264 = vector.broadcast %cst_119 : f32 to vector<32x128xf32>
      %265 = arith.addf %263, %264 : vector<32x128xf32>
      %266 = arith.addf %230, %265 : vector<32x128xf32>
      %c896 = arith.constant 896 : index
      %c0_120 = arith.constant 0 : index
      %267 = vector.load %arg2[%c896, %c0_120] : memref<2048x128xf32, #tpu.memory_space<vmem>>, vector<32x128xf32>
      %cst_121 = arith.constant 5.000000e-01 : f32
      %268 = vector.broadcast %cst_121 : f32 to vector<32x128xf32>
      %269 = arith.mulf %268, %267 : vector<32x128xf32>
      %270 = math.tanh %269 : vector<32x128xf32>
      %cst_122 = arith.constant 5.000000e-01 : f32
      %271 = vector.broadcast %cst_122 : f32 to vector<32x128xf32>
      %272 = arith.mulf %271, %270 : vector<32x128xf32>
      %cst_123 = arith.constant 5.000000e-01 : f32
      %273 = vector.broadcast %cst_123 : f32 to vector<32x128xf32>
      %274 = arith.addf %272, %273 : vector<32x128xf32>
      %275 = arith.addf %239, %274 : vector<32x128xf32>
      %c928 = arith.constant 928 : index
      %c0_124 = arith.constant 0 : index
      %276 = vector.load %arg2[%c928, %c0_124] : memref<2048x128xf32, #tpu.memory_space<vmem>>, vector<32x128xf32>
      %cst_125 = arith.constant 5.000000e-01 : f32
      %277 = vector.broadcast %cst_125 : f32 to vector<32x128xf32>
      %278 = arith.mulf %277, %276 : vector<32x128xf32>
      %279 = math.tanh %278 : vector<32x128xf32>
      %cst_126 = arith.constant 5.000000e-01 : f32
      %280 = vector.broadcast %cst_126 : f32 to vector<32x128xf32>
      %281 = arith.mulf %280, %279 : vector<32x128xf32>
      %cst_127 = arith.constant 5.000000e-01 : f32
      %282 = vector.broadcast %cst_127 : f32 to vector<32x128xf32>
      %283 = arith.addf %281, %282 : vector<32x128xf32>
      %284 = arith.addf %248, %283 : vector<32x128xf32>
      %c960 = arith.constant 960 : index
      %c0_128 = arith.constant 0 : index
      %285 = vector.load %arg2[%c960, %c0_128] : memref<2048x128xf32, #tpu.memory_space<vmem>>, vector<32x128xf32>
      %cst_129 = arith.constant 5.000000e-01 : f32
      %286 = vector.broadcast %cst_129 : f32 to vector<32x128xf32>
      %287 = arith.mulf %286, %285 : vector<32x128xf32>
      %288 = math.tanh %287 : vector<32x128xf32>
      %cst_130 = arith.constant 5.000000e-01 : f32
      %289 = vector.broadcast %cst_130 : f32 to vector<32x128xf32>
      %290 = arith.mulf %289, %288 : vector<32x128xf32>
      %cst_131 = arith.constant 5.000000e-01 : f32
      %291 = vector.broadcast %cst_131 : f32 to vector<32x128xf32>
      %292 = arith.addf %290, %291 : vector<32x128xf32>
      %293 = arith.addf %257, %292 : vector<32x128xf32>
      %c992 = arith.constant 992 : index
      %c0_132 = arith.constant 0 : index
      %294 = vector.load %arg2[%c992, %c0_132] : memref<2048x128xf32, #tpu.memory_space<vmem>>, vector<32x128xf32>
      %cst_133 = arith.constant 5.000000e-01 : f32
      %295 = vector.broadcast %cst_133 : f32 to vector<32x128xf32>
      %296 = arith.mulf %295, %294 : vector<32x128xf32>
      %297 = math.tanh %296 : vector<32x128xf32>
      %cst_134 = arith.constant 5.000000e-01 : f32
      %298 = vector.broadcast %cst_134 : f32 to vector<32x128xf32>
      %299 = arith.mulf %298, %297 : vector<32x128xf32>
      %cst_135 = arith.constant 5.000000e-01 : f32
      %300 = vector.broadcast %cst_135 : f32 to vector<32x128xf32>
      %301 = arith.addf %299, %300 : vector<32x128xf32>
      %302 = arith.addf %266, %301 : vector<32x128xf32>
      %c1024 = arith.constant 1024 : index
      %c0_136 = arith.constant 0 : index
      %303 = vector.load %arg2[%c1024, %c0_136] : memref<2048x128xf32, #tpu.memory_space<vmem>>, vector<32x128xf32>
      %cst_137 = arith.constant 5.000000e-01 : f32
      %304 = vector.broadcast %cst_137 : f32 to vector<32x128xf32>
      %305 = arith.mulf %304, %303 : vector<32x128xf32>
      %306 = math.tanh %305 : vector<32x128xf32>
      %cst_138 = arith.constant 5.000000e-01 : f32
      %307 = vector.broadcast %cst_138 : f32 to vector<32x128xf32>
      %308 = arith.mulf %307, %306 : vector<32x128xf32>
      %cst_139 = arith.constant 5.000000e-01 : f32
      %309 = vector.broadcast %cst_139 : f32 to vector<32x128xf32>
      %310 = arith.addf %308, %309 : vector<32x128xf32>
      %311 = arith.addf %275, %310 : vector<32x128xf32>
      %c1056 = arith.constant 1056 : index
      %c0_140 = arith.constant 0 : index
      %312 = vector.load %arg2[%c1056, %c0_140] : memref<2048x128xf32, #tpu.memory_space<vmem>>, vector<32x128xf32>
      %cst_141 = arith.constant 5.000000e-01 : f32
      %313 = vector.broadcast %cst_141 : f32 to vector<32x128xf32>
      %314 = arith.mulf %313, %312 : vector<32x128xf32>
      %315 = math.tanh %314 : vector<32x128xf32>
      %cst_142 = arith.constant 5.000000e-01 : f32
      %316 = vector.broadcast %cst_142 : f32 to vector<32x128xf32>
      %317 = arith.mulf %316, %315 : vector<32x128xf32>
      %cst_143 = arith.constant 5.000000e-01 : f32
      %318 = vector.broadcast %cst_143 : f32 to vector<32x128xf32>
      %319 = arith.addf %317, %318 : vector<32x128xf32>
      %320 = arith.addf %284, %319 : vector<32x128xf32>
      %c1088 = arith.constant 1088 : index
      %c0_144 = arith.constant 0 : index
      %321 = vector.load %arg2[%c1088, %c0_144] : memref<2048x128xf32, #tpu.memory_space<vmem>>, vector<32x128xf32>
      %cst_145 = arith.constant 5.000000e-01 : f32
      %322 = vector.broadcast %cst_145 : f32 to vector<32x128xf32>
      %323 = arith.mulf %322, %321 : vector<32x128xf32>
      %324 = math.tanh %323 : vector<32x128xf32>
      %cst_146 = arith.constant 5.000000e-01 : f32
      %325 = vector.broadcast %cst_146 : f32 to vector<32x128xf32>
      %326 = arith.mulf %325, %324 : vector<32x128xf32>
      %cst_147 = arith.constant 5.000000e-01 : f32
      %327 = vector.broadcast %cst_147 : f32 to vector<32x128xf32>
      %328 = arith.addf %326, %327 : vector<32x128xf32>
      %329 = arith.addf %293, %328 : vector<32x128xf32>
      %c1120 = arith.constant 1120 : index
      %c0_148 = arith.constant 0 : index
      %330 = vector.load %arg2[%c1120, %c0_148] : memref<2048x128xf32, #tpu.memory_space<vmem>>, vector<32x128xf32>
      %cst_149 = arith.constant 5.000000e-01 : f32
      %331 = vector.broadcast %cst_149 : f32 to vector<32x128xf32>
      %332 = arith.mulf %331, %330 : vector<32x128xf32>
      %333 = math.tanh %332 : vector<32x128xf32>
      %cst_150 = arith.constant 5.000000e-01 : f32
      %334 = vector.broadcast %cst_150 : f32 to vector<32x128xf32>
      %335 = arith.mulf %334, %333 : vector<32x128xf32>
      %cst_151 = arith.constant 5.000000e-01 : f32
      %336 = vector.broadcast %cst_151 : f32 to vector<32x128xf32>
      %337 = arith.addf %335, %336 : vector<32x128xf32>
      %338 = arith.addf %302, %337 : vector<32x128xf32>
      %c1152 = arith.constant 1152 : index
      %c0_152 = arith.constant 0 : index
      %339 = vector.load %arg2[%c1152, %c0_152] : memref<2048x128xf32, #tpu.memory_space<vmem>>, vector<32x128xf32>
      %cst_153 = arith.constant 5.000000e-01 : f32
      %340 = vector.broadcast %cst_153 : f32 to vector<32x128xf32>
      %341 = arith.mulf %340, %339 : vector<32x128xf32>
      %342 = math.tanh %341 : vector<32x128xf32>
      %cst_154 = arith.constant 5.000000e-01 : f32
      %343 = vector.broadcast %cst_154 : f32 to vector<32x128xf32>
      %344 = arith.mulf %343, %342 : vector<32x128xf32>
      %cst_155 = arith.constant 5.000000e-01 : f32
      %345 = vector.broadcast %cst_155 : f32 to vector<32x128xf32>
      %346 = arith.addf %344, %345 : vector<32x128xf32>
      %347 = arith.addf %311, %346 : vector<32x128xf32>
      %c1184 = arith.constant 1184 : index
      %c0_156 = arith.constant 0 : index
      %348 = vector.load %arg2[%c1184, %c0_156] : memref<2048x128xf32, #tpu.memory_space<vmem>>, vector<32x128xf32>
      %cst_157 = arith.constant 5.000000e-01 : f32
      %349 = vector.broadcast %cst_157 : f32 to vector<32x128xf32>
      %350 = arith.mulf %349, %348 : vector<32x128xf32>
      %351 = math.tanh %350 : vector<32x128xf32>
      %cst_158 = arith.constant 5.000000e-01 : f32
      %352 = vector.broadcast %cst_158 : f32 to vector<32x128xf32>
      %353 = arith.mulf %352, %351 : vector<32x128xf32>
      %cst_159 = arith.constant 5.000000e-01 : f32
      %354 = vector.broadcast %cst_159 : f32 to vector<32x128xf32>
      %355 = arith.addf %353, %354 : vector<32x128xf32>
      %356 = arith.addf %320, %355 : vector<32x128xf32>
      %c1216 = arith.constant 1216 : index
      %c0_160 = arith.constant 0 : index
      %357 = vector.load %arg2[%c1216, %c0_160] : memref<2048x128xf32, #tpu.memory_space<vmem>>, vector<32x128xf32>
      %cst_161 = arith.constant 5.000000e-01 : f32
      %358 = vector.broadcast %cst_161 : f32 to vector<32x128xf32>
      %359 = arith.mulf %358, %357 : vector<32x128xf32>
      %360 = math.tanh %359 : vector<32x128xf32>
      %cst_162 = arith.constant 5.000000e-01 : f32
      %361 = vector.broadcast %cst_162 : f32 to vector<32x128xf32>
      %362 = arith.mulf %361, %360 : vector<32x128xf32>
      %cst_163 = arith.constant 5.000000e-01 : f32
      %363 = vector.broadcast %cst_163 : f32 to vector<32x128xf32>
      %364 = arith.addf %362, %363 : vector<32x128xf32>
      %365 = arith.addf %329, %364 : vector<32x128xf32>
      %c1248 = arith.constant 1248 : index
      %c0_164 = arith.constant 0 : index
      %366 = vector.load %arg2[%c1248, %c0_164] : memref<2048x128xf32, #tpu.memory_space<vmem>>, vector<32x128xf32>
      %cst_165 = arith.constant 5.000000e-01 : f32
      %367 = vector.broadcast %cst_165 : f32 to vector<32x128xf32>
      %368 = arith.mulf %367, %366 : vector<32x128xf32>
      %369 = math.tanh %368 : vector<32x128xf32>
      %cst_166 = arith.constant 5.000000e-01 : f32
      %370 = vector.broadcast %cst_166 : f32 to vector<32x128xf32>
      %371 = arith.mulf %370, %369 : vector<32x128xf32>
      %cst_167 = arith.constant 5.000000e-01 : f32
      %372 = vector.broadcast %cst_167 : f32 to vector<32x128xf32>
      %373 = arith.addf %371, %372 : vector<32x128xf32>
      %374 = arith.addf %338, %373 : vector<32x128xf32>
      %c1280 = arith.constant 1280 : index
      %c0_168 = arith.constant 0 : index
      %375 = vector.load %arg2[%c1280, %c0_168] : memref<2048x128xf32, #tpu.memory_space<vmem>>, vector<32x128xf32>
      %cst_169 = arith.constant 5.000000e-01 : f32
      %376 = vector.broadcast %cst_169 : f32 to vector<32x128xf32>
      %377 = arith.mulf %376, %375 : vector<32x128xf32>
      %378 = math.tanh %377 : vector<32x128xf32>
      %cst_170 = arith.constant 5.000000e-01 : f32
      %379 = vector.broadcast %cst_170 : f32 to vector<32x128xf32>
      %380 = arith.mulf %379, %378 : vector<32x128xf32>
      %cst_171 = arith.constant 5.000000e-01 : f32
      %381 = vector.broadcast %cst_171 : f32 to vector<32x128xf32>
      %382 = arith.addf %380, %381 : vector<32x128xf32>
      %383 = arith.addf %347, %382 : vector<32x128xf32>
      %c1312 = arith.constant 1312 : index
      %c0_172 = arith.constant 0 : index
      %384 = vector.load %arg2[%c1312, %c0_172] : memref<2048x128xf32, #tpu.memory_space<vmem>>, vector<32x128xf32>
      %cst_173 = arith.constant 5.000000e-01 : f32
      %385 = vector.broadcast %cst_173 : f32 to vector<32x128xf32>
      %386 = arith.mulf %385, %384 : vector<32x128xf32>
      %387 = math.tanh %386 : vector<32x128xf32>
      %cst_174 = arith.constant 5.000000e-01 : f32
      %388 = vector.broadcast %cst_174 : f32 to vector<32x128xf32>
      %389 = arith.mulf %388, %387 : vector<32x128xf32>
      %cst_175 = arith.constant 5.000000e-01 : f32
      %390 = vector.broadcast %cst_175 : f32 to vector<32x128xf32>
      %391 = arith.addf %389, %390 : vector<32x128xf32>
      %392 = arith.addf %356, %391 : vector<32x128xf32>
      %c1344 = arith.constant 1344 : index
      %c0_176 = arith.constant 0 : index
      %393 = vector.load %arg2[%c1344, %c0_176] : memref<2048x128xf32, #tpu.memory_space<vmem>>, vector<32x128xf32>
      %cst_177 = arith.constant 5.000000e-01 : f32
      %394 = vector.broadcast %cst_177 : f32 to vector<32x128xf32>
      %395 = arith.mulf %394, %393 : vector<32x128xf32>
      %396 = math.tanh %395 : vector<32x128xf32>
      %cst_178 = arith.constant 5.000000e-01 : f32
      %397 = vector.broadcast %cst_178 : f32 to vector<32x128xf32>
      %398 = arith.mulf %397, %396 : vector<32x128xf32>
      %cst_179 = arith.constant 5.000000e-01 : f32
      %399 = vector.broadcast %cst_179 : f32 to vector<32x128xf32>
      %400 = arith.addf %398, %399 : vector<32x128xf32>
      %401 = arith.addf %365, %400 : vector<32x128xf32>
      %c1376 = arith.constant 1376 : index
      %c0_180 = arith.constant 0 : index
      %402 = vector.load %arg2[%c1376, %c0_180] : memref<2048x128xf32, #tpu.memory_space<vmem>>, vector<32x128xf32>
      %cst_181 = arith.constant 5.000000e-01 : f32
      %403 = vector.broadcast %cst_181 : f32 to vector<32x128xf32>
      %404 = arith.mulf %403, %402 : vector<32x128xf32>
      %405 = math.tanh %404 : vector<32x128xf32>
      %cst_182 = arith.constant 5.000000e-01 : f32
      %406 = vector.broadcast %cst_182 : f32 to vector<32x128xf32>
      %407 = arith.mulf %406, %405 : vector<32x128xf32>
      %cst_183 = arith.constant 5.000000e-01 : f32
      %408 = vector.broadcast %cst_183 : f32 to vector<32x128xf32>
      %409 = arith.addf %407, %408 : vector<32x128xf32>
      %410 = arith.addf %374, %409 : vector<32x128xf32>
      %c1408 = arith.constant 1408 : index
      %c0_184 = arith.constant 0 : index
      %411 = vector.load %arg2[%c1408, %c0_184] : memref<2048x128xf32, #tpu.memory_space<vmem>>, vector<32x128xf32>
      %cst_185 = arith.constant 5.000000e-01 : f32
      %412 = vector.broadcast %cst_185 : f32 to vector<32x128xf32>
      %413 = arith.mulf %412, %411 : vector<32x128xf32>
      %414 = math.tanh %413 : vector<32x128xf32>
      %cst_186 = arith.constant 5.000000e-01 : f32
      %415 = vector.broadcast %cst_186 : f32 to vector<32x128xf32>
      %416 = arith.mulf %415, %414 : vector<32x128xf32>
      %cst_187 = arith.constant 5.000000e-01 : f32
      %417 = vector.broadcast %cst_187 : f32 to vector<32x128xf32>
      %418 = arith.addf %416, %417 : vector<32x128xf32>
      %419 = arith.addf %383, %418 : vector<32x128xf32>
      %c1440 = arith.constant 1440 : index
      %c0_188 = arith.constant 0 : index
      %420 = vector.load %arg2[%c1440, %c0_188] : memref<2048x128xf32, #tpu.memory_space<vmem>>, vector<32x128xf32>
      %cst_189 = arith.constant 5.000000e-01 : f32
      %421 = vector.broadcast %cst_189 : f32 to vector<32x128xf32>
      %422 = arith.mulf %421, %420 : vector<32x128xf32>
      %423 = math.tanh %422 : vector<32x128xf32>
      %cst_190 = arith.constant 5.000000e-01 : f32
      %424 = vector.broadcast %cst_190 : f32 to vector<32x128xf32>
      %425 = arith.mulf %424, %423 : vector<32x128xf32>
      %cst_191 = arith.constant 5.000000e-01 : f32
      %426 = vector.broadcast %cst_191 : f32 to vector<32x128xf32>
      %427 = arith.addf %425, %426 : vector<32x128xf32>
      %428 = arith.addf %392, %427 : vector<32x128xf32>
      %c1472 = arith.constant 1472 : index
      %c0_192 = arith.constant 0 : index
      %429 = vector.load %arg2[%c1472, %c0_192] : memref<2048x128xf32, #tpu.memory_space<vmem>>, vector<32x128xf32>
      %cst_193 = arith.constant 5.000000e-01 : f32
      %430 = vector.broadcast %cst_193 : f32 to vector<32x128xf32>
      %431 = arith.mulf %430, %429 : vector<32x128xf32>
      %432 = math.tanh %431 : vector<32x128xf32>
      %cst_194 = arith.constant 5.000000e-01 : f32
      %433 = vector.broadcast %cst_194 : f32 to vector<32x128xf32>
      %434 = arith.mulf %433, %432 : vector<32x128xf32>
      %cst_195 = arith.constant 5.000000e-01 : f32
      %435 = vector.broadcast %cst_195 : f32 to vector<32x128xf32>
      %436 = arith.addf %434, %435 : vector<32x128xf32>
      %437 = arith.addf %401, %436 : vector<32x128xf32>
      %c1504 = arith.constant 1504 : index
      %c0_196 = arith.constant 0 : index
      %438 = vector.load %arg2[%c1504, %c0_196] : memref<2048x128xf32, #tpu.memory_space<vmem>>, vector<32x128xf32>
      %cst_197 = arith.constant 5.000000e-01 : f32
      %439 = vector.broadcast %cst_197 : f32 to vector<32x128xf32>
      %440 = arith.mulf %439, %438 : vector<32x128xf32>
      %441 = math.tanh %440 : vector<32x128xf32>
      %cst_198 = arith.constant 5.000000e-01 : f32
      %442 = vector.broadcast %cst_198 : f32 to vector<32x128xf32>
      %443 = arith.mulf %442, %441 : vector<32x128xf32>
      %cst_199 = arith.constant 5.000000e-01 : f32
      %444 = vector.broadcast %cst_199 : f32 to vector<32x128xf32>
      %445 = arith.addf %443, %444 : vector<32x128xf32>
      %446 = arith.addf %410, %445 : vector<32x128xf32>
      %c1536 = arith.constant 1536 : index
      %c0_200 = arith.constant 0 : index
      %447 = vector.load %arg2[%c1536, %c0_200] : memref<2048x128xf32, #tpu.memory_space<vmem>>, vector<32x128xf32>
      %cst_201 = arith.constant 5.000000e-01 : f32
      %448 = vector.broadcast %cst_201 : f32 to vector<32x128xf32>
      %449 = arith.mulf %448, %447 : vector<32x128xf32>
      %450 = math.tanh %449 : vector<32x128xf32>
      %cst_202 = arith.constant 5.000000e-01 : f32
      %451 = vector.broadcast %cst_202 : f32 to vector<32x128xf32>
      %452 = arith.mulf %451, %450 : vector<32x128xf32>
      %cst_203 = arith.constant 5.000000e-01 : f32
      %453 = vector.broadcast %cst_203 : f32 to vector<32x128xf32>
      %454 = arith.addf %452, %453 : vector<32x128xf32>
      %455 = arith.addf %419, %454 : vector<32x128xf32>
      %c1568 = arith.constant 1568 : index
      %c0_204 = arith.constant 0 : index
      %456 = vector.load %arg2[%c1568, %c0_204] : memref<2048x128xf32, #tpu.memory_space<vmem>>, vector<32x128xf32>
      %cst_205 = arith.constant 5.000000e-01 : f32
      %457 = vector.broadcast %cst_205 : f32 to vector<32x128xf32>
      %458 = arith.mulf %457, %456 : vector<32x128xf32>
      %459 = math.tanh %458 : vector<32x128xf32>
      %cst_206 = arith.constant 5.000000e-01 : f32
      %460 = vector.broadcast %cst_206 : f32 to vector<32x128xf32>
      %461 = arith.mulf %460, %459 : vector<32x128xf32>
      %cst_207 = arith.constant 5.000000e-01 : f32
      %462 = vector.broadcast %cst_207 : f32 to vector<32x128xf32>
      %463 = arith.addf %461, %462 : vector<32x128xf32>
      %464 = arith.addf %428, %463 : vector<32x128xf32>
      %c1600 = arith.constant 1600 : index
      %c0_208 = arith.constant 0 : index
      %465 = vector.load %arg2[%c1600, %c0_208] : memref<2048x128xf32, #tpu.memory_space<vmem>>, vector<32x128xf32>
      %cst_209 = arith.constant 5.000000e-01 : f32
      %466 = vector.broadcast %cst_209 : f32 to vector<32x128xf32>
      %467 = arith.mulf %466, %465 : vector<32x128xf32>
      %468 = math.tanh %467 : vector<32x128xf32>
      %cst_210 = arith.constant 5.000000e-01 : f32
      %469 = vector.broadcast %cst_210 : f32 to vector<32x128xf32>
      %470 = arith.mulf %469, %468 : vector<32x128xf32>
      %cst_211 = arith.constant 5.000000e-01 : f32
      %471 = vector.broadcast %cst_211 : f32 to vector<32x128xf32>
      %472 = arith.addf %470, %471 : vector<32x128xf32>
      %473 = arith.addf %437, %472 : vector<32x128xf32>
      %c1632 = arith.constant 1632 : index
      %c0_212 = arith.constant 0 : index
      %474 = vector.load %arg2[%c1632, %c0_212] : memref<2048x128xf32, #tpu.memory_space<vmem>>, vector<32x128xf32>
      %cst_213 = arith.constant 5.000000e-01 : f32
      %475 = vector.broadcast %cst_213 : f32 to vector<32x128xf32>
      %476 = arith.mulf %475, %474 : vector<32x128xf32>
      %477 = math.tanh %476 : vector<32x128xf32>
      %cst_214 = arith.constant 5.000000e-01 : f32
      %478 = vector.broadcast %cst_214 : f32 to vector<32x128xf32>
      %479 = arith.mulf %478, %477 : vector<32x128xf32>
      %cst_215 = arith.constant 5.000000e-01 : f32
      %480 = vector.broadcast %cst_215 : f32 to vector<32x128xf32>
      %481 = arith.addf %479, %480 : vector<32x128xf32>
      %482 = arith.addf %446, %481 : vector<32x128xf32>
      %c1664 = arith.constant 1664 : index
      %c0_216 = arith.constant 0 : index
      %483 = vector.load %arg2[%c1664, %c0_216] : memref<2048x128xf32, #tpu.memory_space<vmem>>, vector<32x128xf32>
      %cst_217 = arith.constant 5.000000e-01 : f32
      %484 = vector.broadcast %cst_217 : f32 to vector<32x128xf32>
      %485 = arith.mulf %484, %483 : vector<32x128xf32>
      %486 = math.tanh %485 : vector<32x128xf32>
      %cst_218 = arith.constant 5.000000e-01 : f32
      %487 = vector.broadcast %cst_218 : f32 to vector<32x128xf32>
      %488 = arith.mulf %487, %486 : vector<32x128xf32>
      %cst_219 = arith.constant 5.000000e-01 : f32
      %489 = vector.broadcast %cst_219 : f32 to vector<32x128xf32>
      %490 = arith.addf %488, %489 : vector<32x128xf32>
      %491 = arith.addf %455, %490 : vector<32x128xf32>
      %c1696 = arith.constant 1696 : index
      %c0_220 = arith.constant 0 : index
      %492 = vector.load %arg2[%c1696, %c0_220] : memref<2048x128xf32, #tpu.memory_space<vmem>>, vector<32x128xf32>
      %cst_221 = arith.constant 5.000000e-01 : f32
      %493 = vector.broadcast %cst_221 : f32 to vector<32x128xf32>
      %494 = arith.mulf %493, %492 : vector<32x128xf32>
      %495 = math.tanh %494 : vector<32x128xf32>
      %cst_222 = arith.constant 5.000000e-01 : f32
      %496 = vector.broadcast %cst_222 : f32 to vector<32x128xf32>
      %497 = arith.mulf %496, %495 : vector<32x128xf32>
      %cst_223 = arith.constant 5.000000e-01 : f32
      %498 = vector.broadcast %cst_223 : f32 to vector<32x128xf32>
      %499 = arith.addf %497, %498 : vector<32x128xf32>
      %500 = arith.addf %464, %499 : vector<32x128xf32>
      %c1728 = arith.constant 1728 : index
      %c0_224 = arith.constant 0 : index
      %501 = vector.load %arg2[%c1728, %c0_224] : memref<2048x128xf32, #tpu.memory_space<vmem>>, vector<32x128xf32>
      %cst_225 = arith.constant 5.000000e-01 : f32
      %502 = vector.broadcast %cst_225 : f32 to vector<32x128xf32>
      %503 = arith.mulf %502, %501 : vector<32x128xf32>
      %504 = math.tanh %503 : vector<32x128xf32>
      %cst_226 = arith.constant 5.000000e-01 : f32
      %505 = vector.broadcast %cst_226 : f32 to vector<32x128xf32>
      %506 = arith.mulf %505, %504 : vector<32x128xf32>
      %cst_227 = arith.constant 5.000000e-01 : f32
      %507 = vector.broadcast %cst_227 : f32 to vector<32x128xf32>
      %508 = arith.addf %506, %507 : vector<32x128xf32>
      %509 = arith.addf %473, %508 : vector<32x128xf32>
      %c1760 = arith.constant 1760 : index
      %c0_228 = arith.constant 0 : index
      %510 = vector.load %arg2[%c1760, %c0_228] : memref<2048x128xf32, #tpu.memory_space<vmem>>, vector<32x128xf32>
      %cst_229 = arith.constant 5.000000e-01 : f32
      %511 = vector.broadcast %cst_229 : f32 to vector<32x128xf32>
      %512 = arith.mulf %511, %510 : vector<32x128xf32>
      %513 = math.tanh %512 : vector<32x128xf32>
      %cst_230 = arith.constant 5.000000e-01 : f32
      %514 = vector.broadcast %cst_230 : f32 to vector<32x128xf32>
      %515 = arith.mulf %514, %513 : vector<32x128xf32>
      %cst_231 = arith.constant 5.000000e-01 : f32
      %516 = vector.broadcast %cst_231 : f32 to vector<32x128xf32>
      %517 = arith.addf %515, %516 : vector<32x128xf32>
      %518 = arith.addf %482, %517 : vector<32x128xf32>
      %c1792 = arith.constant 1792 : index
      %c0_232 = arith.constant 0 : index
      %519 = vector.load %arg2[%c1792, %c0_232] : memref<2048x128xf32, #tpu.memory_space<vmem>>, vector<32x128xf32>
      %cst_233 = arith.constant 5.000000e-01 : f32
      %520 = vector.broadcast %cst_233 : f32 to vector<32x128xf32>
      %521 = arith.mulf %520, %519 : vector<32x128xf32>
      %522 = math.tanh %521 : vector<32x128xf32>
      %cst_234 = arith.constant 5.000000e-01 : f32
      %523 = vector.broadcast %cst_234 : f32 to vector<32x128xf32>
      %524 = arith.mulf %523, %522 : vector<32x128xf32>
      %cst_235 = arith.constant 5.000000e-01 : f32
      %525 = vector.broadcast %cst_235 : f32 to vector<32x128xf32>
      %526 = arith.addf %524, %525 : vector<32x128xf32>
      %527 = arith.addf %491, %526 : vector<32x128xf32>
      %c1824 = arith.constant 1824 : index
      %c0_236 = arith.constant 0 : index
      %528 = vector.load %arg2[%c1824, %c0_236] : memref<2048x128xf32, #tpu.memory_space<vmem>>, vector<32x128xf32>
      %cst_237 = arith.constant 5.000000e-01 : f32
      %529 = vector.broadcast %cst_237 : f32 to vector<32x128xf32>
      %530 = arith.mulf %529, %528 : vector<32x128xf32>
      %531 = math.tanh %530 : vector<32x128xf32>
      %cst_238 = arith.constant 5.000000e-01 : f32
      %532 = vector.broadcast %cst_238 : f32 to vector<32x128xf32>
      %533 = arith.mulf %532, %531 : vector<32x128xf32>
      %cst_239 = arith.constant 5.000000e-01 : f32
      %534 = vector.broadcast %cst_239 : f32 to vector<32x128xf32>
      %535 = arith.addf %533, %534 : vector<32x128xf32>
      %536 = arith.addf %500, %535 : vector<32x128xf32>
      %c1856 = arith.constant 1856 : index
      %c0_240 = arith.constant 0 : index
      %537 = vector.load %arg2[%c1856, %c0_240] : memref<2048x128xf32, #tpu.memory_space<vmem>>, vector<32x128xf32>
      %cst_241 = arith.constant 5.000000e-01 : f32
      %538 = vector.broadcast %cst_241 : f32 to vector<32x128xf32>
      %539 = arith.mulf %538, %537 : vector<32x128xf32>
      %540 = math.tanh %539 : vector<32x128xf32>
      %cst_242 = arith.constant 5.000000e-01 : f32
      %541 = vector.broadcast %cst_242 : f32 to vector<32x128xf32>
      %542 = arith.mulf %541, %540 : vector<32x128xf32>
      %cst_243 = arith.constant 5.000000e-01 : f32
      %543 = vector.broadcast %cst_243 : f32 to vector<32x128xf32>
      %544 = arith.addf %542, %543 : vector<32x128xf32>
      %545 = arith.addf %509, %544 : vector<32x128xf32>
      %c1888 = arith.constant 1888 : index
      %c0_244 = arith.constant 0 : index
      %546 = vector.load %arg2[%c1888, %c0_244] : memref<2048x128xf32, #tpu.memory_space<vmem>>, vector<32x128xf32>
      %cst_245 = arith.constant 5.000000e-01 : f32
      %547 = vector.broadcast %cst_245 : f32 to vector<32x128xf32>
      %548 = arith.mulf %547, %546 : vector<32x128xf32>
      %549 = math.tanh %548 : vector<32x128xf32>
      %cst_246 = arith.constant 5.000000e-01 : f32
      %550 = vector.broadcast %cst_246 : f32 to vector<32x128xf32>
      %551 = arith.mulf %550, %549 : vector<32x128xf32>
      %cst_247 = arith.constant 5.000000e-01 : f32
      %552 = vector.broadcast %cst_247 : f32 to vector<32x128xf32>
      %553 = arith.addf %551, %552 : vector<32x128xf32>
      %554 = arith.addf %518, %553 : vector<32x128xf32>
      %c1920 = arith.constant 1920 : index
      %c0_248 = arith.constant 0 : index
      %555 = vector.load %arg2[%c1920, %c0_248] : memref<2048x128xf32, #tpu.memory_space<vmem>>, vector<32x128xf32>
      %cst_249 = arith.constant 5.000000e-01 : f32
      %556 = vector.broadcast %cst_249 : f32 to vector<32x128xf32>
      %557 = arith.mulf %556, %555 : vector<32x128xf32>
      %558 = math.tanh %557 : vector<32x128xf32>
      %cst_250 = arith.constant 5.000000e-01 : f32
      %559 = vector.broadcast %cst_250 : f32 to vector<32x128xf32>
      %560 = arith.mulf %559, %558 : vector<32x128xf32>
      %cst_251 = arith.constant 5.000000e-01 : f32
      %561 = vector.broadcast %cst_251 : f32 to vector<32x128xf32>
      %562 = arith.addf %560, %561 : vector<32x128xf32>
      %563 = arith.addf %527, %562 : vector<32x128xf32>
      %c1952 = arith.constant 1952 : index
      %c0_252 = arith.constant 0 : index
      %564 = vector.load %arg2[%c1952, %c0_252] : memref<2048x128xf32, #tpu.memory_space<vmem>>, vector<32x128xf32>
      %cst_253 = arith.constant 5.000000e-01 : f32
      %565 = vector.broadcast %cst_253 : f32 to vector<32x128xf32>
      %566 = arith.mulf %565, %564 : vector<32x128xf32>
      %567 = math.tanh %566 : vector<32x128xf32>
      %cst_254 = arith.constant 5.000000e-01 : f32
      %568 = vector.broadcast %cst_254 : f32 to vector<32x128xf32>
      %569 = arith.mulf %568, %567 : vector<32x128xf32>
      %cst_255 = arith.constant 5.000000e-01 : f32
      %570 = vector.broadcast %cst_255 : f32 to vector<32x128xf32>
      %571 = arith.addf %569, %570 : vector<32x128xf32>
      %572 = arith.addf %536, %571 : vector<32x128xf32>
      %c1984 = arith.constant 1984 : index
      %c0_256 = arith.constant 0 : index
      %573 = vector.load %arg2[%c1984, %c0_256] : memref<2048x128xf32, #tpu.memory_space<vmem>>, vector<32x128xf32>
      %cst_257 = arith.constant 5.000000e-01 : f32
      %574 = vector.broadcast %cst_257 : f32 to vector<32x128xf32>
      %575 = arith.mulf %574, %573 : vector<32x128xf32>
      %576 = math.tanh %575 : vector<32x128xf32>
      %cst_258 = arith.constant 5.000000e-01 : f32
      %577 = vector.broadcast %cst_258 : f32 to vector<32x128xf32>
      %578 = arith.mulf %577, %576 : vector<32x128xf32>
      %cst_259 = arith.constant 5.000000e-01 : f32
      %579 = vector.broadcast %cst_259 : f32 to vector<32x128xf32>
      %580 = arith.addf %578, %579 : vector<32x128xf32>
      %581 = arith.addf %545, %580 : vector<32x128xf32>
      %c2016 = arith.constant 2016 : index
      %c0_260 = arith.constant 0 : index
      %582 = vector.load %arg2[%c2016, %c0_260] : memref<2048x128xf32, #tpu.memory_space<vmem>>, vector<32x128xf32>
      %cst_261 = arith.constant 5.000000e-01 : f32
      %583 = vector.broadcast %cst_261 : f32 to vector<32x128xf32>
      %584 = arith.mulf %583, %582 : vector<32x128xf32>
      %585 = math.tanh %584 : vector<32x128xf32>
      %cst_262 = arith.constant 5.000000e-01 : f32
      %586 = vector.broadcast %cst_262 : f32 to vector<32x128xf32>
      %587 = arith.mulf %586, %585 : vector<32x128xf32>
      %cst_263 = arith.constant 5.000000e-01 : f32
      %588 = vector.broadcast %cst_263 : f32 to vector<32x128xf32>
      %589 = arith.addf %587, %588 : vector<32x128xf32>
      %590 = arith.addf %554, %589 : vector<32x128xf32>
      %591 = arith.addf %563, %572 : vector<32x128xf32>
      %592 = arith.addf %591, %581 : vector<32x128xf32>
      %593 = arith.addf %592, %590 : vector<32x128xf32>
      %c0_264 = arith.constant 0 : index
      %c0_265 = arith.constant 0 : index
      %594 = vector.load %arg4[%c0_264, %c0_265] : memref<32x128xf32, #tpu.memory_space<vmem>>, vector<32x128xf32>
      %595 = arith.addf %594, %593 : vector<32x128xf32>
      %c0_266 = arith.constant 0 : index
      %c0_267 = arith.constant 0 : index
      %596 = vector.load %arg4[%c0_266, %c0_267] : memref<32x128xf32, #tpu.memory_space<vmem>>, vector<32x128xf32>
      tpu.vector_store %arg4[%c0_266, %c0_267], %595 {strides = array<i32>} : memref<32x128xf32, #tpu.memory_space<vmem>>, vector<32x128xf32>,
    } else {
    }
    %c0_i32_3 = arith.constant 0 : i32
    %8 = arith.cmpi eq, %arg1, %c0_i32_3 : i32
    %9 = arith.extui %8 : i1 to i32
    %c0_i32_4 = arith.constant 0 : i32
    %10 = arith.cmpi ne, %9, %c0_i32_4 : i32
    scf.if %10 {
      %c0 = arith.constant 0 : index
      %c0_5 = arith.constant 0 : index
      %11 = vector.load %arg4[%c0, %c0_5] : memref<32x128xf32, #tpu.memory_space<vmem>>, vector<32x128xf32>
      %12 = vector.shape_cast %11 : vector<32x128xf32> to vector<1x32x128xf32>
      %cst = arith.constant dense<0.000000e+00> : vector<1xf32>
      %13 = vector.multi_reduction <add>, %12, %cst [1, 2] : vector<1x32x128xf32> to vector<1xf32>
      %14 = vector.shape_cast %13 : vector<1xf32> to vector<1x1x1xf32>
      %15 = vector.extract %14[0, 0, 0] : f32 from vector<1x1x1xf32>
      %16 = vector.broadcast %15 : f32 to vector<1x1xf32>
      %c0_6 = arith.constant 0 : index
      %c0_7 = arith.constant 0 : index
      %c0_8 = arith.constant 0 : index
      %17 = vector.load %arg3[%c0_6, %c0_7, %c0_8] : memref<1x1x1xf32, #tpu.memory_space<vmem>>, vector<1x1x1xf32>
      %18 = vector.shape_cast %17 : vector<1x1x1xf32> to vector<1x1xf32>
      %19 = vector.shape_cast %16 : vector<1x1xf32> to vector<1x1x1xf32>
      tpu.vector_store %arg3[%c0_6, %c0_7, %c0_8], %19 {strides = array<i32>} : memref<1x1x1xf32, #tpu.memory_space<vmem>>, vector<1x1x1xf32>,
    } else {
    }
    return
  }
  func.func @transform_0(%arg0: i32, %arg1: i32) -> (i32, i32) {
    %c1_i32 = arith.constant 1 : i32
    %0 = arith.muli %arg0, %c1_i32 : i32
    %1 = arith.addi %0, %arg1 : i32
    %c0_i32 = arith.constant 0 : i32
    %2 = arith.minsi %1, %c0_i32 : i32
    %c0_i32_0 = arith.constant 0 : i32
    %c0_i32_1 = arith.constant 0 : i32
    return %2, %c0_i32_0 : i32, i32
  }
  func.func @transform_1(%arg0: i32, %arg1: i32) -> (i32, i32, i32) {
    %c0_i32 = arith.constant 0 : i32
    %c0_i32_0 = arith.constant 0 : i32
    %c0_i32_1 = arith.constant 0 : i32
    return %arg0, %c0_i32, %c0_i32_0 : i32, i32, i32
  }
}

</mosaic_0001>

<bundles_post_ra>
// kernel: tpu_custom_call.1
= control target key start
LH: loop header
LB: loop body
LE: loop exit
PB: predicated region body
PF: predicated region fallthrough
CT: control target
= control target key end

     0   :  { %6 = vsyncpa [#allocation4], 0  ;;  %s3095_s0 = inlined_call_operand.hbm [shape: f32[2048,128], index: 0, kind: input, shape index: {}]   ;;  %s3096_s1 = inlined_call_operand.hbm [shape: f32[1,1,1], index: 1, kind: output, shape index: {}]  }
   0x1   :  { %7 = vsyncpa [#allocation5], 0  ;;  %s2211_s6 = smov [#allocation3]   ;;  %s2163_s10 = scalar_lea.hbm %s3095_s0, 32768 }
   0x2   :  { %s19_s7 = sshll.u32 %s2211_s6, 4  ;;  %p2164_p0 = scmp.ne.s32.totalorder %s3095_s0, %s2163_s10  ;;  %s20_s7 = int_to_ptr.vmem [resolvable:$true] %s19_s7 }
   0x3   :  { %p2167_p1 = scmp.lt.u32.totalorder %s2163_s10, %s3095_s0 }
   0x5   :  { %p2169_p2 = pnand %p2167_p1, %p2164_p0 }
   0x7   :  { %2172 = shalt.err (!%p2169_p2)
}
   0x8   :  { %s2173_s15 = scalar_lea.vmem %s20_s7, 32768  ;;  %p2178_p4 = scmp.lt.s32.totalorder %s20_s7, %s20_s7 }
   0x9   :  { %p2174_p3 = scmp.ne.s32.totalorder %s20_s7, %s2173_s15  ;;  %p2179_p5 = scmp.lt.s32.totalorder %s2173_s15, %s2173_s15 }
   0xb   :  { %p2180_p6 = por %p2179_p5, %p2178_p4 }
   0xd   :  { %p2181_p7 = pnand %p2180_p6, %p2174_p3 }
   0xf   :  { %2184 = shalt.err (!%p2181_p7)
}
  0x10   :  { %s2212_s16 = smov 128   ;;  %s2213_s17 = smov 8  }
  0x11   :  { %25 = dma.hbm_to_vmem [thread:$0]  %s3095_s0, 32768, %s20_s7, [#allocation4], %s2212_s16, %s2212_s16, %s2213_s17  }
  0x12   :  { %2207 = dma.done.wait [#allocation4], 32768  }
  0x13   :  { %2208 = vsyncadd [#allocation4], 4294934528  ;;  %v46_v0 = vld [vmem:[#allocation3] sm:$0xff]  ;;  %v47_v1 = vld [vmem:[#allocation3 + $0x8] sm:$0xff]  ;;  %s2214_s0 = smov [#allocation6]   ;;  %vm1626_vm0 = vcmask 0  }
  0x14   :  { %v48_v2 = vld [vmem:[#allocation3 + $0x10] sm:$0xff]  ;;  %v49_v3 = vld [vmem:[#allocation3 + $0x18] sm:$0xff]  ;;  %v50_v4 = vmul.f32 0.5, %v46_v0  ;;  %v51_v5 = vmul.f32 0.5, %v47_v1  ;;  %v70_v7 = vld [vmem:[#allocation3 + $0x20] sm:$0xff]  ;;  %s1634_s20 = sshll.u32 %s2214_s0, 4  ;;  %s1635_s20 = int_to_ptr.vmem [resolvable:$true] %s1634_s20 }
  0x15   :  { %v52_v6 = vmul.f32 0.5, %v48_v2  ;;  %v71_v8 = vld [vmem:[#allocation3 + $0x28] sm:$0xff]  ;;  %v53_v9 = vmul.f32 0.5, %v49_v3  ;;  %v72_v10 = vld [vmem:[#allocation3 + $0x30] sm:$0xff]  ;;  %v73_v11 = vld [vmem:[#allocation3 + $0x38] sm:$0xff]  ;;  %v74_v13 = vmul.f32 0.5, %v70_v7  ;;  %p2190_p9 = scmp.lt.s32.totalorder %s1635_s20, %s1635_s20 }
  0x16   :  { %v94_v12 = vld [vmem:[#allocation3 + $0x40] sm:$0xff]  ;;  %1651 = vtanh.f32 %v50_v4  ;;  %v95_v14 = vld [vmem:[#allocation3 + $0x48] sm:$0xff]  ;;  %v96_v15 = vld [vmem:[#allocation3 + $0x50] sm:$0xff]  ;;  %v75_v17 = vmul.f32 0.5, %v71_v8  ;;  %v76_v21 = vmul.f32 0.5, %v72_v10  ;;  %v77_v22 = vmul.f32 0.5, %v73_v11 }
  0x17   :  { %v97_v16 = vld [vmem:[#allocation3 + $0x58] sm:$0xff]  ;;  %1653 = vtanh.f32 %v51_v5  ;;  %v118_v18 = vld [vmem:[#allocation3 + $0x60] sm:$0xff]  ;;  %v119_v19 = vld [vmem:[#allocation3 + $0x68] sm:$0xff]  ;;  %v98_v23 = vmul.f32 0.5, %v94_v12  ;;  %v99_v27 = vmul.f32 0.5, %v95_v14  ;;  %v100_v28 = vmul.f32 0.5, %v96_v15 }
  0x18   :  { %v120_v20 = vld [vmem:[#allocation3 + $0x70] sm:$0xff]  ;;  %1655 = vtanh.f32 %v52_v6  ;;  %v121_v24 = vld [vmem:[#allocation3 + $0x78] sm:$0xff]  ;;  %v142_v25 = vld [vmem:[#allocation3 + $0x80] sm:$0xff]  ;;  %v101_v29 = vmul.f32 0.5, %v97_v16  ;;  %v122_v33 = vmul.f32 0.5, %v118_v18  ;;  %v123_v34 = vmul.f32 0.5, %v119_v19 }
  0x19   :  { %v143_v26 = vld [vmem:[#allocation3 + $0x88] sm:$0xff]  ;;  %1657 = vtanh.f32 %v53_v9  ;;  %v144_v30 = vld [vmem:[#allocation3 + $0x90] sm:$0xff]  ;;  %v145_v31 = vld [vmem:[#allocation3 + $0x98] sm:$0xff]  ;;  %v2237_v35 = vmul.f32 0.5, %v120_v20  ;;  %v2239_v39 = vmul.f32 0.5, %v121_v24  ;;  %v2241_v40 = vmul.f32 0.5, %v142_v25 }
  0x1a   :  { %v166_v32 = vld [vmem:[#allocation3 + $0xa0] sm:$0xff]  ;;  %1659 = vtanh.f32 %v74_v13  ;;  %v167_v36 = vld [vmem:[#allocation3 + $0xa8] sm:$0xff]  ;;  %v168_v37 = vld [vmem:[#allocation3 + $0xb0] sm:$0xff]  ;;  %v2243_v41 = vmul.f32 0.5, %v143_v26  ;;  %v2245_v45 = vmul.f32 0.5, %v144_v30  ;;  %v2247_v46 = vmul.f32 0.5, %v145_v31 }
  0x1b   :  { %v169_v38 = vld [vmem:[#allocation3 + $0xb8] sm:$0xff]  ;;  %1661 = vtanh.f32 %v75_v17  ;;  %v190_v42 = vld [vmem:[#allocation3 + $0xc0] sm:$0xff]  ;;  %v191_v43 = vld [vmem:[#allocation3 + $0xc8] sm:$0xff]  ;;  %v2249_v47 = vmul.f32 0.5, %v166_v32  ;;  %v2251_v51 = vmul.f32 0.5, %v167_v36  ;;  %v2253_v52 = vmul.f32 0.5, %v168_v37 }
  0x1c   :  { %v192_v44 = vld [vmem:[#allocation3 + $0xd0] sm:$0xff]  ;;  %1663 = vtanh.f32 %v76_v21  ;;  %v193_v48 = vld [vmem:[#allocation3 + $0xd8] sm:$0xff]  ;;  %v214_v49 = vld [vmem:[#allocation3 + $0xe0] sm:$0xff]  ;;  %v2255_v53 = vmul.f32 0.5, %v169_v38  ;;  %v2257_v57 = vmul.f32 0.5, %v190_v42  ;;  %v2259_v58 = vmul.f32 0.5, %v191_v43 }
  0x1d   :  { %v215_v50 = vld [vmem:[#allocation3 + $0xe8] sm:$0xff]  ;;  %1665 = vtanh.f32 %v77_v22  ;;  %v216_v54 = vld [vmem:[#allocation3 + $0xf0] sm:$0xff]  ;;  %v217_v55 = vld [vmem:[#allocation3 + $0xf8] sm:$0xff]  ;;  %v2261_v59 = vmul.f32 0.5, %v192_v44  ;;  %v2263_v62 = vmul.f32 0.5, %v193_v48  ;;  %v2265_v63 = vmul.f32 0.5, %v214_v49 }
  0x1e   :  { %v238_v56 = vld [vmem:[#allocation3 + $0x100] sm:$0xff]  ;;  %1667 = vtanh.f32 %v98_v23  ;;  %v239_v60 = vld [vmem:[#allocation3 + $0x108] sm:$0xff]  ;;  %v240_v61 = vld [vmem:[#allocation3 + $0x110] sm:$0xff]  ;;  %v2267_v0 = vmul.f32 0.5, %v215_v50  ;;  %v2269_v4 = vmul.f32 0.5, %v216_v54  ;;  %v2271_v5 = vmul.f32 0.5, %v217_v55 }
  0x1f   :  { %1669 = vtanh.f32 %v99_v27  ;;  %v241_v1 = vld [vmem:[#allocation3 + $0x118] sm:$0xff]  ;;  %v262_v2 = vld [vmem:[#allocation3 + $0x120] sm:$0xff]  ;;  %v2273_v6 = vmul.f32 0.5, %v238_v56  ;;  %v263_v7 = vld [vmem:[#allocation3 + $0x128] sm:$0xff]  ;;  %v2275_v11 = vmul.f32 0.5, %v239_v60  ;;  %v2277_v12 = vmul.f32 0.5, %v240_v61 }
  0x20   :  { %v1652_v3 = vpop.eup %1651  ;;  %1671 = vtanh.f32 %v100_v28  ;;  %v264_v8 = vld [vmem:[#allocation3 + $0x130] sm:$0xff]  ;;  %v265_v13 = vld [vmem:[#allocation3 + $0x138] sm:$0xff]  ;;  %v286_v14 = vld [vmem:[#allocation3 + $0x140] sm:$0xff]  ;;  %v2279_v17 = vmul.f32 0.5, %v241_v1  ;;  %v2281_v18 = vmul.f32 0.5, %v262_v2  ;;  %v2283_v23 = vmul.f32 0.5, %v263_v7 }
  0x21   :  { %v1654_v9 = vpop.eup %1653  ;;  %v58_v10 = vmul.f32 0.5, %v1652_v3  ;;  %1673 = vtanh.f32 %v101_v29  ;;  %v287_v19 = vld [vmem:[#allocation3 + $0x148] sm:$0xff]  ;;  %v288_v20 = vld [vmem:[#allocation3 + $0x150] sm:$0xff]  ;;  %v2285_v24 = vmul.f32 0.5, %v264_v8  ;;  %v289_v25 = vld [vmem:[#allocation3 + $0x158] sm:$0xff]  ;;  %v2288_v28 = vmul.f32 0.5, %v265_v13 }
  0x22   :  { %v1656_v15 = vpop.eup %1655  ;;  %v59_v16 = vmul.f32 0.5, %v1654_v9  ;;  %1675 = vtanh.f32 %v122_v33  ;;  %v2290_v29 = vmul.f32 0.5, %v286_v14  ;;  %v310_v30 = vld [vmem:[#allocation3 + $0x160] sm:$0xff]  ;;  %v2295_v33 = vmul.f32 0.5, %v287_v19  ;;  %v311_v36 = vld [vmem:[#allocation3 + $0x168] sm:$0xff]  ;;  %v312_v43 = vld [vmem:[#allocation3 + $0x170] sm:$0xff] }
  0x23   :  { %v1658_v21 = vpop.eup %1657  ;;  %v60_v22 = vmul.f32 0.5, %v1656_v15  ;;  %1677 = vtanh.f32 %v123_v34  ;;  %v2292_v32 = vadd.f32 0.5, %v58_v10  ;;  %v2297_v34 = vmul.f32 0.5, %v288_v20  ;;  %s2185_s22 = scalar_lea.vmem %s1635_s20, 16  ;;  %s2189_s23 = scalar_lea.vmem %s1635_s20, 32 }
  0x24   :  { %v1660_v26 = vpop.eup %1659  ;;  %v61_v27 = vmul.f32 0.5, %v1658_v21  ;;  %1679 = vtanh.f32 %v2237_v35  ;;  %v2299_v38 = vadd.f32 0.5, %v59_v16  ;;  %v2302_v35 = vmul.f32 0.5, %v289_v25  ;;  %v337_v16 = vld [vmem:[#allocation3 + $0x198] sm:$0xff]  ;;  %p2186_p8 = scmp.ne.s32.totalorder %s1635_s20, %s2185_s22  ;;  %p2191_p10 = scmp.lt.s32.totalorder %s2189_s23, %s2185_s22 }
  0x25   :  { %v1662_v31 = vpop.eup %1661  ;;  %1681 = vtanh.f32 %v2239_v39  ;;  %v82_v42 = vmul.f32 0.5, %v1660_v26  ;;  %v2304_v48 = vadd.f32 0.5, %v60_v22  ;;  %v313_v39 = vld [vmem:[#allocation3 + $0x178] sm:$0xff]  ;;  %v2307_v50 = vmul.f32 0.5, %v310_v30  ;;  %v359_v30 = vld [vmem:[#allocation3 + $0x1a8] sm:$0xff] }
  0x26   :  { %v1664_v37 = vpop.eup %1663  ;;  %1683 = vtanh.f32 %v2241_v40  ;;  %v83_v49 = vmul.f32 0.5, %v1662_v31  ;;  %v2309_v55 = vadd.f32 0.5, %v61_v27  ;;  %v2312_v60 = vmul.f32 0.5, %v311_v36  ;;  %v334_v40 = vld [vmem:[#allocation3 + $0x180] sm:$0xff]  ;;  %p2192_p11 = por %p2191_p10, %p2190_p9 }
  0x27   :  { %v1666_v44 = vpop.eup %1665  ;;  %1685 = vtanh.f32 %v2243_v41  ;;  %v84_v56 = vmul.f32 0.5, %v1664_v37  ;;  %v2315_v3 = vmul.f32 0.5, %v312_v43  ;;  %v335_v41 = vld [vmem:[#allocation3 + $0x188] sm:$0xff]  ;;  %v2317_v8 = vadd.f32 0.5, %v82_v42  ;;  %v360_v42 = vld [vmem:[#allocation3 + $0x1b0] sm:$0xff] }
  0x28   :  { %v1668_v54 = vpop.eup %1667  ;;  %1687 = vtanh.f32 %v2245_v45  ;;  %v85_v1 = vmul.f32 0.5, %v1666_v44  ;;  %v2320_v10 = vmul.f32 0.5, %v313_v39  ;;  %v336_v45 = vld [vmem:[#allocation3 + $0x190] sm:$0xff]  ;;  %v2322_v14 = vadd.f32 0.5, %v83_v49  ;;  %v361_v39 = vld [vmem:[#allocation3 + $0x1b8] sm:$0xff]  ;;  %p2193_p12 = pnand %p2192_p11, %p2186_p8 }
  0x29   :  { %v1670_v61 = vpop.eup %1669  ;;  %v106_v2 = vmul.f32 0.5, %v1668_v54  ;;  %1689 = vtanh.f32 %v2247_v46  ;;  %v2325_v46 = vmul.f32 0.5, %v334_v40  ;;  %v2327_v20 = vadd.f32 0.5, %v84_v56 }
  0x2a   :  { %v1672_v7 = vpop.eup %1671  ;;  %v107_v9 = vmul.f32 0.5, %v1670_v61  ;;  %1691 = vtanh.f32 %v2249_v47  ;;  %v2330_v22 = vmul.f32 0.5, %v335_v41  ;;  %v358_v47 = vld [vmem:[#allocation3 + $0x1a0] sm:$0xff]  ;;  %v2332_v26 = vadd.f32 0.5, %v85_v1 }
  0x2b   :  { %v1674_v13 = vpop.eup %1673  ;;  %v108_v15 = vmul.f32 0.5, %v1672_v7  ;;  %1693 = vtanh.f32 %v2251_v51  ;;  %v2334_v27 = vadd.f32 0.5, %v106_v2  ;;  %v2337_v51 = vmul.f32 0.5, %v336_v45 }
  0x2c   :  { %v1676_v19 = vpop.eup %1675  ;;  %v109_v21 = vmul.f32 0.5, %v1674_v13  ;;  %1695 = vtanh.f32 %v2253_v52  ;;  %v2339_v36 = vadd.f32 0.5, %v107_v9  ;;  %v2342_v52 = vmul.f32 0.5, %v337_v16 }
  0x2d   :  { %v1678_v25 = vpop.eup %1677  ;;  %1697 = vtanh.f32 %v2255_v53  ;;  %v130_v37 = vmul.f32 0.5, %v1676_v19  ;;  %v2344_v44 = vadd.f32 0.5, %v108_v15  ;;  %v2347_v53 = vmul.f32 0.5, %v358_v47 }
  0x2e   :  { %v1680_v31 = vpop.eup %1679  ;;  %1699 = vtanh.f32 %v2257_v57  ;;  %v131_v49 = vmul.f32 0.5, %v1678_v25  ;;  %v2349_v56 = vadd.f32 0.5, %v109_v21  ;;  %v2352_v61 = vmul.f32 0.5, %v359_v30  ;;  %v382_v57 = vld [vmem:[#allocation3 + $0x1c0] sm:$0xff]  ;;  %v384_v21 = vld [vmem:[#allocation3 + $0x1d0] sm:$0xff] }
  0x2f   :  { %v1682_v43 = vpop.eup %1681  ;;  %1701 = vtanh.f32 %v2259_v58  ;;  %v132_v40 = vmul.f32 0.5, %v1680_v31  ;;  %v2355_v7 = vmul.f32 0.5, %v360_v42  ;;  %v383_v58 = vld [vmem:[#allocation3 + $0x1c8] sm:$0xff]  ;;  %v2357_v45 = vadd.f32 0.5, %v130_v37  ;;  %v385_v31 = vld [vmem:[#allocation3 + $0x1d8] sm:$0xff] }
  0x30   :  { %v1684_v54 = vpop.eup %1683  ;;  %1703 = vtanh.f32 %v2261_v59  ;;  %v133_v2 = vmul.f32 0.5, %v1682_v43  ;;  %v2360_v15 = vmul.f32 0.5, %v361_v39  ;;  %v2362_v16 = vadd.f32 0.5, %v131_v49 }
  0x31   :  { %v1686_v1 = vpop.eup %1685  ;;  %v154_v41 = vmul.f32 0.5, %v1684_v54  ;;  %1705 = vtanh.f32 %v2263_v62  ;;  %v2365_v47 = vmul.f32 0.5, %v382_v57  ;;  %v2367_v25 = vadd.f32 0.5, %v132_v40 }
  0x32   :  { %v1688_v9 = vpop.eup %1687  ;;  %v155_v13 = vmul.f32 0.5, %v1686_v1  ;;  %1707 = vtanh.f32 %v2265_v63  ;;  %v2370_v37 = vmul.f32 0.5, %v383_v58  ;;  %v2372_v42 = vadd.f32 0.5, %v133_v2 }
  0x33   :  { %v1690_v59 = vpop.eup %1689  ;;  %v156_v19 = vmul.f32 0.5, %v1688_v9  ;;  %1709 = vtanh.f32 %v2267_v0  ;;  %v158_v43 = vadd.f32 0.5, %v154_v41  ;;  %v406_v0 = vld [vmem:[#allocation3 + $0x1e0] sm:$0xff]  ;;  %v2376_v40 = vmul.f32 0.5, %v384_v21 }
  0x34   :  { %v1692_v62 = vpop.eup %1691  ;;  %v157_v30 = vmul.f32 0.5, %v1690_v59  ;;  %1711 = vtanh.f32 %v2269_v4  ;;  %v159_v54 = vadd.f32 0.5, %v155_v13  ;;  %v2379_v58 = vmul.f32 0.5, %v385_v31 }
  0x35   :  { %v1694_v63 = vpop.eup %1693  ;;  %v178_v49 = vmul.f32 0.5, %v1692_v62  ;;  %1713 = vtanh.f32 %v2271_v5  ;;  %v160_v4 = vadd.f32 0.5, %v156_v19  ;;  %v2382_v5 = vmul.f32 0.5, %v406_v0 }
  0x36   :  { %v1696_v39 = vpop.eup %1695  ;;  %v179_v57 = vmul.f32 0.5, %v1694_v63  ;;  %1715 = vtanh.f32 %v2273_v6  ;;  %v161_v41 = vadd.f32 0.5, %v157_v30  ;;  %v2385_v62 = vadd.f32 %v158_v43, %v2292_v32 }
  0x37   :  { %v1698_v1 = vpop.eup %1697  ;;  %v180_v9 = vmul.f32 0.5, %v1696_v39  ;;  %1717 = vtanh.f32 %v2275_v11  ;;  %v182_v6 = vadd.f32 0.5, %v178_v49  ;;  %v2389_v11 = vadd.f32 %v159_v54, %v2299_v38 }
  0x38   :  { %v1700_v2 = vpop.eup %1699  ;;  %v181_v59 = vmul.f32 0.5, %v1698_v1  ;;  %1719 = vtanh.f32 %v2277_v12  ;;  %v183_v31 = vadd.f32 0.5, %v179_v57  ;;  %v2393_v12 = vadd.f32 %v160_v4, %v2304_v48 }
  0x39   :  { %v1702_v13 = vpop.eup %1701  ;;  %v202_v21 = vmul.f32 0.5, %v1700_v2  ;;  %1721 = vtanh.f32 %v2279_v17  ;;  %v184_v0 = vadd.f32 0.5, %v180_v9  ;;  %v2397_v43 = vadd.f32 %v161_v41, %v2309_v55 }
  0x3a   :  { %v1704_v19 = vpop.eup %1703  ;;  %v203_v63 = vmul.f32 0.5, %v1702_v13  ;;  %1723 = vtanh.f32 %v2281_v18  ;;  %v185_v17 = vadd.f32 0.5, %v181_v59  ;;  %v2401_v54 = vadd.f32 %v182_v6, %v2317_v8 }
  0x3b   :  { %v1706_v30 = vpop.eup %1705  ;;  %v204_v39 = vmul.f32 0.5, %v1704_v19  ;;  %1725 = vtanh.f32 %v2283_v23  ;;  %v206_v18 = vadd.f32 0.5, %v202_v21  ;;  %v2405_v1 = vadd.f32 %v183_v31, %v2322_v14 }
  0x3c   :  { %v1708_v32 = vpop.eup %1707  ;;  %v205_v49 = vmul.f32 0.5, %v1706_v30  ;;  %1727 = vtanh.f32 %v2285_v24  ;;  %v207_v23 = vadd.f32 0.5, %v203_v63  ;;  %v2409_v9 = vadd.f32 %v184_v0, %v2327_v20 }
  0x3d   :  { %v1710_v38 = vpop.eup %1709  ;;  %v226_v57 = vmul.f32 0.5, %v1708_v32  ;;  %1729 = vtanh.f32 %v2288_v28  ;;  %v208_v24 = vadd.f32 0.5, %v204_v39  ;;  %v2413_v41 = vadd.f32 %v185_v17, %v2332_v26 }
  0x3e   :  { %v1712_v48 = vpop.eup %1711  ;;  %v227_v4 = vmul.f32 0.5, %v1710_v38  ;;  %1731 = vtanh.f32 %v2290_v29  ;;  %v209_v28 = vadd.f32 0.5, %v205_v49  ;;  %v2417_v13 = vadd.f32 %v206_v18, %v2334_v27 }
  0x3f   :  { %v1714_v55 = vpop.eup %1713  ;;  %v228_v2 = vmul.f32 0.5, %v1712_v48  ;;  %1733 = vtanh.f32 %v2295_v33  ;;  %v230_v29 = vadd.f32 0.5, %v226_v57  ;;  %v2421_v21 = vadd.f32 %v207_v23, %v2339_v36 }
  0x40   :  { %v1716_v8 = vpop.eup %1715  ;;  %v229_v59 = vmul.f32 0.5, %v1714_v55  ;;  %1735 = vtanh.f32 %v2297_v34  ;;  %v231_v33 = vadd.f32 0.5, %v227_v4  ;;  %v2425_v31 = vadd.f32 %v208_v24, %v2344_v44 }
  0x41   :  { %v1718_v14 = vpop.eup %1717  ;;  %v250_v6 = vmul.f32 0.5, %v1716_v8  ;;  %1737 = vtanh.f32 %v2302_v35  ;;  %v232_v34 = vadd.f32 0.5, %v228_v2  ;;  %v2429_v30 = vadd.f32 %v209_v28, %v2349_v56 }
  0x42   :  { %v1720_v20 = vpop.eup %1719  ;;  %v251_v19 = vmul.f32 0.5, %v1718_v14  ;;  %1739 = vtanh.f32 %v2307_v50  ;;  %v233_v35 = vadd.f32 0.5, %v229_v59  ;;  %v2433_v39 = vadd.f32 %v230_v29, %v2357_v45 }
  0x43   :  { %v1722_v26 = vpop.eup %1721  ;;  %v252_v63 = vmul.f32 0.5, %v1720_v20  ;;  %1741 = vtanh.f32 %v2312_v60  ;;  %v254_v50 = vadd.f32 0.5, %v250_v6  ;;  %v2437_v17 = vadd.f32 %v231_v33, %v2362_v16 }
  0x44   :  { %v1724_v27 = vpop.eup %1723  ;;  %v253_v0 = vmul.f32 0.5, %v1722_v26  ;;  %1743 = vtanh.f32 %v2315_v3  ;;  %v255_v60 = vadd.f32 0.5, %v251_v19  ;;  %v2441_v38 = vadd.f32 %v232_v34, %v2367_v25 }
  0x45   :  { %v1726_v36 = vpop.eup %1725  ;;  %v274_v32 = vmul.f32 0.5, %v1724_v27  ;;  %1745 = vtanh.f32 %v2320_v10  ;;  %v256_v3 = vadd.f32 0.5, %v252_v63  ;;  %v2445_v57 = vadd.f32 %v233_v35, %v2372_v42  ;;  %v408_v63 = vld [vmem:[#allocation3 + $0x1f0] sm:$0xff] }
  0x46   :  { %v1728_v44 = vpop.eup %1727  ;;  %v275_v49 = vmul.f32 0.5, %v1726_v36  ;;  %1747 = vtanh.f32 %v2325_v46  ;;  %v257_v10 = vadd.f32 0.5, %v253_v0  ;;  %v2449_v23 = vadd.f32 %v254_v50, %v2385_v62  ;;  %v409_v0 = vld [vmem:[#allocation3 + $0x1f8] sm:$0xff] }
  0x47   :  { %v1730_v56 = vpop.eup %1729  ;;  %v276_v18 = vmul.f32 0.5, %v1728_v44  ;;  %1749 = vtanh.f32 %v2330_v22  ;;  %v278_v46 = vadd.f32 0.5, %v274_v32  ;;  %v2453_v55 = vadd.f32 %v255_v60, %v2389_v11 }
  0x48   :  { %v1732_v45 = vpop.eup %1731  ;;  %v277_v48 = vmul.f32 0.5, %v1730_v56  ;;  %1751 = vtanh.f32 %v2337_v51  ;;  %v279_v22 = vadd.f32 0.5, %v275_v49  ;;  %v2457_v2 = vadd.f32 %v256_v3, %v2393_v12 }
  0x49   :  { %v1734_v16 = vpop.eup %1733  ;;  %v298_v4 = vmul.f32 0.5, %v1732_v45  ;;  %1753 = vtanh.f32 %v2342_v52  ;;  %v280_v51 = vadd.f32 0.5, %v276_v18  ;;  %v2461_v28 = vadd.f32 %v257_v10, %v2397_v43 }
  0x4a   :  { %v1736_v25 = vpop.eup %1735  ;;  %v299_v24 = vmul.f32 0.5, %v1734_v16  ;;  %1755 = vtanh.f32 %v2347_v53  ;;  %v281_v52 = vadd.f32 0.5, %v277_v48  ;;  %v2465_v14 = vadd.f32 %v278_v46, %v2401_v54  ;;  %v407_v54 = vld [vmem:[#allocation3 + $0x1e8] sm:$0xff] }
  0x4b   :  { %v1738_v42 = vpop.eup %1737  ;;  %v300_v8 = vmul.f32 0.5, %v1736_v25  ;;  %1757 = vtanh.f32 %v2352_v61  ;;  %v302_v53 = vadd.f32 0.5, %v298_v4  ;;  %v2469_v6 = vadd.f32 %v279_v22, %v2405_v1 }
  0x4c   :  { %v1740_v62 = vpop.eup %1739  ;;  %v301_v59 = vmul.f32 0.5, %v1738_v42  ;;  %1759 = vtanh.f32 %v2355_v7  ;;  %v303_v61 = vadd.f32 0.5, %v299_v24  ;;  %v2473_v33 = vadd.f32 %v280_v51, %v2409_v9  ;;  %v431_v51 = vld [vmem:[#allocation3 + $0x208] sm:$0xff] }
  0x4d   :  { %v1742_v11 = vpop.eup %1741  ;;  %v322_v29 = vmul.f32 0.5, %v1740_v62  ;;  %1761 = vtanh.f32 %v2360_v15  ;;  %v304_v7 = vadd.f32 0.5, %v300_v8  ;;  %v2477_v15 = vadd.f32 %v281_v52, %v2413_v41 }
  0x4e   :  { %v1744_v12 = vpop.eup %1743  ;;  %v323_v20 = vmul.f32 0.5, %v1742_v11  ;;  %1763 = vtanh.f32 %v2365_v47  ;;  %v305_v34 = vadd.f32 0.5, %v301_v59  ;;  %v2481_v47 = vadd.f32 %v302_v53, %v2417_v13  ;;  %v432_v59 = vld [vmem:[#allocation3 + $0x210] sm:$0xff] }
  0x4f   :  { %v1746_v43 = vpop.eup %1745  ;;  %v324_v19 = vmul.f32 0.5, %v1744_v12  ;;  %1765 = vtanh.f32 %v2370_v37  ;;  %v326_v1 = vadd.f32 0.5, %v322_v29  ;;  %v2485_v36 = vadd.f32 %v303_v61, %v2421_v21 }
  0x50   :  { %v1748_v26 = vpop.eup %1747  ;;  %1767 = vtanh.f32 %v2376_v40  ;;  %v325_v9 = vmul.f32 0.5, %v1746_v43  ;;  %v327_v41 = vadd.f32 0.5, %v323_v20  ;;  %v411_v32 = vmul.f32 0.5, %v407_v54  ;;  %v454_v54 = vld [vmem:[#allocation3 + $0x220] sm:$0xff] }
  0x51   :  { %v1750_v27 = vpop.eup %1749  ;;  %v346_v35 = vmul.f32 0.5, %v1748_v26  ;;  %1769 = vtanh.f32 %v2379_v58  ;;  %v2488_v40 = vadd.f32 %v304_v7, %v2425_v31  ;;  %v328_v60 = vadd.f32 0.5, %v324_v19 }
  0x52   :  { %v1752_v37 = vpop.eup %1751  ;;  %v347_v50 = vmul.f32 0.5, %v1750_v27  ;;  %v412_v13 = vmul.f32 0.5, %v408_v63  ;;  %v2491_v3 = vadd.f32 %v305_v34, %v2429_v30  ;;  %v2494_v58 = vadd.f32 %v326_v1, %v2433_v39  ;;  %v430_v30 = vld [vmem:[#allocation3 + $0x200] sm:$0xff] }
  0x53   :  { %v1754_v44 = vpop.eup %1753  ;;  %v348_v49 = vmul.f32 0.5, %v1752_v37  ;;  %v413_v21 = vmul.f32 0.5, %v409_v0  ;;  %v329_v10 = vadd.f32 0.5, %v325_v9  ;;  %v350_v48 = vadd.f32 0.5, %v346_v35  ;;  %v456_v0 = vld [vmem:[#allocation3 + $0x230] sm:$0xff] }
  0x54   :  { %v1756_v56 = vpop.eup %1755  ;;  %v349_v18 = vmul.f32 0.5, %v1754_v44  ;;  %1771 = vtanh.f32 %v2382_v5  ;;  %v2498_v46 = vadd.f32 %v327_v41, %v2437_v17  ;;  %v351_v4 = vadd.f32 0.5, %v347_v50 }
  0x55   :  { %v1758_v45 = vpop.eup %1757  ;;  %v370_v16 = vmul.f32 0.5, %v1756_v56  ;;  %1773 = vtanh.f32 %v411_v32  ;;  %v2501_v39 = vadd.f32 %v328_v60, %v2441_v38  ;;  %v352_v24 = vadd.f32 0.5, %v348_v49  ;;  %v433_v38 = vld [vmem:[#allocation3 + $0x218] sm:$0xff]  ;;  %v478_v60 = vld [vmem:[#allocation3 + $0x240] sm:$0xff] }
  0x56   :  { %v1760_v31 = vpop.eup %1759  ;;  %v371_v25 = vmul.f32 0.5, %v1758_v45  ;;  %1775 = vtanh.f32 %v412_v13  ;;  %v353_v62 = vadd.f32 0.5, %v349_v18  ;;  %v2504_v11 = vadd.f32 %v329_v10, %v2445_v57  ;;  %v480_v18 = vld [vmem:[#allocation3 + $0x250] sm:$0xff] }
  0x57   :  { %v1762_v22 = vpop.eup %1761  ;;  %v372_v42 = vmul.f32 0.5, %v1760_v31  ;;  %v374_v5 = vadd.f32 0.5, %v370_v16  ;;  %1777 = vtanh.f32 %v413_v21  ;;  %v2507_v53 = vadd.f32 %v350_v48, %v2449_v23  ;;  %v455_v23 = vld [vmem:[#allocation3 + $0x228] sm:$0xff] }
  0x58   :  { %v1764_v8 = vpop.eup %1763  ;;  %v373_v52 = vmul.f32 0.5, %v1762_v22  ;;  %v375_v29 = vadd.f32 0.5, %v371_v25  ;;  %v434_v12 = vmul.f32 0.5, %v430_v30  ;;  %v2510_v20 = vadd.f32 %v351_v4, %v2453_v55  ;;  %v481_v4 = vld [vmem:[#allocation3 + $0x258] sm:$0xff] }
  0x59   :  { %v1766_v17 = vpop.eup %1765  ;;  %v376_v43 = vadd.f32 0.5, %v372_v42  ;;  %v394_v7 = vmul.f32 0.5, %v1764_v8  ;;  %v435_v19 = vmul.f32 0.5, %v431_v51  ;;  %v2513_v34 = vadd.f32 %v352_v24, %v2457_v2  ;;  %v457_v2 = vld [vmem:[#allocation3 + $0x238] sm:$0xff]  ;;  %v502_v42 = vld [vmem:[#allocation3 + $0x260] sm:$0xff] }
  0x5a   :  { %v1768_v61 = vpop.eup %1767  ;;  %v377_v57 = vadd.f32 0.5, %v373_v52  ;;  %v395_v1 = vmul.f32 0.5, %v1766_v17  ;;  %v436_v63 = vmul.f32 0.5, %v432_v59  ;;  %v2516_v27 = vadd.f32 %v353_v62, %v2461_v28  ;;  %v503_v52 = vld [vmem:[#allocation3 + $0x268] sm:$0xff] }
  0x5b   :  { %v1770_v26 = vpop.eup %1769  ;;  %v2519_v9 = vadd.f32 %v374_v5, %v2465_v14  ;;  %v396_v55 = vmul.f32 0.5, %v1768_v61  ;;  %v437_v35 = vmul.f32 0.5, %v433_v38  ;;  %v2522_v37 = vadd.f32 %v375_v29, %v2469_v6  ;;  %v479_v6 = vld [vmem:[#allocation3 + $0x248] sm:$0xff]  ;;  %v504_v29 = vld [vmem:[#allocation3 + $0x270] sm:$0xff]  ;;  %v505_v61 = vld [vmem:[#allocation3 + $0x278] sm:$0xff] }
  0x5c   :  { %v397_v41 = vmul.f32 0.5, %v1770_v26  ;;  %1779 = vtanh.f32 %v434_v12  ;;  %v458_v50 = vmul.f32 0.5, %v454_v54  ;;  %v2525_v32 = vadd.f32 %v376_v43, %v2473_v33  ;;  %v526_v54 = vld [vmem:[#allocation3 + $0x280] sm:$0xff] }
  0x5d   :  { %v398_v44 = vadd.f32 0.5, %v394_v7  ;;  %1781 = vtanh.f32 %v435_v19  ;;  %v459_v28 = vmul.f32 0.5, %v455_v23  ;;  %v2528_v14 = vadd.f32 %v377_v57, %v2477_v15  ;;  %v528_v23 = vld [vmem:[#allocation3 + $0x290] sm:$0xff] }
  0x5e   :  { %v1772_v49 = vpop.eup %1771  ;;  %v399_v13 = vadd.f32 0.5, %v395_v1  ;;  %1783 = vtanh.f32 %v436_v63  ;;  %v460_v56 = vmul.f32 0.5, %v456_v0  ;;  %v400_v45 = vadd.f32 0.5, %v396_v55  ;;  %v527_v63 = vld [vmem:[#allocation3 + $0x288] sm:$0xff]  ;;  %v529_v0 = vld [vmem:[#allocation3 + $0x298] sm:$0xff] }
  0x5f   :  { %v1774_v21 = vpop.eup %1773  ;;  %v418_v10 = vmul.f32 0.5, %v1772_v49  ;;  %1785 = vtanh.f32 %v437_v35  ;;  %v461_v48 = vmul.f32 0.5, %v457_v2  ;;  %v401_v16 = vadd.f32 0.5, %v397_v41  ;;  %v550_v41 = vld [vmem:[#allocation3 + $0x2a0] sm:$0xff] }
  0x60   :  { %v1776_v33 = vpop.eup %1775  ;;  %v419_v31 = vmul.f32 0.5, %v1774_v21  ;;  %1787 = vtanh.f32 %v458_v50  ;;  %v482_v25 = vmul.f32 0.5, %v478_v60  ;;  %v483_v15 = vmul.f32 0.5, %v479_v6  ;;  %v553_v21 = vld [vmem:[#allocation3 + $0x2b8] sm:$0xff] }
  0x61   :  { %v1778_v30 = vpop.eup %1777  ;;  %v420_v22 = vmul.f32 0.5, %v1776_v33  ;;  %1789 = vtanh.f32 %v459_v28  ;;  %v484_v24 = vmul.f32 0.5, %v480_v18  ;;  %v422_v8 = vadd.f32 0.5, %v418_v10 }
  0x62   :  { %v421_v51 = vmul.f32 0.5, %v1778_v30  ;;  %v423_v62 = vadd.f32 0.5, %v419_v31  ;;  %1791 = vtanh.f32 %v460_v56  ;;  %v2531_v5 = vadd.f32 %v398_v44, %v2481_v47  ;;  %v551_v44 = vld [vmem:[#allocation3 + $0x2a8] sm:$0xff] }
  0x63   :  { %v424_v59 = vadd.f32 0.5, %v420_v22  ;;  %1793 = vtanh.f32 %v461_v48  ;;  %v485_v17 = vmul.f32 0.5, %v481_v4  ;;  %v2534_v38 = vadd.f32 %v399_v13, %v2485_v36 }
  0x64   :  { %v425_v12 = vadd.f32 0.5, %v421_v51  ;;  %1795 = vtanh.f32 %v482_v25  ;;  %v506_v43 = vmul.f32 0.5, %v502_v42  ;;  %v2537_v7 = vadd.f32 %v400_v45, %v2488_v40 }
  0x65   :  { %v2540_v19 = vadd.f32 %v401_v16, %v2491_v3  ;;  %1797 = vtanh.f32 %v483_v15  ;;  %v507_v47 = vmul.f32 0.5, %v503_v52  ;;  %v2543_v57 = vadd.f32 %v422_v8, %v2494_v58  ;;  %v574_v16 = vld [vmem:[#allocation3 + $0x2c0] sm:$0xff] }
  0x66   :  { %v1780_v26 = vpop.eup %1779  ;;  %v2546_v36 = vadd.f32 %v423_v62, %v2498_v46  ;;  %1799 = vtanh.f32 %v484_v24  ;;  %v508_v1 = vmul.f32 0.5, %v504_v29  ;;  %v2549_v40 = vadd.f32 %v424_v59, %v2501_v39  ;;  %v552_v39 = vld [vmem:[#allocation3 + $0x2b0] sm:$0xff] }
  0x67   :  { %v1782_v55 = vpop.eup %1781  ;;  %v442_v3 = vmul.f32 0.5, %v1780_v26  ;;  %1801 = vtanh.f32 %v485_v17  ;;  %v509_v35 = vmul.f32 0.5, %v505_v61  ;;  %v2552_v58 = vadd.f32 %v425_v12, %v2504_v11 }
  0x68   :  { %v1784_v2 = vpop.eup %1783  ;;  %v443_v50 = vmul.f32 0.5, %v1782_v55  ;;  %1803 = vtanh.f32 %v506_v43  ;;  %v530_v46 = vmul.f32 0.5, %v526_v54  ;;  %v531_v49 = vmul.f32 0.5, %v527_v63  ;;  %v575_v55 = vld [vmem:[#allocation3 + $0x2c8] sm:$0xff] }
  0x69   :  { %v1786_v28 = vpop.eup %1785  ;;  %v444_v60 = vmul.f32 0.5, %v1784_v2  ;;  %1805 = vtanh.f32 %v507_v47  ;;  %v532_v13 = vmul.f32 0.5, %v528_v23  ;;  %v533_v18 = vmul.f32 0.5, %v529_v0 }
  0x6a   :  { %v1788_v56 = vpop.eup %1787  ;;  %v445_v6 = vmul.f32 0.5, %v1786_v28  ;;  %1807 = vtanh.f32 %v508_v1  ;;  %v554_v45 = vmul.f32 0.5, %v550_v41  ;;  %v446_v48 = vadd.f32 0.5, %v442_v3 }
  0x6b   :  { %v1790_v10 = vpop.eup %1789  ;;  %v466_v11 = vmul.f32 0.5, %v1788_v56  ;;  %1809 = vtanh.f32 %v509_v35  ;;  %v555_v33 = vmul.f32 0.5, %v551_v44  ;;  %v447_v4 = vadd.f32 0.5, %v443_v50 }
  0x6c   :  { %v1792_v31 = vpop.eup %1791  ;;  %v467_v25 = vmul.f32 0.5, %v1790_v10  ;;  %1811 = vtanh.f32 %v530_v46  ;;  %v556_v30 = vmul.f32 0.5, %v552_v39  ;;  %v448_v15 = vadd.f32 0.5, %v444_v60 }
  0x6d   :  { %v1794_v22 = vpop.eup %1793  ;;  %v468_v24 = vmul.f32 0.5, %v1792_v31  ;;  %1813 = vtanh.f32 %v531_v49  ;;  %v557_v42 = vmul.f32 0.5, %v553_v21  ;;  %v449_v8 = vadd.f32 0.5, %v445_v6 }
  0x6e   :  { %v1796_v51 = vpop.eup %1795  ;;  %v469_v62 = vmul.f32 0.5, %v1794_v22  ;;  %1815 = vtanh.f32 %v532_v13  ;;  %v578_v52 = vmul.f32 0.5, %v574_v16  ;;  %v2555_v17 = vadd.f32 %v446_v48, %v2507_v53 }
  0x6f   :  { %v1798_v59 = vpop.eup %1797  ;;  %v470_v29 = vadd.f32 0.5, %v466_v11  ;;  %v490_v12 = vmul.f32 0.5, %v1796_v51  ;;  %1817 = vtanh.f32 %v533_v18  ;;  %v2558_v43 = vadd.f32 %v447_v4, %v2510_v20  ;;  %v576_v20 = vld [vmem:[#allocation3 + $0x2d0] sm:$0xff] }
  0x70   :  { %v1800_v61 = vpop.eup %1799  ;;  %v471_v47 = vadd.f32 0.5, %v467_v25  ;;  %v491_v54 = vmul.f32 0.5, %v1798_v59  ;;  %1819 = vtanh.f32 %v554_v45  ;;  %v2561_v1 = vadd.f32 %v448_v15, %v2513_v34  ;;  %v577_v34 = vld [vmem:[#allocation3 + $0x2d8] sm:$0xff] }
  0x71   :  { %v1802_v26 = vpop.eup %1801  ;;  %v472_v63 = vadd.f32 0.5, %v468_v24  ;;  %v492_v23 = vmul.f32 0.5, %v1800_v61  ;;  %1821 = vtanh.f32 %v555_v33  ;;  %v2564_v3 = vadd.f32 %v449_v8, %v2516_v27  ;;  %v599_v24 = vld [vmem:[#allocation3 + $0x2e8] sm:$0xff] }
  0x72   :  { %v1804_v53 = vpop.eup %1803  ;;  %v473_v35 = vadd.f32 0.5, %v469_v62  ;;  %v494_v0 = vadd.f32 0.5, %v490_v12  ;;  %1823 = vtanh.f32 %v556_v30  ;;  %v2567_v2 = vadd.f32 %v470_v29, %v2519_v9  ;;  %v598_v30 = vld [vmem:[#allocation3 + $0x2e0] sm:$0xff] }
  0x73   :  { %v1806_v41 = vpop.eup %1805  ;;  %v493_v50 = vmul.f32 0.5, %v1802_v26  ;;  %v514_v46 = vmul.f32 0.5, %v1804_v53  ;;  %1825 = vtanh.f32 %v557_v42  ;;  %v2570_v28 = vadd.f32 %v471_v47, %v2522_v37 }
  0x74   :  { %v1808_v44 = vpop.eup %1807  ;;  %v495_v60 = vadd.f32 0.5, %v491_v54  ;;  %v515_v49 = vmul.f32 0.5, %v1806_v41  ;;  %v579_v27 = vmul.f32 0.5, %v575_v55  ;;  %v2573_v39 = vadd.f32 %v472_v63, %v2525_v32  ;;  %v622_v55 = vld [vmem:[#allocation3 + $0x300] sm:$0xff] }
  0x75   :  { %v1810_v13 = vpop.eup %1809  ;;  %v496_v56 = vadd.f32 0.5, %v492_v23  ;;  %v516_v6 = vmul.f32 0.5, %v1808_v44  ;;  %v580_v18 = vmul.f32 0.5, %v576_v20  ;;  %v2576_v21 = vadd.f32 %v473_v35, %v2528_v14 }
  0x76   :  { %v1812_v9 = vpop.eup %1811  ;;  %v2579_v45 = vadd.f32 %v494_v0, %v2531_v5  ;;  %v517_v10 = vmul.f32 0.5, %v1810_v13  ;;  %v581_v37 = vmul.f32 0.5, %v577_v34  ;;  %v497_v11 = vadd.f32 0.5, %v493_v50  ;;  %v624_v34 = vld [vmem:[#allocation3 + $0x310] sm:$0xff] }
  0x77   :  { %v1814_v48 = vpop.eup %1813  ;;  %v518_v33 = vadd.f32 0.5, %v514_v46  ;;  %v538_v16 = vmul.f32 0.5, %v1812_v9  ;;  %1827 = vtanh.f32 %v578_v52  ;;  %v2582_v32 = vadd.f32 %v495_v60, %v2534_v38  ;;  %v600_v52 = vld [vmem:[#allocation3 + $0x2f0] sm:$0xff] }
  0x78   :  { %v1816_v31 = vpop.eup %1815  ;;  %v519_v4 = vadd.f32 0.5, %v515_v49  ;;  %v539_v25 = vmul.f32 0.5, %v1814_v48  ;;  %1829 = vtanh.f32 %v579_v27  ;;  %v2585_v22 = vadd.f32 %v496_v56, %v2537_v7  ;;  %v601_v7 = vld [vmem:[#allocation3 + $0x2f8] sm:$0xff]  ;;  %v646_v56 = vld [vmem:[#allocation3 + $0x320] sm:$0xff] }
  0x79   :  { %v1818_v14 = vpop.eup %1817  ;;  %v520_v5 = vadd.f32 0.5, %v516_v6  ;;  %v540_v15 = vmul.f32 0.5, %v1816_v31  ;;  %1831 = vtanh.f32 %v580_v18  ;;  %v521_v51 = vadd.f32 0.5, %v517_v10  ;;  %v648_v10 = vld [vmem:[#allocation3 + $0x330] sm:$0xff] }
  0x7a   :  { %v1820_v42 = vpop.eup %1819  ;;  %v541_v8 = vmul.f32 0.5, %v1818_v14  ;;  %v542_v62 = vadd.f32 0.5, %v538_v16  ;;  %1833 = vtanh.f32 %v581_v37  ;;  %v2588_v59 = vadd.f32 %v497_v11, %v2540_v19 }
  0x7b   :  { %v1822_v38 = vpop.eup %1821  ;;  %v2591_v29 = vadd.f32 %v518_v33, %v2543_v57  ;;  %v543_v12 = vadd.f32 0.5, %v539_v25  ;;  %v602_v61 = vmul.f32 0.5, %v598_v30  ;;  %v2594_v54 = vadd.f32 %v519_v4, %v2546_v36  ;;  %v623_v57 = vld [vmem:[#allocation3 + $0x308] sm:$0xff]  ;;  %v649_v4 = vld [vmem:[#allocation3 + $0x338] sm:$0xff] }
  0x7c   :  { %v1824_v47 = vpop.eup %1823  ;;  %v544_v26 = vadd.f32 0.5, %v540_v15  ;;  %v562_v63 = vmul.f32 0.5, %v1820_v42  ;;  %v603_v23 = vmul.f32 0.5, %v599_v24  ;;  %v2597_v35 = vadd.f32 %v520_v5, %v2549_v40  ;;  %v625_v40 = vld [vmem:[#allocation3 + $0x318] sm:$0xff]  ;;  %v670_v15 = vld [vmem:[#allocation3 + $0x340] sm:$0xff] }
  0x7d   :  { %v1826_v53 = vpop.eup %1825  ;;  %v545_v19 = vadd.f32 0.5, %v541_v8  ;;  %v563_v0 = vmul.f32 0.5, %v1822_v38  ;;  %v604_v20 = vmul.f32 0.5, %v600_v52  ;;  %v2600_v41 = vadd.f32 %v521_v51, %v2552_v58  ;;  %v671_v8 = vld [vmem:[#allocation3 + $0x348] sm:$0xff] }
  0x7e   :  { %v2603_v50 = vadd.f32 %v542_v62, %v2555_v17  ;;  %v564_v36 = vmul.f32 0.5, %v1824_v47  ;;  %v605_v46 = vmul.f32 0.5, %v601_v7  ;;  %v2606_v44 = vadd.f32 %v543_v12, %v2558_v43  ;;  %v647_v43 = vld [vmem:[#allocation3 + $0x328] sm:$0xff]  ;;  %v672_v12 = vld [vmem:[#allocation3 + $0x350] sm:$0xff]  ;;  %v673_v47 = vld [vmem:[#allocation3 + $0x358] sm:$0xff] }
  0x7f   :  { %v565_v60 = vmul.f32 0.5, %v1826_v53  ;;  %1835 = vtanh.f32 %v602_v61  ;;  %v626_v49 = vmul.f32 0.5, %v622_v55  ;;  %v2609_v27 = vadd.f32 %v544_v26, %v2561_v1  ;;  %v694_v55 = vld [vmem:[#allocation3 + $0x360] sm:$0xff] }
  0x80   :  { %v566_v13 = vadd.f32 0.5, %v562_v63  ;;  %1837 = vtanh.f32 %v603_v23  ;;  %v627_v58 = vmul.f32 0.5, %v623_v57  ;;  %v2612_v17 = vadd.f32 %v545_v19, %v2564_v3  ;;  %v696_v57 = vld [vmem:[#allocation3 + $0x370] sm:$0xff] }
  0x81   :  { %v1828_v6 = vpop.eup %1827  ;;  %v567_v18 = vadd.f32 0.5, %v563_v0  ;;  %1839 = vtanh.f32 %v604_v20  ;;  %v628_v9 = vmul.f32 0.5, %v624_v34  ;;  %v568_v48 = vadd.f32 0.5, %v564_v36  ;;  %v695_v20 = vld [vmem:[#allocation3 + $0x368] sm:$0xff]  ;;  %v697_v34 = vld [vmem:[#allocation3 + $0x378] sm:$0xff] }
  0x82   :  { %v1830_v37 = vpop.eup %1829  ;;  %v586_v11 = vmul.f32 0.5, %v1828_v6  ;;  %1841 = vtanh.f32 %v605_v46  ;;  %v629_v33 = vmul.f32 0.5, %v625_v40  ;;  %v569_v16 = vadd.f32 0.5, %v565_v60  ;;  %v718_v60 = vld [vmem:[#allocation3 + $0x380] sm:$0xff] }
  0x83   :  { %v1832_v1 = vpop.eup %1831  ;;  %v587_v31 = vmul.f32 0.5, %v1830_v37  ;;  %1843 = vtanh.f32 %v626_v49  ;;  %v650_v25 = vmul.f32 0.5, %v646_v56  ;;  %v651_v3 = vmul.f32 0.5, %v647_v43  ;;  %v721_v37 = vld [vmem:[#allocation3 + $0x398] sm:$0xff] }
  0x84   :  { %v1834_v30 = vpop.eup %1833  ;;  %v588_v14 = vmul.f32 0.5, %v1832_v1  ;;  %1845 = vtanh.f32 %v627_v58  ;;  %v652_v5 = vmul.f32 0.5, %v648_v10  ;;  %v590_v42 = vadd.f32 0.5, %v586_v11 }
  0x85   :  { %v589_v24 = vmul.f32 0.5, %v1834_v30  ;;  %v591_v51 = vadd.f32 0.5, %v587_v31  ;;  %1847 = vtanh.f32 %v628_v9  ;;  %v2615_v62 = vadd.f32 %v566_v13, %v2567_v2  ;;  %v719_v13 = vld [vmem:[#allocation3 + $0x388] sm:$0xff] }
  0x86   :  { %v592_v52 = vadd.f32 0.5, %v588_v14  ;;  %1849 = vtanh.f32 %v629_v33  ;;  %v653_v38 = vmul.f32 0.5, %v649_v4  ;;  %v2618_v7 = vadd.f32 %v567_v18, %v2570_v28 }
  0x87   :  { %v593_v61 = vadd.f32 0.5, %v589_v24  ;;  %1851 = vtanh.f32 %v650_v25  ;;  %v674_v26 = vmul.f32 0.5, %v670_v15  ;;  %v2621_v63 = vadd.f32 %v568_v48, %v2573_v39 }
  0x88   :  { %v2624_v23 = vadd.f32 %v569_v16, %v2576_v21  ;;  %1853 = vtanh.f32 %v651_v3  ;;  %v675_v2 = vmul.f32 0.5, %v671_v8  ;;  %v2627_v19 = vadd.f32 %v590_v42, %v2579_v45  ;;  %v742_v16 = vld [vmem:[#allocation3 + $0x3a0] sm:$0xff] }
  0x89   :  { %v1836_v53 = vpop.eup %1835  ;;  %v2630_v28 = vadd.f32 %v591_v51, %v2582_v32  ;;  %1855 = vtanh.f32 %v652_v5  ;;  %v676_v0 = vmul.f32 0.5, %v672_v12  ;;  %v2633_v39 = vadd.f32 %v592_v52, %v2585_v22  ;;  %v720_v22 = vld [vmem:[#allocation3 + $0x390] sm:$0xff] }
  0x8a   :  { %v1838_v36 = vpop.eup %1837  ;;  %v610_v21 = vmul.f32 0.5, %v1836_v53  ;;  %1857 = vtanh.f32 %v653_v38  ;;  %v677_v46 = vmul.f32 0.5, %v673_v47  ;;  %v2636_v45 = vadd.f32 %v593_v61, %v2588_v59 }
  0x8b   :  { %v1840_v40 = vpop.eup %1839  ;;  %v611_v49 = vmul.f32 0.5, %v1838_v36  ;;  %1859 = vtanh.f32 %v674_v26  ;;  %v698_v32 = vmul.f32 0.5, %v694_v55  ;;  %v699_v6 = vmul.f32 0.5, %v695_v20  ;;  %v743_v36 = vld [vmem:[#allocation3 + $0x3a8] sm:$0xff] }
  0x8c   :  { %v1842_v58 = vpop.eup %1841  ;;  %v612_v56 = vmul.f32 0.5, %v1840_v40  ;;  %1861 = vtanh.f32 %v675_v2  ;;  %v700_v18 = vmul.f32 0.5, %v696_v57  ;;  %v701_v10 = vmul.f32 0.5, %v697_v34 }
  0x8d   :  { %v1844_v9 = vpop.eup %1843  ;;  %v613_v43 = vmul.f32 0.5, %v1842_v58  ;;  %1863 = vtanh.f32 %v676_v0  ;;  %v722_v48 = vmul.f32 0.5, %v718_v60  ;;  %v614_v33 = vadd.f32 0.5, %v610_v21 }
  0x8e   :  { %v1846_v11 = vpop.eup %1845  ;;  %v634_v59 = vmul.f32 0.5, %v1844_v9  ;;  %1865 = vtanh.f32 %v677_v46  ;;  %v723_v1 = vmul.f32 0.5, %v719_v13  ;;  %v615_v4 = vadd.f32 0.5, %v611_v49 }
  0x8f   :  { %v1848_v31 = vpop.eup %1847  ;;  %v635_v25 = vmul.f32 0.5, %v1846_v11  ;;  %1867 = vtanh.f32 %v698_v32  ;;  %v724_v30 = vmul.f32 0.5, %v720_v22  ;;  %v616_v3 = vadd.f32 0.5, %v612_v56 }
  0x90   :  { %v1850_v14 = vpop.eup %1849  ;;  %v636_v5 = vmul.f32 0.5, %v1848_v31  ;;  %1869 = vtanh.f32 %v699_v6  ;;  %v725_v15 = vmul.f32 0.5, %v721_v37  ;;  %v617_v42 = vadd.f32 0.5, %v613_v43 }
  0x91   :  { %v1852_v24 = vpop.eup %1851  ;;  %v637_v51 = vmul.f32 0.5, %v1850_v14  ;;  %1871 = vtanh.f32 %v700_v18  ;;  %v746_v8 = vmul.f32 0.5, %v742_v16  ;;  %v2639_v38 = vadd.f32 %v614_v33, %v2591_v29 }
  0x92   :  { %v1854_v52 = vpop.eup %1853  ;;  %v638_v12 = vadd.f32 0.5, %v634_v59  ;;  %v658_v61 = vmul.f32 0.5, %v1852_v24  ;;  %1873 = vtanh.f32 %v701_v10  ;;  %v2642_v26 = vadd.f32 %v615_v4, %v2594_v54  ;;  %v744_v54 = vld [vmem:[#allocation3 + $0x3b0] sm:$0xff] }
  0x93   :  { %v1856_v47 = vpop.eup %1855  ;;  %v639_v2 = vadd.f32 0.5, %v635_v25  ;;  %v659_v55 = vmul.f32 0.5, %v1854_v52  ;;  %1875 = vtanh.f32 %v722_v48  ;;  %v2645_v0 = vadd.f32 %v616_v3, %v2597_v35  ;;  %v745_v35 = vld [vmem:[#allocation3 + $0x3b8] sm:$0xff] }
  0x94   :  { %v1858_v53 = vpop.eup %1857  ;;  %v640_v20 = vadd.f32 0.5, %v636_v5  ;;  %v660_v57 = vmul.f32 0.5, %v1856_v47  ;;  %1877 = vtanh.f32 %v723_v1  ;;  %v2648_v21 = vadd.f32 %v617_v42, %v2600_v41  ;;  %v767_v5 = vld [vmem:[#allocation3 + $0x3c8] sm:$0xff] }
  0x95   :  { %v1860_v29 = vpop.eup %1859  ;;  %v641_v46 = vadd.f32 0.5, %v637_v51  ;;  %v662_v34 = vadd.f32 0.5, %v658_v61  ;;  %1879 = vtanh.f32 %v724_v30  ;;  %v2651_v40 = vadd.f32 %v638_v12, %v2603_v50  ;;  %v766_v30 = vld [vmem:[#allocation3 + $0x3c0] sm:$0xff] }
  0x96   :  { %v1862_v60 = vpop.eup %1861  ;;  %v661_v49 = vmul.f32 0.5, %v1858_v53  ;;  %v682_v32 = vmul.f32 0.5, %v1860_v29  ;;  %1881 = vtanh.f32 %v725_v15  ;;  %v2654_v58 = vadd.f32 %v639_v2, %v2606_v44 }
  0x97   :  { %v1864_v13 = vpop.eup %1863  ;;  %v663_v56 = vadd.f32 0.5, %v659_v55  ;;  %v683_v6 = vmul.f32 0.5, %v1862_v60  ;;  %v747_v41 = vmul.f32 0.5, %v743_v36  ;;  %v2657_v22 = vadd.f32 %v640_v20, %v2609_v27  ;;  %v790_v36 = vld [vmem:[#allocation3 + $0x3e0] sm:$0xff] }
  0x98   :  { %v1866_v18 = vpop.eup %1865  ;;  %v664_v9 = vadd.f32 0.5, %v660_v57  ;;  %v684_v43 = vmul.f32 0.5, %v1864_v13  ;;  %v748_v10 = vmul.f32 0.5, %v744_v54  ;;  %v2660_v37 = vadd.f32 %v641_v46, %v2612_v17 }
  0x99   :  { %v1868_v50 = vpop.eup %1867  ;;  %v2663_v48 = vadd.f32 %v662_v34, %v2615_v62  ;;  %v685_v11 = vmul.f32 0.5, %v1866_v18  ;;  %v749_v44 = vmul.f32 0.5, %v745_v35  ;;  %v665_v59 = vadd.f32 0.5, %v661_v49  ;;  %v792_v35 = vld [vmem:[#allocation3 + $0x3f0] sm:$0xff] }
  0x9a   :  { %v1870_v33 = vpop.eup %1869  ;;  %v686_v1 = vadd.f32 0.5, %v682_v32  ;;  %v706_v16 = vmul.f32 0.5, %v1868_v50  ;;  %1883 = vtanh.f32 %v746_v8  ;;  %v2666_v27 = vadd.f32 %v663_v56, %v2618_v7  ;;  %v768_v8 = vld [vmem:[#allocation3 + $0x3d0] sm:$0xff] }
  0x9b   :  { %v1872_v31 = vpop.eup %1871  ;;  %v687_v4 = vadd.f32 0.5, %v683_v6  ;;  %v707_v25 = vmul.f32 0.5, %v1870_v33  ;;  %1885 = vtanh.f32 %v747_v41  ;;  %v2669_v14 = vadd.f32 %v664_v9, %v2621_v63  ;;  %v769_v63 = vld [vmem:[#allocation3 + $0x3d8] sm:$0xff]  ;;  %v814_v9 = vld [vmem:[#allocation3 + $0x400] sm:$0xff] }
  0x9c   :  { %v1874_v17 = vpop.eup %1873  ;;  %v688_v62 = vadd.f32 0.5, %v684_v43  ;;  %v708_v3 = vmul.f32 0.5, %v1872_v31  ;;  %1887 = vtanh.f32 %v748_v10  ;;  %v689_v24 = vadd.f32 0.5, %v685_v11  ;;  %v816_v11 = vld [vmem:[#allocation3 + $0x410] sm:$0xff] }
  0x9d   :  { %v1876_v15 = vpop.eup %1875  ;;  %v709_v42 = vmul.f32 0.5, %v1874_v17  ;;  %v710_v51 = vadd.f32 0.5, %v706_v16  ;;  %1889 = vtanh.f32 %v749_v44  ;;  %v2672_v52 = vadd.f32 %v665_v59, %v2624_v23 }
  0x9e   :  { %v1878_v7 = vpop.eup %1877  ;;  %v2675_v12 = vadd.f32 %v686_v1, %v2627_v19  ;;  %v711_v61 = vadd.f32 0.5, %v707_v25  ;;  %v770_v47 = vmul.f32 0.5, %v766_v30  ;;  %v2678_v55 = vadd.f32 %v687_v4, %v2630_v28  ;;  %v791_v19 = vld [vmem:[#allocation3 + $0x3e8] sm:$0xff]  ;;  %v817_v4 = vld [vmem:[#allocation3 + $0x418] sm:$0xff] }
  0x9f   :  { %v1880_v2 = vpop.eup %1879  ;;  %v712_v53 = vadd.f32 0.5, %v708_v3  ;;  %v730_v20 = vmul.f32 0.5, %v1876_v15  ;;  %v771_v57 = vmul.f32 0.5, %v767_v5  ;;  %v2681_v46 = vadd.f32 %v688_v62, %v2633_v39  ;;  %v793_v39 = vld [vmem:[#allocation3 + $0x3f8] sm:$0xff]  ;;  %v838_v3 = vld [vmem:[#allocation3 + $0x420] sm:$0xff] }
  0xa0   :  { %v1882_v29 = vpop.eup %1881  ;;  %v713_v23 = vadd.f32 0.5, %v709_v42  ;;  %v731_v34 = vmul.f32 0.5, %v1878_v7  ;;  %v772_v54 = vmul.f32 0.5, %v768_v8  ;;  %v2684_v60 = vadd.f32 %v689_v24, %v2636_v45  ;;  %v839_v42 = vld [vmem:[#allocation3 + $0x428] sm:$0xff] }
  0xa1   :  { %v2687_v49 = vadd.f32 %v710_v51, %v2639_v38  ;;  %v732_v28 = vmul.f32 0.5, %v1880_v2  ;;  %v773_v32 = vmul.f32 0.5, %v769_v63  ;;  %v2690_v13 = vadd.f32 %v711_v61, %v2642_v26  ;;  %v815_v26 = vld [vmem:[#allocation3 + $0x408] sm:$0xff]  ;;  %v840_v61 = vld [vmem:[#allocation3 + $0x430] sm:$0xff]  ;;  %v841_v2 = vld [vmem:[#allocation3 + $0x438] sm:$0xff] }
  0xa2   :  { %v733_v56 = vmul.f32 0.5, %v1882_v29  ;;  %1891 = vtanh.f32 %v770_v47  ;;  %v794_v6 = vmul.f32 0.5, %v790_v36  ;;  %v2693_v41 = vadd.f32 %v712_v53, %v2645_v0  ;;  %v862_v36 = vld [vmem:[#allocation3 + $0x440] sm:$0xff] }
  0xa3   :  { %v734_v18 = vadd.f32 0.5, %v730_v20  ;;  %1893 = vtanh.f32 %v771_v57  ;;  %v795_v45 = vmul.f32 0.5, %v791_v19  ;;  %v2696_v38 = vadd.f32 %v713_v23, %v2648_v21  ;;  %v864_v19 = vld [vmem:[#allocation3 + $0x450] sm:$0xff] }
  0xa4   :  { %v1884_v43 = vpop.eup %1883  ;;  %v735_v10 = vadd.f32 0.5, %v731_v34  ;;  %1895 = vtanh.f32 %v772_v54  ;;  %v796_v50 = vmul.f32 0.5, %v792_v35  ;;  %v736_v33 = vadd.f32 0.5, %v732_v28  ;;  %v863_v54 = vld [vmem:[#allocation3 + $0x448] sm:$0xff]  ;;  %v865_v35 = vld [vmem:[#allocation3 + $0x458] sm:$0xff] }
  0xa5   :  { %v1886_v44 = vpop.eup %1885  ;;  %v754_v59 = vmul.f32 0.5, %v1884_v43  ;;  %1897 = vtanh.f32 %v773_v32  ;;  %v797_v1 = vmul.f32 0.5, %v793_v39  ;;  %v737_v16 = vadd.f32 0.5, %v733_v56  ;;  %v886_v56 = vld [vmem:[#allocation3 + $0x460] sm:$0xff] }
  0xa6   :  { %v1888_v0 = vpop.eup %1887  ;;  %v755_v31 = vmul.f32 0.5, %v1886_v44  ;;  %1899 = vtanh.f32 %v794_v6  ;;  %v818_v25 = vmul.f32 0.5, %v814_v9  ;;  %v819_v21 = vmul.f32 0.5, %v815_v26  ;;  %v889_v44 = vld [vmem:[#allocation3 + $0x478] sm:$0xff] }
  0xa7   :  { %v1890_v30 = vpop.eup %1889  ;;  %v756_v17 = vmul.f32 0.5, %v1888_v0  ;;  %1901 = vtanh.f32 %v795_v45  ;;  %v820_v62 = vmul.f32 0.5, %v816_v11  ;;  %v758_v15 = vadd.f32 0.5, %v754_v59 }
  0xa8   :  { %v757_v5 = vmul.f32 0.5, %v1890_v30  ;;  %v759_v24 = vadd.f32 0.5, %v755_v31  ;;  %1903 = vtanh.f32 %v796_v50  ;;  %v2699_v51 = vadd.f32 %v734_v18, %v2651_v40  ;;  %v887_v18 = vld [vmem:[#allocation3 + $0x468] sm:$0xff] }
  0xa9   :  { %v760_v8 = vadd.f32 0.5, %v756_v17  ;;  %1905 = vtanh.f32 %v797_v1  ;;  %v821_v7 = vmul.f32 0.5, %v817_v4  ;;  %v2702_v63 = vadd.f32 %v735_v10, %v2654_v58 }
  0xaa   :  { %v761_v47 = vadd.f32 0.5, %v757_v5  ;;  %1907 = vtanh.f32 %v818_v25  ;;  %v842_v53 = vmul.f32 0.5, %v838_v3  ;;  %v2705_v20 = vadd.f32 %v736_v33, %v2657_v22 }
  0xab   :  { %v2708_v57 = vadd.f32 %v737_v16, %v2660_v37  ;;  %1909 = vtanh.f32 %v819_v21  ;;  %v843_v40 = vmul.f32 0.5, %v839_v42  ;;  %v2711_v23 = vadd.f32 %v758_v15, %v2663_v48  ;;  %v910_v16 = vld [vmem:[#allocation3 + $0x480] sm:$0xff] }
  0xac   :  { %v1892_v29 = vpop.eup %1891  ;;  %v2714_v58 = vadd.f32 %v759_v24, %v2666_v27  ;;  %1911 = vtanh.f32 %v820_v62  ;;  %v844_v34 = vmul.f32 0.5, %v840_v61  ;;  %v2717_v22 = vadd.f32 %v760_v8, %v2669_v14  ;;  %v888_v14 = vld [vmem:[#allocation3 + $0x470] sm:$0xff] }
  0xad   :  { %v1894_v28 = vpop.eup %1893  ;;  %v778_v37 = vmul.f32 0.5, %v1892_v29  ;;  %1913 = vtanh.f32 %v821_v7  ;;  %v845_v32 = vmul.f32 0.5, %v841_v2  ;;  %v2720_v48 = vadd.f32 %v761_v47, %v2672_v52 }
  0xae   :  { %v1896_v39 = vpop.eup %1895  ;;  %v779_v6 = vmul.f32 0.5, %v1894_v28  ;;  %1915 = vtanh.f32 %v842_v53  ;;  %v866_v27 = vmul.f32 0.5, %v862_v36  ;;  %v867_v43 = vmul.f32 0.5, %v863_v54  ;;  %v911_v28 = vld [vmem:[#allocation3 + $0x488] sm:$0xff] }
  0xaf   :  { %v1898_v45 = vpop.eup %1897  ;;  %v780_v9 = vmul.f32 0.5, %v1896_v39  ;;  %1917 = vtanh.f32 %v843_v40  ;;  %v868_v10 = vmul.f32 0.5, %v864_v19  ;;  %v869_v11 = vmul.f32 0.5, %v865_v35 }
  0xb0   :  { %v1900_v50 = vpop.eup %1899  ;;  %v781_v26 = vmul.f32 0.5, %v1898_v45  ;;  %1919 = vtanh.f32 %v844_v34  ;;  %v890_v33 = vmul.f32 0.5, %v886_v56  ;;  %v782_v1 = vadd.f32 0.5, %v778_v37 }
  0xb1   :  { %v1902_v59 = vpop.eup %1901  ;;  %v802_v52 = vmul.f32 0.5, %v1900_v50  ;;  %1921 = vtanh.f32 %v845_v32  ;;  %v891_v0 = vmul.f32 0.5, %v887_v18  ;;  %v783_v4 = vadd.f32 0.5, %v779_v6 }
  0xb2   :  { %v1904_v31 = vpop.eup %1903  ;;  %v803_v25 = vmul.f32 0.5, %v1902_v59  ;;  %1923 = vtanh.f32 %v866_v27  ;;  %v892_v30 = vmul.f32 0.5, %v888_v14  ;;  %v784_v21 = vadd.f32 0.5, %v780_v9 }
  0xb3   :  { %v1906_v17 = vpop.eup %1905  ;;  %v804_v62 = vmul.f32 0.5, %v1904_v31  ;;  %1925 = vtanh.f32 %v867_v43  ;;  %v893_v3 = vmul.f32 0.5, %v889_v44  ;;  %v785_v15 = vadd.f32 0.5, %v781_v26 }
  0xb4   :  { %v1908_v5 = vpop.eup %1907  ;;  %v805_v24 = vmul.f32 0.5, %v1906_v17  ;;  %1927 = vtanh.f32 %v868_v10  ;;  %v914_v42 = vmul.f32 0.5, %v910_v16  ;;  %v2723_v7 = vadd.f32 %v782_v1, %v2675_v12 }
  0xb5   :  { %v1910_v8 = vpop.eup %1909  ;;  %v806_v61 = vadd.f32 0.5, %v802_v52  ;;  %v826_v47 = vmul.f32 0.5, %v1908_v5  ;;  %1929 = vtanh.f32 %v869_v11  ;;  %v2726_v53 = vadd.f32 %v783_v4, %v2678_v55  ;;  %v912_v55 = vld [vmem:[#allocation3 + $0x490] sm:$0xff] }
  0xb6   :  { %v1912_v2 = vpop.eup %1911  ;;  %v807_v40 = vadd.f32 0.5, %v803_v25  ;;  %v827_v36 = vmul.f32 0.5, %v1910_v8  ;;  %1931 = vtanh.f32 %v890_v33  ;;  %v2729_v34 = vadd.f32 %v784_v21, %v2681_v46  ;;  %v913_v46 = vld [vmem:[#allocation3 + $0x498] sm:$0xff] }
  0xb7   :  { %v1914_v29 = vpop.eup %1913  ;;  %v808_v54 = vadd.f32 0.5, %v804_v62  ;;  %v828_v19 = vmul.f32 0.5, %v1912_v2  ;;  %1933 = vtanh.f32 %v891_v0  ;;  %v2732_v37 = vadd.f32 %v785_v15, %v2684_v60  ;;  %v935_v62 = vld [vmem:[#allocation3 + $0x4a8] sm:$0xff] }
  0xb8   :  { %v1916_v12 = vpop.eup %1915  ;;  %v809_v32 = vadd.f32 0.5, %v805_v24  ;;  %v830_v35 = vadd.f32 0.5, %v826_v47  ;;  %1935 = vtanh.f32 %v892_v30  ;;  %v2735_v39 = vadd.f32 %v806_v61, %v2687_v49  ;;  %v934_v30 = vld [vmem:[#allocation3 + $0x4a0] sm:$0xff] }
  0xb9   :  { %v1918_v56 = vpop.eup %1917  ;;  %v829_v6 = vmul.f32 0.5, %v1914_v29  ;;  %v850_v27 = vmul.f32 0.5, %v1916_v12  ;;  %1937 = vtanh.f32 %v893_v3  ;;  %v2738_v45 = vadd.f32 %v807_v40, %v2690_v13 }
  0xba   :  { %v1920_v18 = vpop.eup %1919  ;;  %v831_v9 = vadd.f32 0.5, %v827_v36  ;;  %v851_v43 = vmul.f32 0.5, %v1918_v56  ;;  %v915_v60 = vmul.f32 0.5, %v911_v28  ;;  %v2741_v14 = vadd.f32 %v808_v54, %v2693_v41  ;;  %v958_v28 = vld [vmem:[#allocation3 + $0x4c0] sm:$0xff] }
  0xbb   :  { %v1922_v10 = vpop.eup %1921  ;;  %v832_v50 = vadd.f32 0.5, %v828_v19  ;;  %v852_v26 = vmul.f32 0.5, %v1920_v18  ;;  %v916_v11 = vmul.f32 0.5, %v912_v55  ;;  %v2744_v44 = vadd.f32 %v809_v32, %v2696_v38 }
  0xbc   :  { %v1924_v49 = vpop.eup %1923  ;;  %v2747_v33 = vadd.f32 %v830_v35, %v2699_v51  ;;  %v853_v59 = vmul.f32 0.5, %v1922_v10  ;;  %v917_v13 = vmul.f32 0.5, %v913_v46  ;;  %v833_v52 = vadd.f32 0.5, %v829_v6  ;;  %v960_v46 = vld [vmem:[#allocation3 + $0x4d0] sm:$0xff] }
  0xbd   :  { %v1926_v1 = vpop.eup %1925  ;;  %v854_v0 = vadd.f32 0.5, %v850_v27  ;;  %v874_v16 = vmul.f32 0.5, %v1924_v49  ;;  %1939 = vtanh.f32 %v914_v42  ;;  %v2750_v41 = vadd.f32 %v831_v9, %v2702_v63  ;;  %v936_v42 = vld [vmem:[#allocation3 + $0x4b0] sm:$0xff] }
  0xbe   :  { %v1928_v31 = vpop.eup %1927  ;;  %v855_v4 = vadd.f32 0.5, %v851_v43  ;;  %v875_v25 = vmul.f32 0.5, %v1926_v1  ;;  %1941 = vtanh.f32 %v915_v60  ;;  %v2753_v17 = vadd.f32 %v832_v50, %v2705_v20  ;;  %v937_v20 = vld [vmem:[#allocation3 + $0x4b8] sm:$0xff]  ;;  %v982_v50 = vld [vmem:[#allocation3 + $0x4e0] sm:$0xff] }
  0xbf   :  { %v1930_v38 = vpop.eup %1929  ;;  %v856_v51 = vadd.f32 0.5, %v852_v26  ;;  %v876_v21 = vmul.f32 0.5, %v1928_v31  ;;  %1943 = vtanh.f32 %v916_v11  ;;  %v857_v5 = vadd.f32 0.5, %v853_v59  ;;  %v984_v59 = vld [vmem:[#allocation3 + $0x4f0] sm:$0xff] }
  0xc0   :  { %v1932_v3 = vpop.eup %1931  ;;  %v877_v15 = vmul.f32 0.5, %v1930_v38  ;;  %v878_v24 = vadd.f32 0.5, %v874_v16  ;;  %1945 = vtanh.f32 %v917_v13  ;;  %v2756_v8 = vadd.f32 %v833_v52, %v2708_v57 }
  0xc1   :  { %v1934_v63 = vpop.eup %1933  ;;  %v2759_v61 = vadd.f32 %v854_v0, %v2711_v23  ;;  %v879_v47 = vadd.f32 0.5, %v875_v25  ;;  %v938_v2 = vmul.f32 0.5, %v934_v30  ;;  %v2762_v36 = vadd.f32 %v855_v4, %v2714_v58  ;;  %v959_v23 = vld [vmem:[#allocation3 + $0x4c8] sm:$0xff]  ;;  %v985_v4 = vld [vmem:[#allocation3 + $0x4f8] sm:$0xff] }
  0xc2   :  { %v1936_v40 = vpop.eup %1935  ;;  %v880_v29 = vadd.f32 0.5, %v876_v21  ;;  %v898_v54 = vmul.f32 0.5, %v1932_v3  ;;  %v939_v19 = vmul.f32 0.5, %v935_v62  ;;  %v2765_v32 = vadd.f32 %v856_v51, %v2717_v22  ;;  %v961_v22 = vld [vmem:[#allocation3 + $0x4d8] sm:$0xff]  ;;  %v1006_v21 = vld [vmem:[#allocation3 + $0x500] sm:$0xff] }
  0xc3   :  { %v1938_v12 = vpop.eup %1937  ;;  %v881_v57 = vadd.f32 0.5, %v877_v15  ;;  %v899_v35 = vmul.f32 0.5, %v1934_v63  ;;  %v940_v55 = vmul.f32 0.5, %v936_v42  ;;  %v2768_v56 = vadd.f32 %v857_v5, %v2720_v48  ;;  %v1007_v15 = vld [vmem:[#allocation3 + $0x508] sm:$0xff] }
  0xc4   :  { %v2771_v6 = vadd.f32 %v878_v24, %v2723_v7  ;;  %v900_v58 = vmul.f32 0.5, %v1936_v40  ;;  %v941_v27 = vmul.f32 0.5, %v937_v20  ;;  %v2774_v18 = vadd.f32 %v879_v47, %v2726_v53  ;;  %v983_v53 = vld [vmem:[#allocation3 + $0x4e8] sm:$0xff]  ;;  %v1008_v47 = vld [vmem:[#allocation3 + $0x510] sm:$0xff]  ;;  %v1009_v40 = vld [vmem:[#allocation3 + $0x518] sm:$0xff] }
  0xc5   :  { %v901_v9 = vmul.f32 0.5, %v1938_v12  ;;  %1947 = vtanh.f32 %v938_v2  ;;  %v962_v43 = vmul.f32 0.5, %v958_v28  ;;  %v2777_v60 = vadd.f32 %v880_v29, %v2729_v34  ;;  %v1030_v28 = vld [vmem:[#allocation3 + $0x520] sm:$0xff] }
  0xc6   :  { %v902_v10 = vadd.f32 0.5, %v898_v54  ;;  %1949 = vtanh.f32 %v939_v19  ;;  %v963_v48 = vmul.f32 0.5, %v959_v23  ;;  %v2780_v7 = vadd.f32 %v881_v57, %v2732_v37  ;;  %v1032_v23 = vld [vmem:[#allocation3 + $0x530] sm:$0xff] }
  0xc7   :  { %v1940_v26 = vpop.eup %1939  ;;  %v903_v11 = vadd.f32 0.5, %v899_v35  ;;  %1951 = vtanh.f32 %v940_v55  ;;  %v964_v49 = vmul.f32 0.5, %v960_v46  ;;  %v904_v1 = vadd.f32 0.5, %v900_v58  ;;  %v1031_v55 = vld [vmem:[#allocation3 + $0x528] sm:$0xff]  ;;  %v1033_v46 = vld [vmem:[#allocation3 + $0x538] sm:$0xff] }
  0xc8   :  { %v1942_v13 = vpop.eup %1941  ;;  %v922_v52 = vmul.f32 0.5, %v1940_v26  ;;  %1953 = vtanh.f32 %v941_v27  ;;  %v965_v0 = vmul.f32 0.5, %v961_v22  ;;  %v905_v16 = vadd.f32 0.5, %v901_v9  ;;  %v1054_v9 = vld [vmem:[#allocation3 + $0x540] sm:$0xff] }
  0xc9   :  { %v1944_v34 = vpop.eup %1943  ;;  %v923_v31 = vmul.f32 0.5, %v1942_v13  ;;  %1955 = vtanh.f32 %v962_v43  ;;  %v986_v25 = vmul.f32 0.5, %v982_v50  ;;  %v987_v37 = vmul.f32 0.5, %v983_v53  ;;  %v1057_v13 = vld [vmem:[#allocation3 + $0x558] sm:$0xff] }
  0xca   :  { %v1946_v30 = vpop.eup %1945  ;;  %v924_v38 = vmul.f32 0.5, %v1944_v34  ;;  %1957 = vtanh.f32 %v963_v48  ;;  %v988_v51 = vmul.f32 0.5, %v984_v59  ;;  %v926_v3 = vadd.f32 0.5, %v922_v52 }
  0xcb   :  { %v925_v62 = vmul.f32 0.5, %v1946_v30  ;;  %v927_v5 = vadd.f32 0.5, %v923_v31  ;;  %1959 = vtanh.f32 %v964_v49  ;;  %v2783_v24 = vadd.f32 %v902_v10, %v2735_v39  ;;  %v1055_v10 = vld [vmem:[#allocation3 + $0x548] sm:$0xff] }
  0xcc   :  { %v928_v42 = vadd.f32 0.5, %v924_v38  ;;  %1961 = vtanh.f32 %v965_v0  ;;  %v989_v63 = vmul.f32 0.5, %v985_v4  ;;  %v2786_v20 = vadd.f32 %v903_v11, %v2738_v45 }
  0xcd   :  { %v929_v2 = vadd.f32 0.5, %v925_v62  ;;  %1963 = vtanh.f32 %v986_v25  ;;  %v1010_v29 = vmul.f32 0.5, %v1006_v21  ;;  %v2789_v54 = vadd.f32 %v904_v1, %v2741_v14 }
  0xce   :  { %v2792_v19 = vadd.f32 %v905_v16, %v2744_v44  ;;  %1965 = vtanh.f32 %v987_v37  ;;  %v1011_v39 = vmul.f32 0.5, %v1007_v15  ;;  %v2795_v57 = vadd.f32 %v926_v3, %v2747_v33  ;;  %v1078_v16 = vld [vmem:[#allocation3 + $0x560] sm:$0xff] }
  0xcf   :  { %v1948_v12 = vpop.eup %1947  ;;  %v2798_v45 = vadd.f32 %v927_v5, %v2750_v41  ;;  %1967 = vtanh.f32 %v988_v51  ;;  %v1012_v35 = vmul.f32 0.5, %v1008_v47  ;;  %v2801_v14 = vadd.f32 %v928_v42, %v2753_v17  ;;  %v1056_v17 = vld [vmem:[#allocation3 + $0x550] sm:$0xff] }
  0xd0   :  { %v1950_v58 = vpop.eup %1949  ;;  %v946_v44 = vmul.f32 0.5, %v1948_v12  ;;  %1969 = vtanh.f32 %v989_v63  ;;  %v1013_v27 = vmul.f32 0.5, %v1009_v40  ;;  %v2804_v33 = vadd.f32 %v929_v2, %v2756_v8 }
  0xd1   :  { %v1952_v22 = vpop.eup %1951  ;;  %v947_v43 = vmul.f32 0.5, %v1950_v58  ;;  %1971 = vtanh.f32 %v1010_v29  ;;  %v1034_v41 = vmul.f32 0.5, %v1030_v28  ;;  %v1035_v26 = vmul.f32 0.5, %v1031_v55  ;;  %v1079_v58 = vld [vmem:[#allocation3 + $0x568] sm:$0xff] }
  0xd2   :  { %v1954_v48 = vpop.eup %1953  ;;  %v948_v50 = vmul.f32 0.5, %v1952_v22  ;;  %1973 = vtanh.f32 %v1011_v39  ;;  %v1036_v11 = vmul.f32 0.5, %v1032_v23  ;;  %v1037_v59 = vmul.f32 0.5, %v1033_v46 }
  0xd3   :  { %v1956_v49 = vpop.eup %1955  ;;  %v949_v53 = vmul.f32 0.5, %v1954_v48  ;;  %1975 = vtanh.f32 %v1012_v35  ;;  %v1058_v1 = vmul.f32 0.5, %v1054_v9  ;;  %v950_v0 = vadd.f32 0.5, %v946_v44 }
  0xd4   :  { %v1958_v52 = vpop.eup %1957  ;;  %v970_v8 = vmul.f32 0.5, %v1956_v49  ;;  %1977 = vtanh.f32 %v1013_v27  ;;  %v1059_v34 = vmul.f32 0.5, %v1055_v10  ;;  %v951_v4 = vadd.f32 0.5, %v947_v43 }
  0xd5   :  { %v1960_v31 = vpop.eup %1959  ;;  %v971_v25 = vmul.f32 0.5, %v1958_v52  ;;  %1979 = vtanh.f32 %v1034_v41  ;;  %v1060_v30 = vmul.f32 0.5, %v1056_v17  ;;  %v952_v37 = vadd.f32 0.5, %v948_v50 }
  0xd6   :  { %v1962_v38 = vpop.eup %1961  ;;  %v972_v51 = vmul.f32 0.5, %v1960_v31  ;;  %1981 = vtanh.f32 %v1035_v26  ;;  %v1061_v21 = vmul.f32 0.5, %v1057_v13  ;;  %v953_v3 = vadd.f32 0.5, %v949_v53 }
  0xd7   :  { %v1964_v62 = vpop.eup %1963  ;;  %v973_v5 = vmul.f32 0.5, %v1962_v38  ;;  %1983 = vtanh.f32 %v1036_v11  ;;  %v1082_v15 = vmul.f32 0.5, %v1078_v16  ;;  %v2807_v63 = vadd.f32 %v950_v0, %v2759_v61 }
  0xd8   :  { %v1966_v42 = vpop.eup %1965  ;;  %v974_v47 = vadd.f32 0.5, %v970_v8  ;;  %v994_v2 = vmul.f32 0.5, %v1964_v62  ;;  %1985 = vtanh.f32 %v1037_v59  ;;  %v2810_v29 = vadd.f32 %v951_v4, %v2762_v36  ;;  %v1080_v36 = vld [vmem:[#allocation3 + $0x570] sm:$0xff] }
  0xd9   :  { %v1968_v40 = vpop.eup %1967  ;;  %v975_v39 = vadd.f32 0.5, %v971_v25  ;;  %v995_v28 = vmul.f32 0.5, %v1966_v42  ;;  %1987 = vtanh.f32 %v1058_v1  ;;  %v2813_v35 = vadd.f32 %v952_v37, %v2765_v32  ;;  %v1081_v32 = vld [vmem:[#allocation3 + $0x578] sm:$0xff] }
  0xda   :  { %v1970_v12 = vpop.eup %1969  ;;  %v976_v55 = vadd.f32 0.5, %v972_v51  ;;  %v996_v23 = vmul.f32 0.5, %v1968_v40  ;;  %1989 = vtanh.f32 %v1059_v34  ;;  %v2816_v44 = vadd.f32 %v953_v3, %v2768_v56  ;;  %v1103_v51 = vld [vmem:[#allocation3 + $0x588] sm:$0xff] }
  0xdb   :  { %v1972_v61 = vpop.eup %1971  ;;  %v977_v27 = vadd.f32 0.5, %v973_v5  ;;  %v998_v46 = vadd.f32 0.5, %v994_v2  ;;  %1991 = vtanh.f32 %v1060_v30  ;;  %v2819_v22 = vadd.f32 %v974_v47, %v2771_v6  ;;  %v1102_v30 = vld [vmem:[#allocation3 + $0x580] sm:$0xff] }
  0xdc   :  { %v1974_v9 = vpop.eup %1973  ;;  %v997_v43 = vmul.f32 0.5, %v1970_v12  ;;  %v1018_v41 = vmul.f32 0.5, %v1972_v61  ;;  %1993 = vtanh.f32 %v1061_v21  ;;  %v2822_v48 = vadd.f32 %v975_v39, %v2774_v18 }
  0xdd   :  { %v1976_v10 = vpop.eup %1975  ;;  %v999_v50 = vadd.f32 0.5, %v995_v28  ;;  %v1019_v26 = vmul.f32 0.5, %v1974_v9  ;;  %v1083_v56 = vmul.f32 0.5, %v1079_v58  ;;  %v2825_v17 = vadd.f32 %v976_v55, %v2777_v60  ;;  %v1126_v58 = vld [vmem:[#allocation3 + $0x5a0] sm:$0xff] }
  0xde   :  { %v1978_v11 = vpop.eup %1977  ;;  %v1000_v49 = vadd.f32 0.5, %v996_v23  ;;  %v1020_v53 = vmul.f32 0.5, %v1976_v10  ;;  %v1084_v59 = vmul.f32 0.5, %v1080_v36  ;;  %v2828_v13 = vadd.f32 %v977_v27, %v2780_v7 }
  0xdf   :  { %v1980_v6 = vpop.eup %1979  ;;  %v2831_v1 = vadd.f32 %v998_v46, %v2783_v24  ;;  %v1021_v52 = vmul.f32 0.5, %v1978_v11  ;;  %v1085_v18 = vmul.f32 0.5, %v1081_v32  ;;  %v1001_v8 = vadd.f32 0.5, %v997_v43  ;;  %v1128_v32 = vld [vmem:[#allocation3 + $0x5b0] sm:$0xff] }
  0xe0   :  { %v1982_v0 = vpop.eup %1981  ;;  %v1022_v34 = vadd.f32 0.5, %v1018_v41  ;;  %v1042_v16 = vmul.f32 0.5, %v1980_v6  ;;  %1995 = vtanh.f32 %v1082_v15  ;;  %v2834_v60 = vadd.f32 %v999_v50, %v2786_v20  ;;  %v1104_v15 = vld [vmem:[#allocation3 + $0x590] sm:$0xff] }
  0xe1   :  { %v1984_v31 = vpop.eup %1983  ;;  %v1023_v4 = vadd.f32 0.5, %v1019_v26  ;;  %v1043_v25 = vmul.f32 0.5, %v1982_v0  ;;  %1997 = vtanh.f32 %v1083_v56  ;;  %v2837_v38 = vadd.f32 %v1000_v49, %v2789_v54  ;;  %v1105_v54 = vld [vmem:[#allocation3 + $0x598] sm:$0xff]  ;;  %v1150_v49 = vld [vmem:[#allocation3 + $0x5c0] sm:$0xff] }
  0xe2   :  { %v1986_v7 = vpop.eup %1985  ;;  %v1024_v24 = vadd.f32 0.5, %v1020_v53  ;;  %v1044_v37 = vmul.f32 0.5, %v1984_v31  ;;  %1999 = vtanh.f32 %v1084_v59  ;;  %v1025_v62 = vadd.f32 0.5, %v1021_v52  ;;  %v1152_v52 = vld [vmem:[#allocation3 + $0x5d0] sm:$0xff] }
  0xe3   :  { %v1988_v21 = vpop.eup %1987  ;;  %v1045_v3 = vmul.f32 0.5, %v1986_v7  ;;  %v1046_v5 = vadd.f32 0.5, %v1042_v16  ;;  %2001 = vtanh.f32 %v1085_v18  ;;  %v2840_v42 = vadd.f32 %v1001_v8, %v2792_v19 }
  0xe4   :  { %v1990_v20 = vpop.eup %1989  ;;  %v2843_v47 = vadd.f32 %v1022_v34, %v2795_v57  ;;  %v1047_v2 = vadd.f32 0.5, %v1043_v25  ;;  %v1106_v40 = vmul.f32 0.5, %v1102_v30  ;;  %v2846_v28 = vadd.f32 %v1023_v4, %v2798_v45  ;;  %v1127_v57 = vld [vmem:[#allocation3 + $0x5a8] sm:$0xff]  ;;  %v1153_v4 = vld [vmem:[#allocation3 + $0x5d8] sm:$0xff] }
  0xe5   :  { %v1992_v39 = vpop.eup %1991  ;;  %v1048_v12 = vadd.f32 0.5, %v1044_v37  ;;  %v1066_v55 = vmul.f32 0.5, %v1988_v21  ;;  %v1107_v23 = vmul.f32 0.5, %v1103_v51  ;;  %v2849_v27 = vadd.f32 %v1024_v24, %v2801_v14  ;;  %v1129_v14 = vld [vmem:[#allocation3 + $0x5b8] sm:$0xff]  ;;  %v1174_v37 = vld [vmem:[#allocation3 + $0x5e0] sm:$0xff] }
  0xe6   :  { %v1994_v61 = vpop.eup %1993  ;;  %v1049_v19 = vadd.f32 0.5, %v1045_v3  ;;  %v1067_v46 = vmul.f32 0.5, %v1990_v20  ;;  %v1108_v36 = vmul.f32 0.5, %v1104_v15  ;;  %v2852_v9 = vadd.f32 %v1025_v62, %v2804_v33  ;;  %v1175_v3 = vld [vmem:[#allocation3 + $0x5e8] sm:$0xff] }
  0xe7   :  { %v2855_v43 = vadd.f32 %v1046_v5, %v2807_v63  ;;  %v1068_v45 = vmul.f32 0.5, %v1992_v39  ;;  %v1109_v41 = vmul.f32 0.5, %v1105_v54  ;;  %v2858_v10 = vadd.f32 %v1047_v2, %v2810_v29  ;;  %v1151_v29 = vld [vmem:[#allocation3 + $0x5c8] sm:$0xff]  ;;  %v1176_v2 = vld [vmem:[#allocation3 + $0x5f0] sm:$0xff]  ;;  %v1177_v39 = vld [vmem:[#allocation3 + $0x5f8] sm:$0xff] }
  0xe8   :  { %v1069_v50 = vmul.f32 0.5, %v1994_v61  ;;  %2003 = vtanh.f32 %v1106_v40  ;;  %v1130_v26 = vmul.f32 0.5, %v1126_v58  ;;  %v2861_v56 = vadd.f32 %v1048_v12, %v2813_v35  ;;  %v1198_v58 = vld [vmem:[#allocation3 + $0x600] sm:$0xff] }
  0xe9   :  { %v1070_v11 = vadd.f32 0.5, %v1066_v55  ;;  %2005 = vtanh.f32 %v1107_v23  ;;  %v1131_v33 = vmul.f32 0.5, %v1127_v57  ;;  %v2864_v63 = vadd.f32 %v1049_v19, %v2816_v44  ;;  %v1200_v57 = vld [vmem:[#allocation3 + $0x610] sm:$0xff] }
  0xea   :  { %v1996_v53 = vpop.eup %1995  ;;  %v1071_v59 = vadd.f32 0.5, %v1067_v46  ;;  %2007 = vtanh.f32 %v1108_v36  ;;  %v1132_v6 = vmul.f32 0.5, %v1128_v32  ;;  %v1072_v0 = vadd.f32 0.5, %v1068_v45  ;;  %v1199_v36 = vld [vmem:[#allocation3 + $0x608] sm:$0xff]  ;;  %v1201_v32 = vld [vmem:[#allocation3 + $0x618] sm:$0xff] }
  0xeb   :  { %v1998_v18 = vpop.eup %1997  ;;  %v1090_v8 = vmul.f32 0.5, %v1996_v53  ;;  %2009 = vtanh.f32 %v1109_v41  ;;  %v1133_v34 = vmul.f32 0.5, %v1129_v14  ;;  %v1073_v16 = vadd.f32 0.5, %v1069_v50  ;;  %v1222_v50 = vld [vmem:[#allocation3 + $0x620] sm:$0xff] }
  0xec   :  { %v2000_v35 = vpop.eup %1999  ;;  %v1091_v31 = vmul.f32 0.5, %v1998_v18  ;;  %2011 = vtanh.f32 %v1130_v26  ;;  %v1154_v25 = vmul.f32 0.5, %v1150_v49  ;;  %v1155_v44 = vmul.f32 0.5, %v1151_v29  ;;  %v1225_v18 = vld [vmem:[#allocation3 + $0x638] sm:$0xff] }
  0xed   :  { %v2002_v30 = vpop.eup %2001  ;;  %v1092_v7 = vmul.f32 0.5, %v2000_v35  ;;  %2013 = vtanh.f32 %v1131_v33  ;;  %v1156_v24 = vmul.f32 0.5, %v1152_v52  ;;  %v1094_v21 = vadd.f32 0.5, %v1090_v8 }
  0xee   :  { %v1093_v51 = vmul.f32 0.5, %v2002_v30  ;;  %v1095_v62 = vadd.f32 0.5, %v1091_v31  ;;  %2015 = vtanh.f32 %v1132_v6  ;;  %v2867_v5 = vadd.f32 %v1070_v11, %v2819_v22  ;;  %v1223_v11 = vld [vmem:[#allocation3 + $0x628] sm:$0xff] }
  0xef   :  { %v1096_v15 = vadd.f32 0.5, %v1092_v7  ;;  %2017 = vtanh.f32 %v1133_v34  ;;  %v1157_v20 = vmul.f32 0.5, %v1153_v4  ;;  %v2870_v54 = vadd.f32 %v1071_v59, %v2822_v48 }
  0xf0   :  { %v1097_v40 = vadd.f32 0.5, %v1093_v51  ;;  %2019 = vtanh.f32 %v1154_v25  ;;  %v1178_v12 = vmul.f32 0.5, %v1174_v37  ;;  %v2873_v55 = vadd.f32 %v1072_v0, %v2825_v17 }
  0xf1   :  { %v2876_v23 = vadd.f32 %v1073_v16, %v2828_v13  ;;  %2021 = vtanh.f32 %v1155_v44  ;;  %v1179_v22 = vmul.f32 0.5, %v1175_v3  ;;  %v2879_v19 = vadd.f32 %v1094_v21, %v2831_v1  ;;  %v1246_v16 = vld [vmem:[#allocation3 + $0x640] sm:$0xff] }
  0xf2   :  { %v2004_v61 = vpop.eup %2003  ;;  %v2882_v48 = vadd.f32 %v1095_v62, %v2834_v60  ;;  %2023 = vtanh.f32 %v1156_v24  ;;  %v1180_v46 = vmul.f32 0.5, %v1176_v2  ;;  %v2885_v17 = vadd.f32 %v1096_v15, %v2837_v38  ;;  %v1224_v38 = vld [vmem:[#allocation3 + $0x630] sm:$0xff] }
  0xf3   :  { %v2006_v45 = vpop.eup %2005  ;;  %v1114_v13 = vmul.f32 0.5, %v2004_v61  ;;  %2025 = vtanh.f32 %v1157_v20  ;;  %v1181_v41 = vmul.f32 0.5, %v1177_v39  ;;  %v2888_v1 = vadd.f32 %v1097_v40, %v2840_v42 }
  0xf4   :  { %v2008_v14 = vpop.eup %2007  ;;  %v1115_v26 = vmul.f32 0.5, %v2006_v45  ;;  %2027 = vtanh.f32 %v1178_v12  ;;  %v1202_v60 = vmul.f32 0.5, %v1198_v58  ;;  %v1203_v53 = vmul.f32 0.5, %v1199_v36  ;;  %v1247_v45 = vld [vmem:[#allocation3 + $0x648] sm:$0xff] }
  0xf5   :  { %v2010_v33 = vpop.eup %2009  ;;  %v1116_v49 = vmul.f32 0.5, %v2008_v14  ;;  %2029 = vtanh.f32 %v1179_v22  ;;  %v1204_v59 = vmul.f32 0.5, %v1200_v57  ;;  %v1205_v52 = vmul.f32 0.5, %v1201_v32 }
  0xf6   :  { %v2012_v6 = vpop.eup %2011  ;;  %v1117_v29 = vmul.f32 0.5, %v2010_v33  ;;  %2031 = vtanh.f32 %v1180_v46  ;;  %v1226_v0 = vmul.f32 0.5, %v1222_v50  ;;  %v1118_v34 = vadd.f32 0.5, %v1114_v13 }
  0xf7   :  { %v2014_v8 = vpop.eup %2013  ;;  %v1138_v42 = vmul.f32 0.5, %v2012_v6  ;;  %2033 = vtanh.f32 %v1181_v41  ;;  %v1227_v35 = vmul.f32 0.5, %v1223_v11  ;;  %v1119_v4 = vadd.f32 0.5, %v1115_v26 }
  0xf8   :  { %v2016_v31 = vpop.eup %2015  ;;  %v1139_v25 = vmul.f32 0.5, %v2014_v8  ;;  %2035 = vtanh.f32 %v1202_v60  ;;  %v1228_v30 = vmul.f32 0.5, %v1224_v38  ;;  %v1120_v44 = vadd.f32 0.5, %v1116_v49 }
  0xf9   :  { %v2018_v7 = vpop.eup %2017  ;;  %v1140_v24 = vmul.f32 0.5, %v2016_v31  ;;  %2037 = vtanh.f32 %v1203_v53  ;;  %v1229_v37 = vmul.f32 0.5, %v1225_v18  ;;  %v1121_v21 = vadd.f32 0.5, %v1117_v29 }
  0xfa   :  { %v2020_v51 = vpop.eup %2019  ;;  %v1141_v62 = vmul.f32 0.5, %v2018_v7  ;;  %2039 = vtanh.f32 %v1204_v59  ;;  %v1250_v3 = vmul.f32 0.5, %v1246_v16  ;;  %v2891_v20 = vadd.f32 %v1118_v34, %v2843_v47 }
  0xfb   :  { %v2022_v15 = vpop.eup %2021  ;;  %v1142_v2 = vadd.f32 0.5, %v1138_v42  ;;  %v1162_v40 = vmul.f32 0.5, %v2020_v51  ;;  %2041 = vtanh.f32 %v1205_v52  ;;  %v2894_v12 = vadd.f32 %v1119_v4, %v2846_v28  ;;  %v1248_v28 = vld [vmem:[#allocation3 + $0x650] sm:$0xff] }
  0xfc   :  { %v2024_v39 = vpop.eup %2023  ;;  %v1143_v22 = vadd.f32 0.5, %v1139_v25  ;;  %v1163_v58 = vmul.f32 0.5, %v2022_v15  ;;  %2043 = vtanh.f32 %v1226_v0  ;;  %v2897_v46 = vadd.f32 %v1120_v44, %v2849_v27  ;;  %v1249_v27 = vld [vmem:[#allocation3 + $0x658] sm:$0xff] }
  0xfd   :  { %v2026_v61 = vpop.eup %2025  ;;  %v1144_v36 = vadd.f32 0.5, %v1140_v24  ;;  %v1164_v57 = vmul.f32 0.5, %v2024_v39  ;;  %2045 = vtanh.f32 %v1227_v35  ;;  %v2900_v13 = vadd.f32 %v1121_v21, %v2852_v9  ;;  %v1271_v24 = vld [vmem:[#allocation3 + $0x668] sm:$0xff] }
  0xfe   :  { %v2028_v47 = vpop.eup %2027  ;;  %v1145_v41 = vadd.f32 0.5, %v1141_v62  ;;  %v1166_v32 = vadd.f32 0.5, %v1162_v40  ;;  %2047 = vtanh.f32 %v1228_v30  ;;  %v2903_v14 = vadd.f32 %v1142_v2, %v2855_v43  ;;  %v1270_v30 = vld [vmem:[#allocation3 + $0x660] sm:$0xff] }
  0xff   :  { %v2030_v50 = vpop.eup %2029  ;;  %v1165_v26 = vmul.f32 0.5, %v2026_v61  ;;  %v1186_v60 = vmul.f32 0.5, %v2028_v47  ;;  %2049 = vtanh.f32 %v1229_v37  ;;  %v2906_v33 = vadd.f32 %v1143_v22, %v2858_v10 }
 0x100   :  { %v2032_v11 = vpop.eup %2031  ;;  %v1167_v49 = vadd.f32 0.5, %v1163_v58  ;;  %v1187_v53 = vmul.f32 0.5, %v2030_v50  ;;  %v1251_v9 = vmul.f32 0.5, %v1247_v45  ;;  %v2909_v38 = vadd.f32 %v1144_v36, %v2861_v56  ;;  %v1294_v45 = vld [vmem:[#allocation3 + $0x680] sm:$0xff] }
 0x101   :  { %v2034_v59 = vpop.eup %2033  ;;  %v1168_v6 = vadd.f32 0.5, %v1164_v57  ;;  %v1188_v29 = vmul.f32 0.5, %v2032_v11  ;;  %v1252_v52 = vmul.f32 0.5, %v1248_v28  ;;  %v2912_v18 = vadd.f32 %v1145_v41, %v2864_v63 }
 0x102   :  { %v2036_v43 = vpop.eup %2035  ;;  %v2915_v0 = vadd.f32 %v1166_v32, %v2867_v5  ;;  %v1189_v8 = vmul.f32 0.5, %v2034_v59  ;;  %v1253_v10 = vmul.f32 0.5, %v1249_v27  ;;  %v1169_v42 = vadd.f32 0.5, %v1165_v26  ;;  %v1296_v27 = vld [vmem:[#allocation3 + $0x690] sm:$0xff] }
 0x103   :  { %v2038_v34 = vpop.eup %2037  ;;  %v1190_v35 = vadd.f32 0.5, %v1186_v60  ;;  %v1210_v16 = vmul.f32 0.5, %v2036_v43  ;;  %2051 = vtanh.f32 %v1250_v3  ;;  %v2918_v56 = vadd.f32 %v1167_v49, %v2870_v54  ;;  %v1272_v3 = vld [vmem:[#allocation3 + $0x670] sm:$0xff] }
 0x104   :  { %v2040_v31 = vpop.eup %2039  ;;  %v1191_v4 = vadd.f32 0.5, %v1187_v53  ;;  %v1211_v25 = vmul.f32 0.5, %v2038_v34  ;;  %2053 = vtanh.f32 %v1251_v9  ;;  %v2921_v7 = vadd.f32 %v1168_v6, %v2873_v55  ;;  %v1273_v55 = vld [vmem:[#allocation3 + $0x678] sm:$0xff]  ;;  %v1318_v6 = vld [vmem:[#allocation3 + $0x6a0] sm:$0xff] }
 0x105   :  { %v2042_v63 = vpop.eup %2041  ;;  %v1192_v5 = vadd.f32 0.5, %v1188_v29  ;;  %v1212_v44 = vmul.f32 0.5, %v2040_v31  ;;  %2055 = vtanh.f32 %v1252_v52  ;;  %v1193_v51 = vadd.f32 0.5, %v1189_v8  ;;  %v1320_v8 = vld [vmem:[#allocation3 + $0x6b0] sm:$0xff] }
 0x106   :  { %v2044_v37 = vpop.eup %2043  ;;  %v1213_v21 = vmul.f32 0.5, %v2042_v63  ;;  %v1214_v62 = vadd.f32 0.5, %v1210_v16  ;;  %2057 = vtanh.f32 %v1253_v10  ;;  %v2924_v15 = vadd.f32 %v1169_v42, %v2876_v23 }
 0x107   :  { %v2046_v54 = vpop.eup %2045  ;;  %v2927_v2 = vadd.f32 %v1190_v35, %v2879_v19  ;;  %v1215_v40 = vadd.f32 0.5, %v1211_v25  ;;  %v1274_v39 = vmul.f32 0.5, %v1270_v30  ;;  %v2930_v58 = vadd.f32 %v1191_v4, %v2882_v48  ;;  %v1295_v19 = vld [vmem:[#allocation3 + $0x688] sm:$0xff]  ;;  %v1321_v4 = vld [vmem:[#allocation3 + $0x6b8] sm:$0xff] }
 0x108   :  { %v2048_v22 = vpop.eup %2047  ;;  %v1216_v61 = vadd.f32 0.5, %v1212_v44  ;;  %v1234_v36 = vmul.f32 0.5, %v2044_v37  ;;  %v1275_v57 = vmul.f32 0.5, %v1271_v24  ;;  %v2933_v41 = vadd.f32 %v1192_v5, %v2885_v17  ;;  %v1297_v17 = vld [vmem:[#allocation3 + $0x698] sm:$0xff]  ;;  %v1342_v44 = vld [vmem:[#allocation3 + $0x6c0] sm:$0xff] }
 0x109   :  { %v2050_v47 = vpop.eup %2049  ;;  %v1217_v23 = vadd.f32 0.5, %v1213_v21  ;;  %v1235_v32 = vmul.f32 0.5, %v2046_v54  ;;  %v1276_v28 = vmul.f32 0.5, %v1272_v3  ;;  %v2936_v50 = vadd.f32 %v1193_v51, %v2888_v1  ;;  %v1343_v21 = vld [vmem:[#allocation3 + $0x6c8] sm:$0xff] }
 0x10a   :  { %v2939_v26 = vadd.f32 %v1214_v62, %v2891_v20  ;;  %v1236_v48 = vmul.f32 0.5, %v2048_v22  ;;  %v1277_v60 = vmul.f32 0.5, %v1273_v55  ;;  %v2942_v11 = vadd.f32 %v1215_v40, %v2894_v12  ;;  %v1319_v12 = vld [vmem:[#allocation3 + $0x6a8] sm:$0xff]  ;;  %v1344_v40 = vld [vmem:[#allocation3 + $0x6d0] sm:$0xff]  ;;  %v1345_v22 = vld [vmem:[#allocation3 + $0x6d8] sm:$0xff] }
 0x10b   :  { %v1237_v49 = vmul.f32 0.5, %v2050_v47  ;;  %2059 = vtanh.f32 %v1274_v39  ;;  %v1298_v53 = vmul.f32 0.5, %v1294_v45  ;;  %v2945_v9 = vadd.f32 %v1216_v61, %v2897_v46  ;;  %v1366_v45 = vld [vmem:[#allocation3 + $0x6e0] sm:$0xff] }
 0x10c   :  { %v1238_v59 = vadd.f32 0.5, %v1234_v36  ;;  %2061 = vtanh.f32 %v1275_v57  ;;  %v1299_v1 = vmul.f32 0.5, %v1295_v19  ;;  %v2948_v20 = vadd.f32 %v1217_v23, %v2900_v13  ;;  %v1368_v19 = vld [vmem:[#allocation3 + $0x6f0] sm:$0xff] }
 0x10d   :  { %v2052_v29 = vpop.eup %2051  ;;  %v1239_v52 = vadd.f32 0.5, %v1235_v32  ;;  %2063 = vtanh.f32 %v1276_v28  ;;  %v1300_v43 = vmul.f32 0.5, %v1296_v27  ;;  %v1240_v34 = vadd.f32 0.5, %v1236_v48  ;;  %v1367_v28 = vld [vmem:[#allocation3 + $0x6e8] sm:$0xff]  ;;  %v1369_v27 = vld [vmem:[#allocation3 + $0x6f8] sm:$0xff] }
 0x10e   :  { %v2054_v10 = vpop.eup %2053  ;;  %v1258_v42 = vmul.f32 0.5, %v2052_v29  ;;  %2065 = vtanh.f32 %v1277_v60  ;;  %v1301_v35 = vmul.f32 0.5, %v1297_v17  ;;  %v1241_v16 = vadd.f32 0.5, %v1237_v49  ;;  %v1390_v49 = vld [vmem:[#allocation3 + $0x700] sm:$0xff] }
 0x10f   :  { %v2056_v46 = vpop.eup %2055  ;;  %v1259_v31 = vmul.f32 0.5, %v2054_v10  ;;  %2067 = vtanh.f32 %v1298_v53  ;;  %v1322_v25 = vmul.f32 0.5, %v1318_v6  ;;  %v1323_v13 = vmul.f32 0.5, %v1319_v12  ;;  %v1393_v10 = vld [vmem:[#allocation3 + $0x718] sm:$0xff] }
 0x110   :  { %v2058_v30 = vpop.eup %2057  ;;  %v1260_v63 = vmul.f32 0.5, %v2056_v46  ;;  %2069 = vtanh.f32 %v1299_v1  ;;  %v1324_v5 = vmul.f32 0.5, %v1320_v8  ;;  %v1262_v37 = vadd.f32 0.5, %v1258_v42 }
 0x111   :  { %v1261_v24 = vmul.f32 0.5, %v2058_v30  ;;  %v1263_v51 = vadd.f32 0.5, %v1259_v31  ;;  %2071 = vtanh.f32 %v1300_v43  ;;  %v2951_v62 = vadd.f32 %v1238_v59, %v2903_v14  ;;  %v1391_v59 = vld [vmem:[#allocation3 + $0x708] sm:$0xff] }
 0x112   :  { %v1264_v3 = vadd.f32 0.5, %v1260_v63  ;;  %2073 = vtanh.f32 %v1301_v35  ;;  %v1325_v54 = vmul.f32 0.5, %v1321_v4  ;;  %v2954_v55 = vadd.f32 %v1239_v52, %v2906_v33 }
 0x113   :  { %v1265_v39 = vadd.f32 0.5, %v1261_v24  ;;  %2075 = vtanh.f32 %v1322_v25  ;;  %v1346_v61 = vmul.f32 0.5, %v1342_v44  ;;  %v2957_v36 = vadd.f32 %v1240_v34, %v2909_v38 }
 0x114   :  { %v2960_v57 = vadd.f32 %v1241_v16, %v2912_v18  ;;  %2077 = vtanh.f32 %v1323_v13  ;;  %v1347_v14 = vmul.f32 0.5, %v1343_v21  ;;  %v2963_v23 = vadd.f32 %v1262_v37, %v2915_v0  ;;  %v1414_v16 = vld [vmem:[#allocation3 + $0x720] sm:$0xff] }
 0x115   :  { %v2060_v47 = vpop.eup %2059  ;;  %v2966_v33 = vadd.f32 %v1263_v51, %v2918_v56  ;;  %2079 = vtanh.f32 %v1324_v5  ;;  %v1348_v32 = vmul.f32 0.5, %v1344_v40  ;;  %v2969_v38 = vadd.f32 %v1264_v3, %v2921_v7  ;;  %v1392_v7 = vld [vmem:[#allocation3 + $0x710] sm:$0xff] }
 0x116   :  { %v2062_v48 = vpop.eup %2061  ;;  %v1282_v18 = vmul.f32 0.5, %v2060_v47  ;;  %2081 = vtanh.f32 %v1325_v54  ;;  %v1349_v60 = vmul.f32 0.5, %v1345_v22  ;;  %v2972_v0 = vadd.f32 %v1265_v39, %v2924_v15 }
 0x117   :  { %v2064_v17 = vpop.eup %2063  ;;  %v1283_v53 = vmul.f32 0.5, %v2062_v48  ;;  %2083 = vtanh.f32 %v1346_v61  ;;  %v1370_v56 = vmul.f32 0.5, %v1366_v45  ;;  %v1371_v29 = vmul.f32 0.5, %v1367_v28  ;;  %v1415_v48 = vld [vmem:[#allocation3 + $0x728] sm:$0xff] }
 0x118   :  { %v2066_v1 = vpop.eup %2065  ;;  %v1284_v6 = vmul.f32 0.5, %v2064_v17  ;;  %2085 = vtanh.f32 %v1347_v14  ;;  %v1372_v52 = vmul.f32 0.5, %v1368_v19  ;;  %v1373_v8 = vmul.f32 0.5, %v1369_v27 }
 0x119   :  { %v2068_v43 = vpop.eup %2067  ;;  %v1285_v12 = vmul.f32 0.5, %v2066_v1  ;;  %2087 = vtanh.f32 %v1348_v32  ;;  %v1394_v34 = vmul.f32 0.5, %v1390_v49  ;;  %v1286_v35 = vadd.f32 0.5, %v1282_v18 }
 0x11a   :  { %v2070_v42 = vpop.eup %2069  ;;  %v1306_v15 = vmul.f32 0.5, %v2068_v43  ;;  %2089 = vtanh.f32 %v1349_v60  ;;  %v1395_v46 = vmul.f32 0.5, %v1391_v59  ;;  %v1287_v4 = vadd.f32 0.5, %v1283_v53 }
 0x11b   :  { %v2072_v31 = vpop.eup %2071  ;;  %v1307_v25 = vmul.f32 0.5, %v2070_v42  ;;  %2091 = vtanh.f32 %v1370_v56  ;;  %v1396_v30 = vmul.f32 0.5, %v1392_v7  ;;  %v1288_v13 = vadd.f32 0.5, %v1284_v6 }
 0x11c   :  { %v2074_v63 = vpop.eup %2073  ;;  %v1308_v5 = vmul.f32 0.5, %v2072_v31  ;;  %2093 = vtanh.f32 %v1371_v29  ;;  %v1397_v44 = vmul.f32 0.5, %v1393_v10  ;;  %v1289_v37 = vadd.f32 0.5, %v1285_v12 }
 0x11d   :  { %v2076_v24 = vpop.eup %2075  ;;  %v1309_v51 = vmul.f32 0.5, %v2074_v63  ;;  %2095 = vtanh.f32 %v1372_v52  ;;  %v1418_v21 = vmul.f32 0.5, %v1414_v16  ;;  %v2975_v54 = vadd.f32 %v1286_v35, %v2927_v2 }
 0x11e   :  { %v2078_v3 = vpop.eup %2077  ;;  %v1310_v40 = vadd.f32 0.5, %v1306_v15  ;;  %v1330_v39 = vmul.f32 0.5, %v2076_v24  ;;  %2097 = vtanh.f32 %v1373_v8  ;;  %v2978_v61 = vadd.f32 %v1287_v4, %v2930_v58  ;;  %v1416_v58 = vld [vmem:[#allocation3 + $0x730] sm:$0xff] }
 0x11f   :  { %v2080_v22 = vpop.eup %2079  ;;  %v1311_v14 = vadd.f32 0.5, %v1307_v25  ;;  %v1331_v45 = vmul.f32 0.5, %v2078_v3  ;;  %2099 = vtanh.f32 %v1394_v34  ;;  %v2981_v32 = vadd.f32 %v1288_v13, %v2933_v41  ;;  %v1417_v41 = vld [vmem:[#allocation3 + $0x738] sm:$0xff] }
 0x120   :  { %v2082_v47 = vpop.eup %2081  ;;  %v1312_v28 = vadd.f32 0.5, %v1308_v5  ;;  %v1332_v19 = vmul.f32 0.5, %v2080_v22  ;;  %2101 = vtanh.f32 %v1395_v46  ;;  %v2984_v18 = vadd.f32 %v1289_v37, %v2936_v50  ;;  %v1439_v5 = vld [vmem:[#allocation3 + $0x748] sm:$0xff] }
 0x121   :  { %v2084_v2 = vpop.eup %2083  ;;  %v1313_v60 = vadd.f32 0.5, %v1309_v51  ;;  %v1334_v27 = vadd.f32 0.5, %v1330_v39  ;;  %2103 = vtanh.f32 %v1396_v30  ;;  %v2987_v17 = vadd.f32 %v1310_v40, %v2939_v26  ;;  %v1438_v30 = vld [vmem:[#allocation3 + $0x740] sm:$0xff] }
 0x122   :  { %v2086_v49 = vpop.eup %2085  ;;  %v1333_v53 = vmul.f32 0.5, %v2082_v47  ;;  %v1354_v56 = vmul.f32 0.5, %v2084_v2  ;;  %2105 = vtanh.f32 %v1397_v44  ;;  %v2990_v1 = vadd.f32 %v1311_v14, %v2942_v11 }
 0x123   :  { %v2088_v59 = vpop.eup %2087  ;;  %v1335_v6 = vadd.f32 0.5, %v1331_v45  ;;  %v1355_v29 = vmul.f32 0.5, %v2086_v49  ;;  %v1419_v50 = vmul.f32 0.5, %v1415_v48  ;;  %v2993_v7 = vadd.f32 %v1312_v28, %v2945_v9  ;;  %v1462_v48 = vld [vmem:[#allocation3 + $0x760] sm:$0xff] }
 0x124   :  { %v2090_v52 = vpop.eup %2089  ;;  %v1336_v43 = vadd.f32 0.5, %v1332_v19  ;;  %v1356_v12 = vmul.f32 0.5, %v2088_v59  ;;  %v1420_v8 = vmul.f32 0.5, %v1416_v58  ;;  %v2996_v10 = vadd.f32 %v1313_v60, %v2948_v20 }
 0x125   :  { %v2092_v26 = vpop.eup %2091  ;;  %v2999_v34 = vadd.f32 %v1334_v27, %v2951_v62  ;;  %v1357_v42 = vmul.f32 0.5, %v2090_v52  ;;  %v1421_v11 = vmul.f32 0.5, %v1417_v41  ;;  %v1337_v15 = vadd.f32 0.5, %v1333_v53  ;;  %v1464_v41 = vld [vmem:[#allocation3 + $0x770] sm:$0xff] }
 0x126   :  { %v2094_v35 = vpop.eup %2093  ;;  %v1358_v46 = vadd.f32 0.5, %v1354_v56  ;;  %v1378_v16 = vmul.f32 0.5, %v2092_v26  ;;  %2107 = vtanh.f32 %v1418_v21  ;;  %v3002_v9 = vadd.f32 %v1335_v6, %v2954_v55  ;;  %v1440_v21 = vld [vmem:[#allocation3 + $0x750] sm:$0xff] }
 0x127   :  { %v2096_v31 = vpop.eup %2095  ;;  %v1359_v4 = vadd.f32 0.5, %v1355_v29  ;;  %v1379_v25 = vmul.f32 0.5, %v2094_v35  ;;  %2109 = vtanh.f32 %v1419_v50  ;;  %v3005_v63 = vadd.f32 %v1336_v43, %v2957_v36  ;;  %v1441_v36 = vld [vmem:[#allocation3 + $0x758] sm:$0xff]  ;;  %v1486_v43 = vld [vmem:[#allocation3 + $0x780] sm:$0xff] }
 0x128   :  { %v2098_v20 = vpop.eup %2097  ;;  %v1360_v62 = vadd.f32 0.5, %v1356_v12  ;;  %v1380_v13 = vmul.f32 0.5, %v2096_v31  ;;  %2111 = vtanh.f32 %v1420_v8  ;;  %v1361_v24 = vadd.f32 0.5, %v1357_v42  ;;  %v1488_v42 = vld [vmem:[#allocation3 + $0x790] sm:$0xff] }
 0x129   :  { %v2100_v44 = vpop.eup %2099  ;;  %v1381_v37 = vmul.f32 0.5, %v2098_v20  ;;  %v1382_v51 = vadd.f32 0.5, %v1378_v16  ;;  %2113 = vtanh.f32 %v1421_v11  ;;  %v3008_v3 = vadd.f32 %v1337_v15, %v2960_v57 }
 0x12a   :  { %v2102_v55 = vpop.eup %2101  ;;  %v3011_v40 = vadd.f32 %v1358_v46, %v2963_v23  ;;  %v1383_v39 = vadd.f32 0.5, %v1379_v25  ;;  %v1442_v22 = vmul.f32 0.5, %v1438_v30  ;;  %v3014_v45 = vadd.f32 %v1359_v4, %v2966_v33  ;;  %v1463_v23 = vld [vmem:[#allocation3 + $0x768] sm:$0xff]  ;;  %v1489_v4 = vld [vmem:[#allocation3 + $0x798] sm:$0xff] }
 0x12b   :  { %v2104_v14 = vpop.eup %2103  ;;  %v1384_v47 = vadd.f32 0.5, %v1380_v13  ;;  %v1402_v28 = vmul.f32 0.5, %v2100_v44  ;;  %v1443_v19 = vmul.f32 0.5, %v1439_v5  ;;  %v3017_v60 = vadd.f32 %v1360_v62, %v2969_v38  ;;  %v1465_v38 = vld [vmem:[#allocation3 + $0x778] sm:$0xff]  ;;  %v1510_v13 = vld [vmem:[#allocation3 + $0x7a0] sm:$0xff] }
 0x12c   :  { %v2106_v2 = vpop.eup %2105  ;;  %v1385_v57 = vadd.f32 0.5, %v1381_v37  ;;  %v1403_v27 = vmul.f32 0.5, %v2102_v55  ;;  %v1444_v58 = vmul.f32 0.5, %v1440_v21  ;;  %v3020_v49 = vadd.f32 %v1361_v24, %v2972_v0  ;;  %v1511_v37 = vld [vmem:[#allocation3 + $0x7a8] sm:$0xff] }
 0x12d   :  { %v3023_v53 = vadd.f32 %v1382_v51, %v2975_v54  ;;  %v1404_v33 = vmul.f32 0.5, %v2104_v14  ;;  %v1445_v56 = vmul.f32 0.5, %v1441_v36  ;;  %v3026_v59 = vadd.f32 %v1383_v39, %v2978_v61  ;;  %v1487_v61 = vld [vmem:[#allocation3 + $0x788] sm:$0xff]  ;;  %v1512_v39 = vld [vmem:[#allocation3 + $0x7b0] sm:$0xff]  ;;  %v1513_v14 = vld [vmem:[#allocation3 + $0x7b8] sm:$0xff] }
 0x12e   :  { %v1405_v6 = vmul.f32 0.5, %v2106_v2  ;;  %2115 = vtanh.f32 %v1442_v22  ;;  %v1466_v29 = vmul.f32 0.5, %v1462_v48  ;;  %v3029_v50 = vadd.f32 %v1384_v47, %v2981_v32  ;;  %v1534_v48 = vld [vmem:[#allocation3 + $0x7c0] sm:$0xff] }
 0x12f   :  { %v1406_v52 = vadd.f32 0.5, %v1402_v28  ;;  %2117 = vtanh.f32 %v1443_v19  ;;  %v1467_v0 = vmul.f32 0.5, %v1463_v23  ;;  %v3032_v54 = vadd.f32 %v1385_v57, %v2984_v18  ;;  %v1536_v23 = vld [vmem:[#allocation3 + $0x7d0] sm:$0xff] }
 0x130   :  { %v2108_v12 = vpop.eup %2107  ;;  %v1407_v8 = vadd.f32 0.5, %v1403_v27  ;;  %2119 = vtanh.f32 %v1444_v58  ;;  %v1468_v26 = vmul.f32 0.5, %v1464_v41  ;;  %v1408_v35 = vadd.f32 0.5, %v1404_v33  ;;  %v1535_v58 = vld [vmem:[#allocation3 + $0x7c8] sm:$0xff]  ;;  %v1537_v41 = vld [vmem:[#allocation3 + $0x7d8] sm:$0xff] }
 0x131   :  { %v2110_v11 = vpop.eup %2109  ;;  %v1426_v15 = vmul.f32 0.5, %v2108_v12  ;;  %2121 = vtanh.f32 %v1445_v56  ;;  %v1469_v46 = vmul.f32 0.5, %v1465_v38  ;;  %v1409_v16 = vadd.f32 0.5, %v1405_v6 }
 0x132   :  { %v2112_v32 = vpop.eup %2111  ;;  %v1427_v31 = vmul.f32 0.5, %v2110_v11  ;;  %2123 = vtanh.f32 %v1466_v29  ;;  %v1490_v25 = vmul.f32 0.5, %v1486_v43  ;;  %v1491_v18 = vmul.f32 0.5, %v1487_v61  ;;  %v1558_v29 = vld [vmem:[#allocation3 + $0x7e0] sm:$0xff]  ;;  %v1560_v11 = vld [vmem:[#allocation3 + $0x7f0] sm:$0xff] }
 0x133   :  { %v2114_v30 = vpop.eup %2113  ;;  %v1428_v20 = vmul.f32 0.5, %v2112_v32  ;;  %2125 = vtanh.f32 %v1467_v0  ;;  %v1492_v62 = vmul.f32 0.5, %v1488_v42  ;;  %v1430_v44 = vadd.f32 0.5, %v1426_v15 }
 0x134   :  { %v1429_v5 = vmul.f32 0.5, %v2114_v30  ;;  %v1431_v24 = vadd.f32 0.5, %v1427_v31  ;;  %2127 = vtanh.f32 %v1468_v26  ;;  %v3035_v51 = vadd.f32 %v1406_v52, %v2987_v17 }
 0x135   :  { %v1432_v21 = vadd.f32 0.5, %v1428_v20  ;;  %2129 = vtanh.f32 %v1469_v46  ;;  %v1493_v55 = vmul.f32 0.5, %v1489_v4  ;;  %v3038_v36 = vadd.f32 %v1407_v8, %v2990_v1  ;;  %v1559_v8 = vld [vmem:[#allocation3 + $0x7e8] sm:$0xff] }
 0x136   :  { %v1433_v22 = vadd.f32 0.5, %v1429_v5  ;;  %2131 = vtanh.f32 %v1490_v25  ;;  %v1514_v47 = vmul.f32 0.5, %v1510_v13  ;;  %v3041_v28 = vadd.f32 %v1408_v35, %v2993_v7  ;;  %v1561_v35 = vld [vmem:[#allocation3 + $0x7f8] sm:$0xff] }
 0x137   :  { %v3044_v19 = vadd.f32 %v1409_v16, %v2996_v10  ;;  %2133 = vtanh.f32 %v1491_v18  ;;  %v1515_v17 = vmul.f32 0.5, %v1511_v37  ;;  %v3047_v57 = vadd.f32 %v1430_v44, %v2999_v34 }
 0x138   :  { %v2116_v2 = vpop.eup %2115  ;;  %v3050_v1 = vadd.f32 %v1431_v24, %v3002_v9  ;;  %2135 = vtanh.f32 %v1492_v62  ;;  %v1516_v27 = vmul.f32 0.5, %v1512_v39  ;;  %v3053_v7 = vadd.f32 %v1432_v21, %v3005_v63 }
 0x139   :  { %v2118_v33 = vpop.eup %2117  ;;  %v1450_v10 = vmul.f32 0.5, %v2116_v2  ;;  %2137 = vtanh.f32 %v1493_v55  ;;  %v1517_v56 = vmul.f32 0.5, %v1513_v14  ;;  %v3056_v38 = vadd.f32 %v1433_v22, %v3008_v3 }
 0x13a   :  { %v2120_v6 = vpop.eup %2119  ;;  %v1451_v34 = vmul.f32 0.5, %v2118_v33  ;;  %2139 = vtanh.f32 %v1514_v47  ;;  %v1538_v9 = vmul.f32 0.5, %v1534_v48  ;;  %v1539_v43 = vmul.f32 0.5, %v1535_v58 }
 0x13b   :  { %v2122_v52 = vpop.eup %2121  ;;  %v1452_v0 = vmul.f32 0.5, %v2120_v6  ;;  %2141 = vtanh.f32 %v1515_v17  ;;  %v1540_v12 = vmul.f32 0.5, %v1536_v23  ;;  %v1454_v61 = vadd.f32 0.5, %v1450_v10 }
 0x13c   :  { %v2124_v63 = vpop.eup %2123  ;;  %v1453_v26 = vmul.f32 0.5, %v2122_v52  ;;  %2143 = vtanh.f32 %v1516_v27  ;;  %v1541_v42 = vmul.f32 0.5, %v1537_v41  ;;  %v1455_v3 = vadd.f32 0.5, %v1451_v34 }
 0x13d   :  { %v2126_v15 = vpop.eup %2125  ;;  %v1456_v46 = vadd.f32 0.5, %v1452_v0  ;;  %2145 = vtanh.f32 %v1517_v56  ;;  %v1562_v32 = vmul.f32 0.5, %v1558_v29  ;;  %v1474_v31 = vmul.f32 0.5, %v2124_v63 }
 0x13e   :  { %v2128_v16 = vpop.eup %2127  ;;  %v1475_v4 = vmul.f32 0.5, %v2126_v15  ;;  %2147 = vtanh.f32 %v1538_v9  ;;  %v1563_v25 = vmul.f32 0.5, %v1559_v8  ;;  %v1564_v18 = vmul.f32 0.5, %v1560_v11 }
 0x13f   :  { %v2130_v30 = vpop.eup %2129  ;;  %v1476_v20 = vmul.f32 0.5, %v2128_v16  ;;  %2149 = vtanh.f32 %v1539_v43  ;;  %v1565_v62 = vmul.f32 0.5, %v1561_v35  ;;  %v1457_v5 = vadd.f32 0.5, %v1453_v26 }
 0x140   :  { %v2132_v13 = vpop.eup %2131  ;;  %v3059_v44 = vadd.f32 %v1454_v61, %v3011_v40  ;;  %v1477_v24 = vmul.f32 0.5, %v2130_v30  ;;  %2151 = vtanh.f32 %v1540_v12  ;;  %v3062_v21 = vadd.f32 %v1455_v3, %v3014_v45 }
 0x141   :  { %v2134_v37 = vpop.eup %2133  ;;  %v3065_v55 = vadd.f32 %v1456_v46, %v3017_v60  ;;  %v1498_v39 = vmul.f32 0.5, %v2132_v13  ;;  %2153 = vtanh.f32 %v1541_v42  ;;  %v1478_v14 = vadd.f32 0.5, %v1474_v31 }
 0x142   :  { %v2136_v22 = vpop.eup %2135  ;;  %v1479_v47 = vadd.f32 0.5, %v1475_v4  ;;  %v1499_v17 = vmul.f32 0.5, %v2134_v37  ;;  %2155 = vtanh.f32 %v1562_v32  ;;  %v1480_v2 = vadd.f32 0.5, %v1476_v20 }
 0x143   :  { %v2138_v48 = vpop.eup %2137  ;;  %v1500_v40 = vmul.f32 0.5, %v2136_v22  ;;  %v1502_v27 = vadd.f32 0.5, %v1498_v39  ;;  %2157 = vtanh.f32 %v1563_v25  ;;  %v1481_v23 = vadd.f32 0.5, %v1477_v24 }
 0x144   :  { %v2140_v58 = vpop.eup %2139  ;;  %v1501_v33 = vmul.f32 0.5, %v2138_v48  ;;  %v1503_v45 = vadd.f32 0.5, %v1499_v17  ;;  %2159 = vtanh.f32 %v1564_v18  ;;  %v1461_v60 = vadd.f32 %v1457_v5, %v3020_v49 }
 0x145   :  { %v2142_v10 = vpop.eup %2141  ;;  %v1504_v56 = vadd.f32 0.5, %v1500_v40  ;;  %v1522_v41 = vmul.f32 0.5, %v2140_v58  ;;  %2161 = vtanh.f32 %v1565_v62  ;;  %v1482_v34 = vadd.f32 %v1478_v14, %v3023_v53 }
 0x146   :  { %v2144_v6 = vpop.eup %2143  ;;  %v1483_v9 = vadd.f32 %v1479_v47, %v3026_v59  ;;  %v1505_v29 = vadd.f32 0.5, %v1501_v33  ;;  %v1523_v52 = vmul.f32 0.5, %v2142_v10  ;;  %v1484_v43 = vadd.f32 %v1480_v2, %v3029_v50 }
 0x147   :  { %v2146_v0 = vpop.eup %2145  ;;  %v1506_v12 = vadd.f32 %v1502_v27, %v3035_v51  ;;  %v1524_v8 = vmul.f32 0.5, %v2144_v6  ;;  %v1526_v63 = vadd.f32 0.5, %v1522_v41  ;;  %v1485_v49 = vadd.f32 %v1481_v23, %v3032_v54 }
 0x148   :  { %v2148_v26 = vpop.eup %2147  ;;  %v1507_v61 = vadd.f32 %v1503_v45, %v3038_v36  ;;  %v1525_v42 = vmul.f32 0.5, %v2146_v0  ;;  %v1527_v11 = vadd.f32 0.5, %v1523_v52  ;;  %v1508_v53 = vadd.f32 %v1504_v56, %v3041_v28 }
 0x149   :  { %v2150_v35 = vpop.eup %2149  ;;  %v1528_v59 = vadd.f32 0.5, %v1524_v8  ;;  %v1530_v15 = vadd.f32 %v1526_v63, %v3047_v57  ;;  %v1546_v3 = vmul.f32 0.5, %v2148_v26  ;;  %v1509_v50 = vadd.f32 %v1505_v29, %v3044_v19 }
 0x14a   :  { %v2152_v46 = vpop.eup %2151  ;;  %v1529_v51 = vadd.f32 0.5, %v1525_v42  ;;  %v1531_v32 = vadd.f32 %v1527_v11, %v3050_v1  ;;  %v1547_v16 = vmul.f32 0.5, %v2150_v35 }
 0x14b   :  { %v2154_v31 = vpop.eup %2153  ;;  %v1532_v54 = vadd.f32 %v1528_v59, %v3053_v7  ;;  %v1548_v36 = vmul.f32 0.5, %v2152_v46  ;;  %v1550_v4 = vadd.f32 0.5, %v1546_v3  ;;  %v1582_v25 = vadd.f32 %v1530_v15, %v1506_v12 }
 0x14c   :  { %v2156_v30 = vpop.eup %2155  ;;  %v1533_v28 = vadd.f32 %v1529_v51, %v3056_v38  ;;  %v1549_v20 = vmul.f32 0.5, %v2154_v31  ;;  %v1551_v18 = vadd.f32 0.5, %v1547_v16  ;;  %v1583_v57 = vadd.f32 %v1531_v32, %v1507_v61 }
 0x14d   :  { %v2158_v62 = vpop.eup %2157  ;;  %v1552_v13 = vadd.f32 0.5, %v1548_v36  ;;  %v1554_v19 = vadd.f32 %v1550_v4, %v3059_v44  ;;  %v1570_v5 = vmul.f32 0.5, %v2156_v30  ;;  %v1584_v24 = vadd.f32 %v1532_v54, %v1508_v53 }
 0x14e   :  { %v2160_v1 = vpop.eup %2159  ;;  %v1553_v37 = vadd.f32 0.5, %v1549_v20  ;;  %v1555_v39 = vadd.f32 %v1551_v18, %v3062_v21  ;;  %v1571_v7 = vmul.f32 0.5, %v2158_v62  ;;  %v1585_v22 = vadd.f32 %v1533_v28, %v1509_v50 }
 0x14f   :  { %v2162_v14 = vpop.eup %2161  ;;  %v1556_v47 = vadd.f32 %v1552_v13, %v3065_v55  ;;  %v1572_v17 = vmul.f32 0.5, %v2160_v1  ;;  %v1574_v38 = vadd.f32 0.5, %v1570_v5  ;;  %v1586_v48 = vadd.f32 %v1582_v25, %v1554_v19 }
 0x150   :  { %v1557_v2 = vadd.f32 %v1553_v37, %v1461_v60  ;;  %v1573_v40 = vmul.f32 0.5, %v2162_v14  ;;  %v1575_v27 = vadd.f32 0.5, %v1571_v7  ;;  %v1587_v58 = vadd.f32 %v1583_v57, %v1555_v39 }
 0x151   :  { %v1576_v23 = vadd.f32 0.5, %v1572_v17  ;;  %v1578_v44 = vadd.f32 %v1574_v38, %v1482_v34  ;;  %v1588_v33 = vadd.f32 %v1584_v24, %v1556_v47 }
 0x152   :  { %v1577_v45 = vadd.f32 0.5, %v1573_v40  ;;  %v1579_v10 = vadd.f32 %v1575_v27, %v1483_v9  ;;  %v1589_v56 = vadd.f32 %v1585_v22, %v1557_v2 }
 0x153   :  { %v1580_v41 = vadd.f32 %v1576_v23, %v1484_v43  ;;  %v1590_v21 = vadd.f32 %v1586_v48, %v1578_v44 }
 0x154   :  { %v1581_v6 = vadd.f32 %v1577_v45, %v1485_v49  ;;  %v1591_v29 = vadd.f32 %v1587_v58, %v1579_v10 }
 0x155   :  { %v1592_v52 = vadd.f32 %v1588_v33, %v1580_v41 }
 0x156   :  { %v1593_v0 = vadd.f32 %v1589_v56, %v1581_v6  ;;  %v1613_v55 = vadd.f32 %v1591_v29, %v1590_v21 }
 0x158   :  { %v1614_v12 = vadd.f32 %v1613_v55, %v1592_v52 }
 0x15a   :  { %v1615_v8 = vadd.f32 %v1614_v12, %v1593_v0 }
 0x15c   :  { %1616 = vadd.xlane.f32.xlu0 %v1615_v8 }
 0x1e9   :  { %v1617_v60 = vpop.xlane.xlu0 %1616 }
 0x1ea   :  { %v1618_v63 = vrot.slane %v1617_v60, 4 }
 0x1ec   :  { %v1619_v26 = vadd.f32 %v1618_v63, %v1617_v60 }
 0x1ee   :  { %v1620_v61 = vrot.slane %v1619_v26, 2 }
 0x1f0   :  { %v1621_v42 = vadd.f32 %v1620_v61, %v1619_v26 }
 0x1f2   :  { %v1622_v34 = vrot.slane %v1621_v42, 1 }
 0x1f4   :  { %v1623_v11 = vadd.f32 %v1622_v34, %v1621_v42 }
 0x1f6   :  { %1645 = vpush %v1623_v11 }
 0x227   :  { %s1646_s21 = spop %1645 }
 0x228   :  { %v1625_v9 = vstv %s1646_s21 }
 0x229   :  { %1627 = vst.msk [vmem:[#allocation6] sm:$0x1] %vm1626_vm0, %v1625_v9 }
 0x22a   :  { %2196 = shalt.err (!%p2193_p12)
}
 0x22b   :  { %s2197_s26 = scalar_lea.hbm %s3096_s1, 16 }
 0x22c   :  { %p2198_p13 = scmp.ne.s32.totalorder %s3096_s1, %s2197_s26  ;;  %p2201_p0 = scmp.lt.u32.totalorder %s2197_s26, %s3096_s1 }
 0x22e   :  { %p2203_p1 = pnand %p2201_p0, %p2198_p13 }
 0x230   :  { %2206 = shalt.err (!%p2203_p1)
}
 0x231   :  { %1637 = dma.vmem_to_hbm [thread:$0]  %s1635_s20, 16, %s3096_s1, [#allocation5]  }
 0x232   :  { %2209 = dma.done.wait [#allocation5], 16  }
 0x233   :  { %2210 = vsyncadd [#allocation5], 4294967280 }
 0x234   :  { %1641 = vsyncpa [#allocation4], 1 }
 0x235   :  { %1642 = vsyncpa [#allocation5], 1 }

</bundles_post_ra>
